<compile_context>
chip_gen: v6e
topology: v6e:2x2x1
jax: 0.10.0
libtpu: 0.0.40
codegen_flags: <defaults>
</compile_context>

<pallas_src>
import functools
import numpy as np

import jax
import jax.numpy as jnp
from jax.experimental import pallas as pl
from jax.experimental.pallas import tpu as pltpu


# ----------------------------------------------------------------------------
# Trace-time, generation-aware tile / VMEM budget
# ----------------------------------------------------------------------------

@functools.lru_cache(maxsize=1)
def _budget():
    try:
        vmem = int(pltpu.get_tpu_info().vmem_capacity_bytes)
    except Exception:
        vmem = 64 * 1024 * 1024                     # assume smallest (v7x)
    if vmem >= 128 * 1024 * 1024:                   # v5e / v6e
        return dict(tile_m=512, tile_n=1024, tile_k=512,
                    weight_budget=24 << 20, vmem_limit=100 << 20, attn_group=8)
    # v7x: 64 MiB physical VMEM per TensorCore — keep tiles and limit small.
    return dict(tile_m=256, tile_n=512, tile_k=512,
                weight_budget=12 << 20, vmem_limit=44 << 20, attn_group=4)


# ----------------------------------------------------------------------------
# In-kernel exact GELU (erf via Abramowitz–Stegun 7.1.26, |err| < 1.5e-7)
# ----------------------------------------------------------------------------

def _erf(x):
    a1, a2, a3, a4, a5 = (0.254829592, -0.284496736, 1.421413741,
                          -1.453152027, 1.061405429)
    p = 0.3275911
    s = jnp.where(x < 0.0, -1.0, 1.0)
    ax = jnp.abs(x)
    t = 1.0 / (1.0 + p * ax)
    y = 1.0 - ((((a5 * t + a4) * t + a3) * t + a2) * t + a1) * t * jnp.exp(-ax * ax)
    return s * y


def _gelu_exact(x):
    return 0.5 * x * (1.0 + _erf(x * 0.7071067811865476))


# ----------------------------------------------------------------------------
# Fused (LayerNorm?) -> matmul(+bias) -> (GELU?) -> (+residual?) kernel
# ----------------------------------------------------------------------------

def _fused_matmul_kernel(*refs, nsteps_k, do_ln, do_gelu, do_residual, eps):
    it = iter(refs)
    x_ref = next(it)
    w_ref = next(it)
    b_ref = next(it)
    g_ref = next(it) if do_ln else None
    bt_ref = next(it) if do_ln else None
    r_ref = next(it) if do_residual else None
    o_ref = next(it)
    acc_ref = next(it) if nsteps_k > 1 else None

    x = x_ref[...]
    if do_ln:
        # LayerNorm in f32 on the full feature dim (K is never tiled when fused).
        xf = x.astype(jnp.float32)
        mu = jnp.mean(xf, axis=-1, keepdims=True)
        xc = xf - mu
        var = jnp.mean(xc * xc, axis=-1, keepdims=True)
        xn = (xc * jax.lax.rsqrt(var + eps) * g_ref[...].astype(jnp.float32)
              + bt_ref[...].astype(jnp.float32))
        xb = xn.astype(jnp.bfloat16)
    else:
        xb = x.astype(jnp.bfloat16)

    partial_dot = jnp.dot(xb, w_ref[...], preferred_element_type=jnp.float32)

    def _epilogue(acc):
        out = acc + b_ref[...].astype(jnp.float32)
        if do_gelu:
            out = _gelu_exact(out)
        if do_residual:
            out = out + r_ref[...].astype(jnp.float32)
        o_ref[...] = out.astype(o_ref.dtype)

    if nsteps_k == 1:
        # Single K step: no VMEM accumulator / scratch needed at all.
        _epilogue(partial_dot)
    else:
        k = pl.program_id(2)

        @pl.when(k == 0)
        def _init():
            acc_ref[...] = jnp.zeros_like(acc_ref)

        acc_ref[...] += partial_dot

        @pl.when(k == nsteps_k - 1)
        def _fin():
            _epilogue(acc_ref[...])


def fused_linear(x, w, b, *, ln=None, gelu=False, residual=None, eps=1e-6,
                 out_dtype=jnp.float32):
    """(LN(x) if ln) @ w + b, optionally GELU'd and/or added to `residual`.

    x: (M, K) f32/bf16, w: (K, N) (cast to bf16), b: (N,) f32,
    ln: optional (gamma, beta) each (K,), residual: optional (M, N) f32.
    """
    budget = _budget()
    M, K = x.shape
    N = w.shape[1]
    if w.dtype != jnp.bfloat16:
        w = w.astype(jnp.bfloat16)

    bm = M if M <= budget["tile_m"] else budget["tile_m"]
    weight_fits = K * N * 2 <= budget["weight_budget"]
    if ln is not None:
        bk = K                                   # LN needs the whole feature dim
        bn = N if (weight_fits or N <= budget["tile_n"]) else budget["tile_n"]
    elif weight_fits:
        bk, bn = K, N                            # weight-resident: W from HBM once
    else:
        bn = N if N <= budget["tile_n"] else budget["tile_n"]
        bk = (budget["tile_k"]
              if (K > budget["tile_k"] and K % budget["tile_k"] == 0) else K)

    nk = K // bk
    grid = (pl.cdiv(M, bm), pl.cdiv(N, bn), nk)

    in_specs = [
        pl.BlockSpec((bm, bk), lambda i, j, k: (i, k)),
        pl.BlockSpec((bk, bn), lambda i, j, k: (k, j)),
        pl.BlockSpec((1, bn), lambda i, j, k: (0, j)),
    ]
    args = [x, w, b.reshape(1, N)]
    if ln is not None:
        gamma, beta = ln
        in_specs += [pl.BlockSpec((1, bk), lambda i, j, k: (0, k)),
                     pl.BlockSpec((1, bk), lambda i, j, k: (0, k))]
        args += [gamma.reshape(1, K), beta.reshape(1, K)]
    if residual is not None:
        in_specs.append(pl.BlockSpec((bm, bn), lambda i, j, k: (i, j)))
        args.append(residual)

    scratch = [] if nk == 1 else [pltpu.VMEM((bm, bn), jnp.float32)]

    kernel = functools.partial(
        _fused_matmul_kernel, nsteps_k=nk, do_ln=ln is not None,
        do_gelu=gelu, do_residual=residual is not None, eps=eps)

    return pl.pallas_call(
        kernel,
        out_shape=jax.ShapeDtypeStruct((M, N), out_dtype),
        grid=grid,
        in_specs=in_specs,
        out_specs=pl.BlockSpec((bm, bn), lambda i, j, k: (i, j)),
        scratch_shapes=scratch,
        compiler_params=pltpu.CompilerParams(
            dimension_semantics=("parallel", "parallel", "arbitrary"),
            vmem_limit_bytes=budget["vmem_limit"]),
    )(*args)


# ----------------------------------------------------------------------------
# Multi-head attention on the packed qkv tensor (no standalone transposes)
# ----------------------------------------------------------------------------

def _attention_heads(q_slab, k_slab, v_slab, o_ref, n_heads, head_dim, scale):
    """Per-head attention on contiguous head slabs; writes straight into o_ref."""
    for h in range(n_heads):                               # static, small
        lo, hi = h * head_dim, (h + 1) * head_dim
        q = q_slab[:, :, lo:hi].astype(jnp.float32) * scale   # fold scale into q
        k = k_slab[:, :, lo:hi]
        v = v_slab[:, :, lo:hi]
        s = jnp.einsum("bqd,bkd->bqk", q.astype(jnp.bfloat16),
                       k.astype(jnp.bfloat16),
                       preferred_element_type=jnp.float32)
        m = jnp.max(s, axis=-1, keepdims=True)
        p = jnp.exp(s - m)
        p = p * pl.reciprocal(jnp.sum(p, axis=-1, keepdims=True), approx=True)
        out = jnp.einsum("bqk,bkd->bqd", p.astype(jnp.bfloat16),
                         v.astype(jnp.bfloat16),
                         preferred_element_type=jnp.float32)
        o_ref[:, :, lo:hi] = out.astype(o_ref.dtype)


def _attention_group_kernel(q_ref, k_ref, v_ref, o_ref, *, heads_per_group,
                            head_dim, scale):
    _attention_heads(q_ref[...], k_ref[...], v_ref[...], o_ref,
                     heads_per_group, head_dim, scale)


def _attention_packed_kernel(qkv_ref, o_ref, *, num_heads, head_dim, scale):
    D = num_heads * head_dim
    qkv = qkv_ref[...]
    _attention_heads(qkv[:, :, 0:D], qkv[:, :, D:2 * D], qkv[:, :, 2 * D:3 * D],
                     o_ref, num_heads, head_dim, scale)


def _pick_batch_group(B, cap):
    g = min(B, cap)
    while B % g:
        g -= 1
    # Prefer >= 2 batch-grid steps so work shards across v7x's 2 TensorCores.
    while g > 1 and B // g < 2:
        g -= 1
        while B % g:
            g -= 1
    return max(g, 1)


def attention(qkv, num_heads, *, out_dtype=jnp.bfloat16):
    """qkv: (B, L, 3D) -> (B, L, D) (timm Attention; qkv bias already added)."""
    budget = _budget()
    B, L, threeD = qkv.shape
    D = threeD // 3
    Dh = D // num_heads
    scale = float(Dh) ** -0.5
    G = _pick_batch_group(B, budget["attn_group"])

    # Head-group split via BlockSpec when the group width is lane-aligned (128).
    hg = 0
    if Dh % 128 == 0:
        hg = 1
    elif 128 % Dh == 0 and num_heads % (128 // Dh) == 0:
        hg = 128 // Dh

    if hg:
        Wg = hg * Dh
        n_groups = num_heads // hg
        koff, voff = D // Wg, 2 * D // Wg
        kernel = functools.partial(_attention_group_kernel, heads_per_group=hg,
                                   head_dim=Dh, scale=scale)
        return pl.pallas_call(
            kernel,
            out_shape=jax.ShapeDtypeStruct((B, L, D), out_dtype),
            grid=(B // G, n_groups),
            in_specs=[
                pl.BlockSpec((G, L, Wg), lambda b, g: (b, 0, g)),
                pl.BlockSpec((G, L, Wg), lambda b, g, o=koff: (b, 0, o + g)),
                pl.BlockSpec((G, L, Wg), lambda b, g, o=voff: (b, 0, o + g)),
            ],
            out_specs=pl.BlockSpec((G, L, Wg), lambda b, g: (b, 0, g)),
            compiler_params=pltpu.CompilerParams(
                dimension_semantics=("parallel", "parallel"),
                vmem_limit_bytes=budget["vmem_limit"]),
        )(qkv, qkv, qkv)

    # Fallback (tiny / non-lane-aligned model dims): whole packed qkv per block,
    # heads sliced in-kernel but still written per-head straight into o_ref.
    kernel = functools.partial(_attention_packed_kernel, num_heads=num_heads,
                               head_dim=Dh, scale=scale)
    return pl.pallas_call(
        kernel,
        out_shape=jax.ShapeDtypeStruct((B, L, D), out_dtype),
        grid=(B // G,),
        in_specs=[pl.BlockSpec((G, L, threeD), lambda b: (b, 0, 0))],
        out_specs=pl.BlockSpec((G, L, D), lambda b: (b, 0, 0)),
        compiler_params=pltpu.CompilerParams(
            dimension_semantics=("parallel",),
            vmem_limit_bytes=budget["vmem_limit"]),
    )(qkv)


# ----------------------------------------------------------------------------
# MAE reconstruction loss (masked mean of per-patch MSE), row-tiled
# ----------------------------------------------------------------------------

def _mae_loss_kernel(pred_ref, tgt_ref, mask_ref, loss_ref, num_ref, den_ref,
                     *, total_rows, block_rows):
    i = pl.program_id(0)

    @pl.when(i == 0)
    def _init():
        num_ref[...] = jnp.zeros_like(num_ref)
        den_ref[...] = jnp.zeros_like(den_ref)

    rid = (jax.lax.broadcasted_iota(jnp.int32, (block_rows, 1), 0)
           + i * block_rows)
    valid = rid < total_rows

    d = pred_ref[...] - tgt_ref[...]
    per = jnp.mean(d * d, axis=-1, keepdims=True)          # (bm, 1)
    per = jnp.where(valid, per, 0.0)                       # mask padded rows
    m = jnp.where(valid, mask_ref[...], 0.0)

    num_ref[...] += jnp.sum(per * m, keepdims=True)
    den_ref[...] += jnp.sum(m, keepdims=True)

    @pl.when(i == pl.num_programs(0) - 1)
    def _fin():
        # Faithful to the reference: divides by mask.sum() with no guard
        # (NaN in the degenerate all-visible case, same as PyTorch).
        loss_ref[...] = num_ref[...] / den_ref[...]


def mae_loss(pred, target, mask):
    budget = _budget()
    B, L, P = pred.shape
    rows = B * L
    predf = pred.reshape(rows, P)
    tgtf = target.reshape(rows, P)
    maskf = mask.reshape(rows, 1)

    cap = 4 * budget["tile_m"]                 # 2048 (v5e/v6e) / 1024 (v7x)
    bm = rows if rows <= cap else cap          # cap is a multiple of 8
    grid = (pl.cdiv(rows, bm),)

    kernel = functools.partial(_mae_loss_kernel, total_rows=rows, block_rows=bm)
    loss = pl.pallas_call(
        kernel,
        out_shape=jax.ShapeDtypeStruct((1, 1), jnp.float32),
        grid=grid,
        in_specs=[pl.BlockSpec((bm, P), lambda i: (i, 0)),
                  pl.BlockSpec((bm, P), lambda i: (i, 0)),
                  pl.BlockSpec((bm, 1), lambda i: (i, 0))],
        out_specs=pl.BlockSpec((1, 1), lambda i: (0, 0)),
        scratch_shapes=[pltpu.VMEM((1, 1), jnp.float32),
                        pltpu.VMEM((1, 1), jnp.float32)],
        compiler_params=pltpu.CompilerParams(
            dimension_semantics=("arbitrary",),
            vmem_limit_bytes=budget["vmem_limit"]),
    )(predf, tgtf, maskf)
    return loss[0, 0]


# ----------------------------------------------------------------------------
# Sin-cos positional embeddings (same as MAE reference, computed in numpy)
# ----------------------------------------------------------------------------

def get_1d_sincos_pos_embed_from_grid(embed_dim, pos):
    omega = np.arange(embed_dim // 2, dtype=np.float64)
    omega /= embed_dim / 2.0
    omega = 1.0 / 10000 ** omega
    pos = pos.reshape(-1)
    out = np.einsum("m,d->md", pos, omega)
    return np.concatenate([np.sin(out), np.cos(out)], axis=1)


def get_2d_sincos_pos_embed(embed_dim, grid_size, cls_token=False):
    grid_h = np.arange(grid_size, dtype=np.float64)
    grid_w = np.arange(grid_size, dtype=np.float64)
    grid = np.meshgrid(grid_w, grid_h)
    grid = np.stack(grid, axis=0).reshape([2, 1, grid_size, grid_size])
    emb_h = get_1d_sincos_pos_embed_from_grid(embed_dim // 2, grid[0])
    emb_w = get_1d_sincos_pos_embed_from_grid(embed_dim // 2, grid[1])
    pos_embed = np.concatenate([emb_h, emb_w], axis=1)
    if cls_token:
        pos_embed = np.concatenate([np.zeros([1, embed_dim]), pos_embed], axis=0)
    return pos_embed.astype(np.float32)


# ----------------------------------------------------------------------------
# Parameter initialization (deterministic, synthetic; matmul weights in bf16)
# ----------------------------------------------------------------------------

class KeyGen:
    def __init__(self, key):
        self._key = key

    def __call__(self):
        self._key, k = jax.random.split(self._key)
        return k


def xavier_uniform(key, shape, dtype=jnp.float32):
    fan_in, fan_out = shape
    limit = float(np.sqrt(6.0 / (fan_in + fan_out)))
    return jax.random.uniform(key, shape, jnp.float32, -limit, limit).astype(dtype)


def init_block(kg, dim, mlp_ratio):
    hidden = int(dim * mlp_ratio)
    wdt = jnp.bfloat16
    return dict(
        norm1_w=jnp.ones((dim,), jnp.float32),
        norm1_b=jnp.zeros((dim,), jnp.float32),
        qkv_w=xavier_uniform(kg(), (dim, 3 * dim), wdt),
        qkv_b=jnp.zeros((3 * dim,), jnp.float32),
        proj_w=xavier_uniform(kg(), (dim, dim), wdt),
        proj_b=jnp.zeros((dim,), jnp.float32),
        norm2_w=jnp.ones((dim,), jnp.float32),
        norm2_b=jnp.zeros((dim,), jnp.float32),
        fc1_w=xavier_uniform(kg(), (dim, hidden), wdt),
        fc1_b=jnp.zeros((hidden,), jnp.float32),
        fc2_w=xavier_uniform(kg(), (hidden, dim), wdt),
        fc2_b=jnp.zeros((dim,), jnp.float32),
    )


def init_mae_params(key, cfg):
    kg = KeyGen(key)
    C, p = cfg["in_chans"], cfg["patch_size"]
    E, DE = cfg["embed_dim"], cfg["decoder_embed_dim"]
    grid_size = cfg["img_size"] // p
    wdt = jnp.bfloat16

    return dict(
        patch_w=xavier_uniform(kg(), (C * p * p, E), wdt),   # conv-as-matmul
        patch_b=jnp.zeros((E,), jnp.float32),
        cls_token=0.02 * jax.random.normal(kg(), (1, 1, E), jnp.float32),
        pos_embed=jnp.asarray(
            get_2d_sincos_pos_embed(E, grid_size, cls_token=True))[None],
        blocks=[init_block(kg, E, cfg["mlp_ratio"]) for _ in range(cfg["depth"])],
        norm_w=jnp.ones((E,), jnp.float32),
        norm_b=jnp.zeros((E,), jnp.float32),
        dec_embed_w=xavier_uniform(kg(), (E, DE), wdt),
        dec_embed_b=jnp.zeros((DE,), jnp.float32),
        mask_token=0.02 * jax.random.normal(kg(), (1, 1, DE), jnp.float32),
        dec_pos_embed=jnp.asarray(
            get_2d_sincos_pos_embed(DE, grid_size, cls_token=True))[None],
        dec_blocks=[init_block(kg, DE, cfg["mlp_ratio"])
                    for _ in range(cfg["decoder_depth"])],
        dec_norm_w=jnp.ones((DE,), jnp.float32),
        dec_norm_b=jnp.zeros((DE,), jnp.float32),
        dec_pred_w=xavier_uniform(kg(), (DE, p * p * C), wdt),
        dec_pred_b=jnp.zeros((p * p * C,), jnp.float32),
    )


# ----------------------------------------------------------------------------
# Model forward
# ----------------------------------------------------------------------------

def block_forward(x, bp, num_heads):
    """timm-style Block: x + Attn(LN1(x)); x + MLP(LN2(x)) — fully fused."""
    B, L, D = x.shape
    xf = x.reshape(B * L, D)                                 # f32 residual stream

    # LN1 + qkv projection (one kernel, bf16 out), attention on packed qkv.
    qkv = fused_linear(xf, bp["qkv_w"], bp["qkv_b"],
                       ln=(bp["norm1_w"], bp["norm1_b"]),
                       out_dtype=jnp.bfloat16)
    attn = attention(qkv.reshape(B, L, 3 * D), num_heads,
                     out_dtype=jnp.bfloat16)                 # (B, L, D) bf16

    # Output projection + residual (one kernel, f32 out: residual stream).
    x1 = fused_linear(attn.reshape(B * L, D), bp["proj_w"], bp["proj_b"],
                      residual=xf, out_dtype=jnp.float32)

    # LN2 + fc1 + exact GELU (one kernel, bf16 out), fc2 + residual (one kernel).
    h = fused_linear(x1, bp["fc1_w"], bp["fc1_b"],
                     ln=(bp["norm2_w"], bp["norm2_b"]), gelu=True,
                     out_dtype=jnp.bfloat16)
    x2 = fused_linear(h, bp["fc2_w"], bp["fc2_b"], residual=x1,
                      out_dtype=jnp.float32)
    return x2.reshape(B, L, D)


def patchify_target(imgs, p):
    """Reference MAE patchify (order h, w, p, q, c) for the loss target."""
    B, C, Hh, Ww = imgs.shape
    h = Hh // p
    x = imgs.reshape(B, C, h, p, h, p)
    x = x.transpose(0, 2, 4, 3, 5, 1)          # n h w p q c
    return x.reshape(B, h * h, p * p * C)


def extract_patches(imgs, p):
    """Patch extraction matching Conv2d(k=p, s=p) weight flatten order (c,i,j)."""
    B, C, Hh, Ww = imgs.shape
    h = Hh // p
    x = imgs.reshape(B, C, h, p, h, p)
    x = x.transpose(0, 2, 4, 1, 3, 5)          # n h w c p q
    return x.reshape(B, h * h, C * p * p)


def random_masking(x, mask_ratio, key):
    # TODO(synk): argsort/gather-based shuffling has no clean Pallas TPU
    # equivalent at these shapes; done in plain JAX (glue).
    N, L, D = x.shape
    len_keep = int(L * (1 - mask_ratio))
    noise = jax.random.uniform(key, (N, L), jnp.float32)
    ids_shuffle = jnp.argsort(noise, axis=1)
    ids_restore = jnp.argsort(ids_shuffle, axis=1)
    ids_keep = ids_shuffle[:, :len_keep]
    x_masked = jnp.take_along_axis(
        x, jnp.broadcast_to(ids_keep[:, :, None], (N, len_keep, D)), axis=1)
    mask = jnp.ones((N, L), jnp.float32).at[:, :len_keep].set(0.0)
    mask = jnp.take_along_axis(mask, ids_restore, axis=1)
    return x_masked, mask, ids_restore


def forward_encoder(imgs, params, cfg, mask_ratio, key):
    p = cfg["patch_size"]
    E = cfg["embed_dim"]
    B = imgs.shape[0]
    L = (cfg["img_size"] // p) ** 2

    patches = extract_patches(imgs, p)                               # (B, L, CPP)
    x = fused_linear(patches.reshape(B * L, -1), params["patch_w"],
                     params["patch_b"])
    x = x.reshape(B, L, E) + params["pos_embed"][:, 1:, :]

    x, mask, ids_restore = random_masking(x, mask_ratio, key)

    cls = params["cls_token"] + params["pos_embed"][:, :1, :]
    x = jnp.concatenate([jnp.broadcast_to(cls, (B, 1, E)), x], axis=1)

    for bp in params["blocks"]:
        x = block_forward(x, bp, cfg["num_heads"])

    # Final encoder LayerNorm is fused into decoder_embed (see forward_decoder).
    return x, mask, ids_restore


def forward_decoder(x, ids_restore, params, cfg):
    DE = cfg["decoder_embed_dim"]
    B, Lk, E = x.shape
    L = ids_restore.shape[1]

    # encoder norm (fused) + decoder embed in one kernel
    x = fused_linear(x.reshape(B * Lk, E), params["dec_embed_w"],
                     params["dec_embed_b"], ln=(params["norm_w"], params["norm_b"]))
    x = x.reshape(B, Lk, DE)

    mask_tokens = jnp.broadcast_to(params["mask_token"], (B, L + 1 - Lk, DE))
    x_ = jnp.concatenate([x[:, 1:, :], mask_tokens], axis=1)         # (B, L, DE)
    x_ = jnp.take_along_axis(
        x_, jnp.broadcast_to(ids_restore[:, :, None], (B, L, DE)), axis=1)
    x = jnp.concatenate([x[:, :1, :], x_], axis=1)                   # (B, L+1, DE)
    x = x + params["dec_pos_embed"]

    for bp in params["dec_blocks"]:
        x = block_forward(x, bp, cfg["decoder_num_heads"])

    # decoder norm (fused) + prediction head in one kernel
    x = fused_linear(x.reshape(B * (L + 1), DE), params["dec_pred_w"],
                     params["dec_pred_b"],
                     ln=(params["dec_norm_w"], params["dec_norm_b"]))
    x = x.reshape(B, L + 1, -1)
    return x[:, 1:, :]                                               # drop cls


def mae_forward(imgs, params, key, *, cfg, mask_ratio):
    latent, mask, ids_restore = forward_encoder(imgs, params, cfg, mask_ratio, key)
    pred = forward_decoder(latent, ids_restore, params, cfg)
    target = patchify_target(imgs, cfg["patch_size"])
    loss = mae_loss(pred, target, mask)        # norm_pix_loss=False (default)
    return loss, pred, mask


# ----------------------------------------------------------------------------
# Main
# ----------------------------------------------------------------------------

if __name__ == "__main__":
    cfg = dict(
        img_size=16,
        patch_size=4,
        in_chans=3,
        embed_dim=32,
        depth=2,
        num_heads=4,
        decoder_embed_dim=32,
        decoder_depth=1,
        decoder_num_heads=4,
        mlp_ratio=4.0,
    )

    root = jax.random.PRNGKey(0)
    k_params, k_imgs, k_mask = jax.random.split(root, 3)

    params = init_mae_params(k_params, cfg)
    imgs = jax.random.normal(
        k_imgs, (2, cfg["in_chans"], cfg["img_size"], cfg["img_size"]), jnp.float32)

    fwd = jax.jit(functools.partial(mae_forward, cfg=cfg, mask_ratio=0.75))
    loss, pred, mask = fwd(imgs, params, k_mask)
    jax.block_until_ready((loss, pred, mask))

    assert pred.shape == (2, 16, cfg["patch_size"] ** 2 * cfg["in_chans"])
    assert mask.shape == (2, 16)
    assert bool(jnp.isfinite(loss))

    print("KERNEL_OK")
</pallas_src>

<mosaic_0001>
module attributes {stable_mosaic.version = 11 : i64} {
  func.func @_fused_matmul_kernel(%arg0: i32, %arg1: i32, %arg2: i32, %arg3: memref<32x48xf32, #tpu.memory_space<vmem>>, %arg4: memref<48x32xbf16, #tpu.memory_space<vmem>>, %arg5: memref<1x32xf32, #tpu.memory_space<vmem>>, %arg6: memref<32x32xf32, #tpu.memory_space<vmem>>) attributes {dimension_semantics = [#tpu.dimension_semantics<parallel>, #tpu.dimension_semantics<parallel>, #tpu.dimension_semantics<arbitrary>], iteration_bounds = array<i64: 1, 1, 1>, scalar_prefetch = 0 : i64, scratch_operands = 0 : i64, tpu.core_type = #tpu.core_type<tc>, window_params = [{transform_indices = @transform_0, window_bounds = array<i64: 32, 48>}, {transform_indices = @transform_1, window_bounds = array<i64: 48, 32>}, {transform_indices = @transform_2, window_bounds = array<i64: 1, 32>}, {transform_indices = @transform_3, window_bounds = array<i64: 32, 32>}]} {
    %c0 = arith.constant 0 : index
    %c0_0 = arith.constant 0 : index
    %0 = vector.load %arg3[%c0, %c0_0] : memref<32x48xf32, #tpu.memory_space<vmem>>, vector<32x48xf32>
    %1 = arith.truncf %0 : vector<32x48xf32> to vector<32x48xbf16>
    %c0_1 = arith.constant 0 : index
    %c0_2 = arith.constant 0 : index
    %2 = vector.load %arg4[%c0_1, %c0_2] : memref<48x32xbf16, #tpu.memory_space<vmem>>, vector<48x32xbf16>
    %cst = arith.constant dense<0.000000e+00> : vector<32x32xf32>
    %3 = tpu.matmul %1, %2, %cst {dimension_numbers = #tpu.dot_dimension_numbers<[1], [0], [0], [1], [0, 0, 1, 1], [], []>} : vector<32x48xbf16>, vector<48x32xbf16>, vector<32x32xf32> -> vector<32x32xf32>
    %c0_3 = arith.constant 0 : index
    %c0_4 = arith.constant 0 : index
    %4 = vector.load %arg5[%c0_3, %c0_4] : memref<1x32xf32, #tpu.memory_space<vmem>>, vector<1x32xf32>
    %5 = vector.broadcast %4 : vector<1x32xf32> to vector<32x32xf32>
    %6 = arith.addf %3, %5 : vector<32x32xf32>
    %c0_5 = arith.constant 0 : index
    %c0_6 = arith.constant 0 : index
    %7 = vector.load %arg6[%c0_5, %c0_6] : memref<32x32xf32, #tpu.memory_space<vmem>>, vector<32x32xf32>
    tpu.vector_store %arg6[%c0_5, %c0_6], %6 {strides = array<i32>} : memref<32x32xf32, #tpu.memory_space<vmem>>, vector<32x32xf32>,
    return
  }
  func.func @transform_0(%arg0: i32, %arg1: i32, %arg2: i32) -> (i32, i32) {
    %c0_i32 = arith.constant 0 : i32
    return %arg0, %arg2 : i32, i32
  }
  func.func @transform_1(%arg0: i32, %arg1: i32, %arg2: i32) -> (i32, i32) {
    %c0_i32 = arith.constant 0 : i32
    return %arg2, %arg1 : i32, i32
  }
  func.func @transform_2(%arg0: i32, %arg1: i32, %arg2: i32) -> (i32, i32) {
    %c0_i32 = arith.constant 0 : i32
    %c0_i32_0 = arith.constant 0 : i32
    return %c0_i32, %arg1 : i32, i32
  }
  func.func @transform_3(%arg0: i32, %arg1: i32, %arg2: i32) -> (i32, i32) {
    %c0_i32 = arith.constant 0 : i32
    return %arg0, %arg1 : i32, i32
  }
}

module attributes {stable_mosaic.version = 11 : i64} {
  func.func @_fused_matmul_kernel(%arg0: i32, %arg1: i32, %arg2: i32, %arg3: memref<10x32xf32, #tpu.memory_space<vmem>>, %arg4: memref<32x96xbf16, #tpu.memory_space<vmem>>, %arg5: memref<1x96xf32, #tpu.memory_space<vmem>>, %arg6: memref<1x32xf32, #tpu.memory_space<vmem>>, %arg7: memref<1x32xf32, #tpu.memory_space<vmem>>, %arg8: memref<10x96xbf16, #tpu.memory_space<vmem>>) attributes {dimension_semantics = [#tpu.dimension_semantics<parallel>, #tpu.dimension_semantics<parallel>, #tpu.dimension_semantics<arbitrary>], iteration_bounds = array<i64: 1, 1, 1>, scalar_prefetch = 0 : i64, scratch_operands = 0 : i64, tpu.core_type = #tpu.core_type<tc>, window_params = [{transform_indices = @transform_0, window_bounds = array<i64: 10, 32>}, {transform_indices = @transform_1, window_bounds = array<i64: 32, 96>}, {transform_indices = @transform_2, window_bounds = array<i64: 1, 96>}, {transform_indices = @transform_3, window_bounds = array<i64: 1, 32>}, {transform_indices = @transform_4, window_bounds = array<i64: 1, 32>}, {transform_indices = @transform_5, window_bounds = array<i64: 10, 96>}]} {
    %c0 = arith.constant 0 : index
    %c0_0 = arith.constant 0 : index
    %0 = vector.load %arg3[%c0, %c0_0] : memref<10x32xf32, #tpu.memory_space<vmem>>, vector<10x32xf32>
    %cst = arith.constant dense<0.000000e+00> : vector<10xf32>
    %1 = vector.multi_reduction <add>, %0, %cst [1] : vector<10x32xf32> to vector<10xf32>
    %2 = vector.shape_cast %1 : vector<10xf32> to vector<10x1xf32>
    %cst_1 = arith.constant 3.200000e+01 : f32
    %3 = vector.broadcast %cst_1 : f32 to vector<10x1xf32>
    %4 = arith.divf %2, %3 : vector<10x1xf32>
    %5 = vector.broadcast %4 : vector<10x1xf32> to vector<10x32xf32>
    %6 = arith.subf %0, %5 : vector<10x32xf32>
    %7 = arith.mulf %6, %6 : vector<10x32xf32>
    %cst_2 = arith.constant dense<0.000000e+00> : vector<10xf32>
    %8 = vector.multi_reduction <add>, %7, %cst_2 [1] : vector<10x32xf32> to vector<10xf32>
    %9 = vector.shape_cast %8 : vector<10xf32> to vector<10x1xf32>
    %cst_3 = arith.constant 3.200000e+01 : f32
    %10 = vector.broadcast %cst_3 : f32 to vector<10x1xf32>
    %11 = arith.divf %9, %10 : vector<10x1xf32>
    %cst_4 = arith.constant 9.99999997E-7 : f32
    %12 = vector.broadcast %cst_4 : f32 to vector<10x1xf32>
    %13 = arith.addf %11, %12 : vector<10x1xf32>
    %14 = math.rsqrt %13 : vector<10x1xf32>
    %15 = vector.broadcast %14 : vector<10x1xf32> to vector<10x32xf32>
    %16 = arith.mulf %6, %15 : vector<10x32xf32>
    %c0_5 = arith.constant 0 : index
    %c0_6 = arith.constant 0 : index
    %17 = vector.load %arg6[%c0_5, %c0_6] : memref<1x32xf32, #tpu.memory_space<vmem>>, vector<1x32xf32>
    %18 = vector.broadcast %17 : vector<1x32xf32> to vector<10x32xf32>
    %19 = arith.mulf %16, %18 : vector<10x32xf32>
    %c0_7 = arith.constant 0 : index
    %c0_8 = arith.constant 0 : index
    %20 = vector.load %arg7[%c0_7, %c0_8] : memref<1x32xf32, #tpu.memory_space<vmem>>, vector<1x32xf32>
    %21 = vector.broadcast %20 : vector<1x32xf32> to vector<10x32xf32>
    %22 = arith.addf %19, %21 : vector<10x32xf32>
    %23 = arith.truncf %22 : vector<10x32xf32> to vector<10x32xbf16>
    %c0_9 = arith.constant 0 : index
    %c0_10 = arith.constant 0 : index
    %24 = vector.load %arg4[%c0_9, %c0_10] : memref<32x96xbf16, #tpu.memory_space<vmem>>, vector<32x96xbf16>
    %cst_11 = arith.constant dense<0.000000e+00> : vector<10x96xf32>
    %25 = tpu.matmul %23, %24, %cst_11 {dimension_numbers = #tpu.dot_dimension_numbers<[1], [0], [0], [1], [0, 0, 1, 1], [], []>} : vector<10x32xbf16>, vector<32x96xbf16>, vector<10x96xf32> -> vector<10x96xf32>
    %c0_12 = arith.constant 0 : index
    %c0_13 = arith.constant 0 : index
    %26 = vector.load %arg5[%c0_12, %c0_13] : memref<1x96xf32, #tpu.memory_space<vmem>>, vector<1x96xf32>
    %27 = vector.broadcast %26 : vector<1x96xf32> to vector<10x96xf32>
    %28 = arith.addf %25, %27 : vector<10x96xf32>
    %29 = arith.truncf %28 : vector<10x96xf32> to vector<10x96xbf16>
    %c0_14 = arith.constant 0 : index
    %c0_15 = arith.constant 0 : index
    %30 = vector.load %arg8[%c0_14, %c0_15] : memref<10x96xbf16, #tpu.memory_space<vmem>>, vector<10x96xbf16>
    tpu.vector_store %arg8[%c0_14, %c0_15], %29 {strides = array<i32>} : memref<10x96xbf16, #tpu.memory_space<vmem>>, vector<10x96xbf16>,
    return
  }
  func.func @transform_0(%arg0: i32, %arg1: i32, %arg2: i32) -> (i32, i32) {
    %c0_i32 = arith.constant 0 : i32
    return %arg0, %arg2 : i32, i32
  }
  func.func @transform_1(%arg0: i32, %arg1: i32, %arg2: i32) -> (i32, i32) {
    %c0_i32 = arith.constant 0 : i32
    return %arg2, %arg1 : i32, i32
  }
  func.func @transform_2(%arg0: i32, %arg1: i32, %arg2: i32) -> (i32, i32) {
    %c0_i32 = arith.constant 0 : i32
    %c0_i32_0 = arith.constant 0 : i32
    return %c0_i32, %arg1 : i32, i32
  }
  func.func @transform_3(%arg0: i32, %arg1: i32, %arg2: i32) -> (i32, i32) {
    %c0_i32 = arith.constant 0 : i32
    %c0_i32_0 = arith.constant 0 : i32
    return %c0_i32, %arg2 : i32, i32
  }
  func.func @transform_4(%arg0: i32, %arg1: i32, %arg2: i32) -> (i32, i32) {
    %c0_i32 = arith.constant 0 : i32
    %c0_i32_0 = arith.constant 0 : i32
    return %c0_i32, %arg2 : i32, i32
  }
  func.func @transform_5(%arg0: i32, %arg1: i32, %arg2: i32) -> (i32, i32) {
    %c0_i32 = arith.constant 0 : i32
    return %arg0, %arg1 : i32, i32
  }
}

module attributes {stable_mosaic.version = 11 : i64} {
  func.func @_attention_packed_kernel(%arg0: i32, %arg1: memref<1x5x96xbf16, #tpu.memory_space<vmem>>, %arg2: memref<1x5x32xbf16, #tpu.memory_space<vmem>>) attributes {dimension_semantics = [#tpu.dimension_semantics<parallel>], iteration_bounds = array<i64: 2>, scalar_prefetch = 0 : i64, scratch_operands = 0 : i64, tpu.core_type = #tpu.core_type<tc>, window_params = [{transform_indices = @transform_0, window_bounds = array<i64: 1, 5, 96>}, {transform_indices = @transform_1, window_bounds = array<i64: 1, 5, 32>}]} {
    %c0 = arith.constant 0 : index
    %c0_0 = arith.constant 0 : index
    %c0_1 = arith.constant 0 : index
    %0 = vector.load %arg1[%c0, %c0_0, %c0_1] : memref<1x5x96xbf16, #tpu.memory_space<vmem>>, vector<1x5x96xbf16>
    %1 = vector.extract_strided_slice %0 {offsets = [0, 0, 0], sizes = [1, 5, 32], strides = [1, 1, 1]} : vector<1x5x96xbf16> to vector<1x5x32xbf16>
    %2 = vector.extract_strided_slice %0 {offsets = [0, 0, 32], sizes = [1, 5, 32], strides = [1, 1, 1]} : vector<1x5x96xbf16> to vector<1x5x32xbf16>
    %3 = vector.extract_strided_slice %0 {offsets = [0, 0, 64], sizes = [1, 5, 32], strides = [1, 1, 1]} : vector<1x5x96xbf16> to vector<1x5x32xbf16>
    %4 = vector.extract_strided_slice %1 {offsets = [0, 0, 0], sizes = [1, 5, 8], strides = [1, 1, 1]} : vector<1x5x32xbf16> to vector<1x5x8xbf16>
    %5 = arith.extf %4 : vector<1x5x8xbf16> to vector<1x5x8xf32>
    %cst = arith.constant 0.353553385 : f32
    %6 = vector.broadcast %cst : f32 to vector<1x5x8xf32>
    %7 = arith.mulf %5, %6 : vector<1x5x8xf32>
    %8 = vector.extract_strided_slice %2 {offsets = [0, 0, 0], sizes = [1, 5, 8], strides = [1, 1, 1]} : vector<1x5x32xbf16> to vector<1x5x8xbf16>
    %9 = vector.extract_strided_slice %3 {offsets = [0, 0, 0], sizes = [1, 5, 8], strides = [1, 1, 1]} : vector<1x5x32xbf16> to vector<1x5x8xbf16>
    %10 = arith.truncf %7 : vector<1x5x8xf32> to vector<1x5x8xbf16>
    "tpu.trace_start"() <{level = 10 : i32, message = "bqd,bkd->bqk"}> : () -> ()
    %cst_2 = arith.constant dense<0.000000e+00> : vector<1x5x5xf32>
    %11 = tpu.matmul %10, %8, %cst_2 {dimension_numbers = #tpu.dot_dimension_numbers<[2], [2], [1], [1], [0, 0, 0, 1, 1, 1], [0], [0]>} : vector<1x5x8xbf16>, vector<1x5x8xbf16>, vector<1x5x5xf32> -> vector<1x5x5xf32>
    "tpu.trace_stop"() : () -> ()
    %cst_3 = arith.constant dense<0xFF800000> : vector<1x5xf32>
    %12 = vector.multi_reduction <maximumf>, %11, %cst_3 [2] : vector<1x5x5xf32> to vector<1x5xf32>
    %13 = vector.shape_cast %12 : vector<1x5xf32> to vector<1x5x1xf32>
    %14 = vector.broadcast %13 : vector<1x5x1xf32> to vector<1x5x5xf32>
    %15 = arith.subf %11, %14 : vector<1x5x5xf32>
    %16 = math.exp %15 : vector<1x5x5xf32>
    %cst_4 = arith.constant dense<0.000000e+00> : vector<1x5xf32>
    %17 = vector.multi_reduction <add>, %16, %cst_4 [2] : vector<1x5x5xf32> to vector<1x5xf32>
    %18 = vector.shape_cast %17 : vector<1x5xf32> to vector<1x5x1xf32>
    %19 = tpu.reciprocal %18 {approx = true} : vector<1x5x1xf32> -> vector<1x5x1xf32>
    %20 = vector.broadcast %19 : vector<1x5x1xf32> to vector<1x5x5xf32>
    %21 = arith.mulf %16, %20 : vector<1x5x5xf32>
    %22 = arith.truncf %21 : vector<1x5x5xf32> to vector<1x5x5xbf16>
    "tpu.trace_start"() <{level = 10 : i32, message = "bqk,bkd->bqd"}> : () -> ()
    %cst_5 = arith.constant dense<0.000000e+00> : vector<1x5x8xf32>
    %23 = tpu.matmul %22, %9, %cst_5 {dimension_numbers = #tpu.dot_dimension_numbers<[2], [1], [1], [2], [0, 0, 0, 1, 1, 2], [0], [0]>} : vector<1x5x5xbf16>, vector<1x5x8xbf16>, vector<1x5x8xf32> -> vector<1x5x8xf32>
    "tpu.trace_stop"() : () -> ()
    %24 = arith.truncf %23 : vector<1x5x8xf32> to vector<1x5x8xbf16>
    %c0_6 = arith.constant 0 : index
    %c0_7 = arith.constant 0 : index
    %c0_8 = arith.constant 0 : index
    %25 = vector.load %arg2[%c0_6, %c0_7, %c0_8] : memref<1x5x32xbf16, #tpu.memory_space<vmem>>, vector<1x5x8xbf16>
    tpu.vector_store %arg2[%c0_6, %c0_7, %c0_8], %24 {strides = array<i32>} : memref<1x5x32xbf16, #tpu.memory_space<vmem>>, vector<1x5x8xbf16>,
    %26 = vector.extract_strided_slice %1 {offsets = [0, 0, 8], sizes = [1, 5, 8], strides = [1, 1, 1]} : vector<1x5x32xbf16> to vector<1x5x8xbf16>
    %27 = arith.extf %26 : vector<1x5x8xbf16> to vector<1x5x8xf32>
    %cst_9 = arith.constant 0.353553385 : f32
    %28 = vector.broadcast %cst_9 : f32 to vector<1x5x8xf32>
    %29 = arith.mulf %27, %28 : vector<1x5x8xf32>
    %30 = vector.extract_strided_slice %2 {offsets = [0, 0, 8], sizes = [1, 5, 8], strides = [1, 1, 1]} : vector<1x5x32xbf16> to vector<1x5x8xbf16>
    %31 = vector.extract_strided_slice %3 {offsets = [0, 0, 8], sizes = [1, 5, 8], strides = [1, 1, 1]} : vector<1x5x32xbf16> to vector<1x5x8xbf16>
    %32 = arith.truncf %29 : vector<1x5x8xf32> to vector<1x5x8xbf16>
    "tpu.trace_start"() <{level = 10 : i32, message = "bqd,bkd->bqk"}> : () -> ()
    %cst_10 = arith.constant dense<0.000000e+00> : vector<1x5x5xf32>
    %33 = tpu.matmul %32, %30, %cst_10 {dimension_numbers = #tpu.dot_dimension_numbers<[2], [2], [1], [1], [0, 0, 0, 1, 1, 1], [0], [0]>} : vector<1x5x8xbf16>, vector<1x5x8xbf16>, vector<1x5x5xf32> -> vector<1x5x5xf32>
    "tpu.trace_stop"() : () -> ()
    %cst_11 = arith.constant dense<0xFF800000> : vector<1x5xf32>
    %34 = vector.multi_reduction <maximumf>, %33, %cst_11 [2] : vector<1x5x5xf32> to vector<1x5xf32>
    %35 = vector.shape_cast %34 : vector<1x5xf32> to vector<1x5x1xf32>
    %36 = vector.broadcast %35 : vector<1x5x1xf32> to vector<1x5x5xf32>
    %37 = arith.subf %33, %36 : vector<1x5x5xf32>
    %38 = math.exp %37 : vector<1x5x5xf32>
    %cst_12 = arith.constant dense<0.000000e+00> : vector<1x5xf32>
    %39 = vector.multi_reduction <add>, %38, %cst_12 [2] : vector<1x5x5xf32> to vector<1x5xf32>
    %40 = vector.shape_cast %39 : vector<1x5xf32> to vector<1x5x1xf32>
    %41 = tpu.reciprocal %40 {approx = true} : vector<1x5x1xf32> -> vector<1x5x1xf32>
    %42 = vector.broadcast %41 : vector<1x5x1xf32> to vector<1x5x5xf32>
    %43 = arith.mulf %38, %42 : vector<1x5x5xf32>
    %44 = arith.truncf %43 : vector<1x5x5xf32> to vector<1x5x5xbf16>
    "tpu.trace_start"() <{level = 10 : i32, message = "bqk,bkd->bqd"}> : () -> ()
    %cst_13 = arith.constant dense<0.000000e+00> : vector<1x5x8xf32>
    %45 = tpu.matmul %44, %31, %cst_13 {dimension_numbers = #tpu.dot_dimension_numbers<[2], [1], [1], [2], [0, 0, 0, 1, 1, 2], [0], [0]>} : vector<1x5x5xbf16>, vector<1x5x8xbf16>, vector<1x5x8xf32> -> vector<1x5x8xf32>
    "tpu.trace_stop"() : () -> ()
    %46 = arith.truncf %45 : vector<1x5x8xf32> to vector<1x5x8xbf16>
    %c0_14 = arith.constant 0 : index
    %c0_15 = arith.constant 0 : index
    %c8 = arith.constant 8 : index
    %47 = vector.load %arg2[%c0_14, %c0_15, %c8] : memref<1x5x32xbf16, #tpu.memory_space<vmem>>, vector<1x5x8xbf16>
    tpu.vector_store %arg2[%c0_14, %c0_15, %c8], %46 {strides = array<i32>} : memref<1x5x32xbf16, #tpu.memory_space<vmem>>, vector<1x5x8xbf16>,
    %48 = vector.extract_strided_slice %1 {offsets = [0, 0, 16], sizes = [1, 5, 8], strides = [1, 1, 1]} : vector<1x5x32xbf16> to vector<1x5x8xbf16>
    %49 = arith.extf %48 : vector<1x5x8xbf16> to vector<1x5x8xf32>
    %cst_16 = arith.constant 0.353553385 : f32
    %50 = vector.broadcast %cst_16 : f32 to vector<1x5x8xf32>
    %51 = arith.mulf %49, %50 : vector<1x5x8xf32>
    %52 = vector.extract_strided_slice %2 {offsets = [0, 0, 16], sizes = [1, 5, 8], strides = [1, 1, 1]} : vector<1x5x32xbf16> to vector<1x5x8xbf16>
    %53 = vector.extract_strided_slice %3 {offsets = [0, 0, 16], sizes = [1, 5, 8], strides = [1, 1, 1]} : vector<1x5x32xbf16> to vector<1x5x8xbf16>
    %54 = arith.truncf %51 : vector<1x5x8xf32> to vector<1x5x8xbf16>
    "tpu.trace_start"() <{level = 10 : i32, message = "bqd,bkd->bqk"}> : () -> ()
    %cst_17 = arith.constant dense<0.000000e+00> : vector<1x5x5xf32>
    %55 = tpu.matmul %54, %52, %cst_17 {dimension_numbers = #tpu.dot_dimension_numbers<[2], [2], [1], [1], [0, 0, 0, 1, 1, 1], [0], [0]>} : vector<1x5x8xbf16>, vector<1x5x8xbf16>, vector<1x5x5xf32> -> vector<1x5x5xf32>
    "tpu.trace_stop"() : () -> ()
    %cst_18 = arith.constant dense<0xFF800000> : vector<1x5xf32>
    %56 = vector.multi_reduction <maximumf>, %55, %cst_18 [2] : vector<1x5x5xf32> to vector<1x5xf32>
    %57 = vector.shape_cast %56 : vector<1x5xf32> to vector<1x5x1xf32>
    %58 = vector.broadcast %57 : vector<1x5x1xf32> to vector<1x5x5xf32>
    %59 = arith.subf %55, %58 : vector<1x5x5xf32>
    %60 = math.exp %59 : vector<1x5x5xf32>
    %cst_19 = arith.constant dense<0.000000e+00> : vector<1x5xf32>
    %61 = vector.multi_reduction <add>, %60, %cst_19 [2] : vector<1x5x5xf32> to vector<1x5xf32>
    %62 = vector.shape_cast %61 : vector<1x5xf32> to vector<1x5x1xf32>
    %63 = tpu.reciprocal %62 {approx = true} : vector<1x5x1xf32> -> vector<1x5x1xf32>
    %64 = vector.broadcast %63 : vector<1x5x1xf32> to vector<1x5x5xf32>
    %65 = arith.mulf %60, %64 : vector<1x5x5xf32>
    %66 = arith.truncf %65 : vector<1x5x5xf32> to vector<1x5x5xbf16>
    "tpu.trace_start"() <{level = 10 : i32, message = "bqk,bkd->bqd"}> : () -> ()
    %cst_20 = arith.constant dense<0.000000e+00> : vector<1x5x8xf32>
    %67 = tpu.matmul %66, %53, %cst_20 {dimension_numbers = #tpu.dot_dimension_numbers<[2], [1], [1], [2], [0, 0, 0, 1, 1, 2], [0], [0]>} : vector<1x5x5xbf16>, vector<1x5x8xbf16>, vector<1x5x8xf32> -> vector<1x5x8xf32>
    "tpu.trace_stop"() : () -> ()
    %68 = arith.truncf %67 : vector<1x5x8xf32> to vector<1x5x8xbf16>
    %c0_21 = arith.constant 0 : index
    %c0_22 = arith.constant 0 : index
    %c16 = arith.constant 16 : index
    %69 = vector.load %arg2[%c0_21, %c0_22, %c16] : memref<1x5x32xbf16, #tpu.memory_space<vmem>>, vector<1x5x8xbf16>
    tpu.vector_store %arg2[%c0_21, %c0_22, %c16], %68 {strides = array<i32>} : memref<1x5x32xbf16, #tpu.memory_space<vmem>>, vector<1x5x8xbf16>,
    %70 = vector.extract_strided_slice %1 {offsets = [0, 0, 24], sizes = [1, 5, 8], strides = [1, 1, 1]} : vector<1x5x32xbf16> to vector<1x5x8xbf16>
    %71 = arith.extf %70 : vector<1x5x8xbf16> to vector<1x5x8xf32>
    %cst_23 = arith.constant 0.353553385 : f32
    %72 = vector.broadcast %cst_23 : f32 to vector<1x5x8xf32>
    %73 = arith.mulf %71, %72 : vector<1x5x8xf32>
    %74 = vector.extract_strided_slice %2 {offsets = [0, 0, 24], sizes = [1, 5, 8], strides = [1, 1, 1]} : vector<1x5x32xbf16> to vector<1x5x8xbf16>
    %75 = vector.extract_strided_slice %3 {offsets = [0, 0, 24], sizes = [1, 5, 8], strides = [1, 1, 1]} : vector<1x5x32xbf16> to vector<1x5x8xbf16>
    %76 = arith.truncf %73 : vector<1x5x8xf32> to vector<1x5x8xbf16>
    "tpu.trace_start"() <{level = 10 : i32, message = "bqd,bkd->bqk"}> : () -> ()
    %cst_24 = arith.constant dense<0.000000e+00> : vector<1x5x5xf32>
    %77 = tpu.matmul %76, %74, %cst_24 {dimension_numbers = #tpu.dot_dimension_numbers<[2], [2], [1], [1], [0, 0, 0, 1, 1, 1], [0], [0]>} : vector<1x5x8xbf16>, vector<1x5x8xbf16>, vector<1x5x5xf32> -> vector<1x5x5xf32>
    "tpu.trace_stop"() : () -> ()
    %cst_25 = arith.constant dense<0xFF800000> : vector<1x5xf32>
    %78 = vector.multi_reduction <maximumf>, %77, %cst_25 [2] : vector<1x5x5xf32> to vector<1x5xf32>
    %79 = vector.shape_cast %78 : vector<1x5xf32> to vector<1x5x1xf32>
    %80 = vector.broadcast %79 : vector<1x5x1xf32> to vector<1x5x5xf32>
    %81 = arith.subf %77, %80 : vector<1x5x5xf32>
    %82 = math.exp %81 : vector<1x5x5xf32>
    %cst_26 = arith.constant dense<0.000000e+00> : vector<1x5xf32>
    %83 = vector.multi_reduction <add>, %82, %cst_26 [2] : vector<1x5x5xf32> to vector<1x5xf32>
    %84 = vector.shape_cast %83 : vector<1x5xf32> to vector<1x5x1xf32>
    %85 = tpu.reciprocal %84 {approx = true} : vector<1x5x1xf32> -> vector<1x5x1xf32>
    %86 = vector.broadcast %85 : vector<1x5x1xf32> to vector<1x5x5xf32>
    %87 = arith.mulf %82, %86 : vector<1x5x5xf32>
    %88 = arith.truncf %87 : vector<1x5x5xf32> to vector<1x5x5xbf16>
    "tpu.trace_start"() <{level = 10 : i32, message = "bqk,bkd->bqd"}> : () -> ()
    %cst_27 = arith.constant dense<0.000000e+00> : vector<1x5x8xf32>
    %89 = tpu.matmul %88, %75, %cst_27 {dimension_numbers = #tpu.dot_dimension_numbers<[2], [1], [1], [2], [0, 0, 0, 1, 1, 2], [0], [0]>} : vector<1x5x5xbf16>, vector<1x5x8xbf16>, vector<1x5x8xf32> -> vector<1x5x8xf32>
    "tpu.trace_stop"() : () -> ()
    %90 = arith.truncf %89 : vector<1x5x8xf32> to vector<1x5x8xbf16>
    %c0_28 = arith.constant 0 : index
    %c0_29 = arith.constant 0 : index
    %c24 = arith.constant 24 : index
    %91 = vector.load %arg2[%c0_28, %c0_29, %c24] : memref<1x5x32xbf16, #tpu.memory_space<vmem>>, vector<1x5x8xbf16>
    tpu.vector_store %arg2[%c0_28, %c0_29, %c24], %90 {strides = array<i32>} : memref<1x5x32xbf16, #tpu.memory_space<vmem>>, vector<1x5x8xbf16>,
    return
  }
  func.func @transform_0(%arg0: i32) -> (i32, i32, i32) {
    %c0_i32 = arith.constant 0 : i32
    %c0_i32_0 = arith.constant 0 : i32
    %c0_i32_1 = arith.constant 0 : i32
    return %arg0, %c0_i32, %c0_i32_0 : i32, i32, i32
  }
  func.func @transform_1(%arg0: i32) -> (i32, i32, i32) {
    %c0_i32 = arith.constant 0 : i32
    %c0_i32_0 = arith.constant 0 : i32
    %c0_i32_1 = arith.constant 0 : i32
    return %arg0, %c0_i32, %c0_i32_0 : i32, i32, i32
  }
}

module attributes {stable_mosaic.version = 11 : i64} {
  func.func @_fused_matmul_kernel(%arg0: i32, %arg1: i32, %arg2: i32, %arg3: memref<10x32xbf16, #tpu.memory_space<vmem>>, %arg4: memref<32x32xbf16, #tpu.memory_space<vmem>>, %arg5: memref<1x32xf32, #tpu.memory_space<vmem>>, %arg6: memref<10x32xf32, #tpu.memory_space<vmem>>, %arg7: memref<10x32xf32, #tpu.memory_space<vmem>>) attributes {dimension_semantics = [#tpu.dimension_semantics<parallel>, #tpu.dimension_semantics<parallel>, #tpu.dimension_semantics<arbitrary>], iteration_bounds = array<i64: 1, 1, 1>, scalar_prefetch = 0 : i64, scratch_operands = 0 : i64, tpu.core_type = #tpu.core_type<tc>, window_params = [{transform_indices = @transform_0, window_bounds = array<i64: 10, 32>}, {transform_indices = @transform_1, window_bounds = array<i64: 32, 32>}, {transform_indices = @transform_2, window_bounds = array<i64: 1, 32>}, {transform_indices = @transform_3, window_bounds = array<i64: 10, 32>}, {transform_indices = @transform_4, window_bounds = array<i64: 10, 32>}]} {
    %c0 = arith.constant 0 : index
    %c0_0 = arith.constant 0 : index
    %0 = vector.load %arg3[%c0, %c0_0] : memref<10x32xbf16, #tpu.memory_space<vmem>>, vector<10x32xbf16>
    %c0_1 = arith.constant 0 : index
    %c0_2 = arith.constant 0 : index
    %1 = vector.load %arg4[%c0_1, %c0_2] : memref<32x32xbf16, #tpu.memory_space<vmem>>, vector<32x32xbf16>
    %cst = arith.constant dense<0.000000e+00> : vector<10x32xf32>
    %2 = tpu.matmul %0, %1, %cst {dimension_numbers = #tpu.dot_dimension_numbers<[1], [0], [0], [1], [0, 0, 1, 1], [], []>} : vector<10x32xbf16>, vector<32x32xbf16>, vector<10x32xf32> -> vector<10x32xf32>
    %c0_3 = arith.constant 0 : index
    %c0_4 = arith.constant 0 : index
    %3 = vector.load %arg5[%c0_3, %c0_4] : memref<1x32xf32, #tpu.memory_space<vmem>>, vector<1x32xf32>
    %4 = vector.broadcast %3 : vector<1x32xf32> to vector<10x32xf32>
    %5 = arith.addf %2, %4 : vector<10x32xf32>
    %c0_5 = arith.constant 0 : index
    %c0_6 = arith.constant 0 : index
    %6 = vector.load %arg6[%c0_5, %c0_6] : memref<10x32xf32, #tpu.memory_space<vmem>>, vector<10x32xf32>
    %7 = arith.addf %5, %6 : vector<10x32xf32>
    %c0_7 = arith.constant 0 : index
    %c0_8 = arith.constant 0 : index
    %8 = vector.load %arg7[%c0_7, %c0_8] : memref<10x32xf32, #tpu.memory_space<vmem>>, vector<10x32xf32>
    tpu.vector_store %arg7[%c0_7, %c0_8], %7 {strides = array<i32>} : memref<10x32xf32, #tpu.memory_space<vmem>>, vector<10x32xf32>,
    return
  }
  func.func @transform_0(%arg0: i32, %arg1: i32, %arg2: i32) -> (i32, i32) {
    %c0_i32 = arith.constant 0 : i32
    return %arg0, %arg2 : i32, i32
  }
  func.func @transform_1(%arg0: i32, %arg1: i32, %arg2: i32) -> (i32, i32) {
    %c0_i32 = arith.constant 0 : i32
    return %arg2, %arg1 : i32, i32
  }
  func.func @transform_2(%arg0: i32, %arg1: i32, %arg2: i32) -> (i32, i32) {
    %c0_i32 = arith.constant 0 : i32
    %c0_i32_0 = arith.constant 0 : i32
    return %c0_i32, %arg1 : i32, i32
  }
  func.func @transform_3(%arg0: i32, %arg1: i32, %arg2: i32) -> (i32, i32) {
    %c0_i32 = arith.constant 0 : i32
    return %arg0, %arg1 : i32, i32
  }
  func.func @transform_4(%arg0: i32, %arg1: i32, %arg2: i32) -> (i32, i32) {
    %c0_i32 = arith.constant 0 : i32
    return %arg0, %arg1 : i32, i32
  }
}

module attributes {stable_mosaic.version = 11 : i64} {
  func.func @_fused_matmul_kernel(%arg0: i32, %arg1: i32, %arg2: i32, %arg3: memref<10x32xf32, #tpu.memory_space<vmem>>, %arg4: memref<32x128xbf16, #tpu.memory_space<vmem>>, %arg5: memref<1x128xf32, #tpu.memory_space<vmem>>, %arg6: memref<1x32xf32, #tpu.memory_space<vmem>>, %arg7: memref<1x32xf32, #tpu.memory_space<vmem>>, %arg8: memref<10x128xbf16, #tpu.memory_space<vmem>>) attributes {dimension_semantics = [#tpu.dimension_semantics<parallel>, #tpu.dimension_semantics<parallel>, #tpu.dimension_semantics<arbitrary>], iteration_bounds = array<i64: 1, 1, 1>, scalar_prefetch = 0 : i64, scratch_operands = 0 : i64, tpu.core_type = #tpu.core_type<tc>, window_params = [{transform_indices = @transform_0, window_bounds = array<i64: 10, 32>}, {transform_indices = @transform_1, window_bounds = array<i64: 32, 128>}, {transform_indices = @transform_2, window_bounds = array<i64: 1, 128>}, {transform_indices = @transform_3, window_bounds = array<i64: 1, 32>}, {transform_indices = @transform_4, window_bounds = array<i64: 1, 32>}, {transform_indices = @transform_5, window_bounds = array<i64: 10, 128>}]} {
    %c0 = arith.constant 0 : index
    %c0_0 = arith.constant 0 : index
    %0 = vector.load %arg3[%c0, %c0_0] : memref<10x32xf32, #tpu.memory_space<vmem>>, vector<10x32xf32>
    %cst = arith.constant dense<0.000000e+00> : vector<10xf32>
    %1 = vector.multi_reduction <add>, %0, %cst [1] : vector<10x32xf32> to vector<10xf32>
    %2 = vector.shape_cast %1 : vector<10xf32> to vector<10x1xf32>
    %cst_1 = arith.constant 3.200000e+01 : f32
    %3 = vector.broadcast %cst_1 : f32 to vector<10x1xf32>
    %4 = arith.divf %2, %3 : vector<10x1xf32>
    %5 = vector.broadcast %4 : vector<10x1xf32> to vector<10x32xf32>
    %6 = arith.subf %0, %5 : vector<10x32xf32>
    %7 = arith.mulf %6, %6 : vector<10x32xf32>
    %cst_2 = arith.constant dense<0.000000e+00> : vector<10xf32>
    %8 = vector.multi_reduction <add>, %7, %cst_2 [1] : vector<10x32xf32> to vector<10xf32>
    %9 = vector.shape_cast %8 : vector<10xf32> to vector<10x1xf32>
    %cst_3 = arith.constant 3.200000e+01 : f32
    %10 = vector.broadcast %cst_3 : f32 to vector<10x1xf32>
    %11 = arith.divf %9, %10 : vector<10x1xf32>
    %cst_4 = arith.constant 9.99999997E-7 : f32
    %12 = vector.broadcast %cst_4 : f32 to vector<10x1xf32>
    %13 = arith.addf %11, %12 : vector<10x1xf32>
    %14 = math.rsqrt %13 : vector<10x1xf32>
    %15 = vector.broadcast %14 : vector<10x1xf32> to vector<10x32xf32>
    %16 = arith.mulf %6, %15 : vector<10x32xf32>
    %c0_5 = arith.constant 0 : index
    %c0_6 = arith.constant 0 : index
    %17 = vector.load %arg6[%c0_5, %c0_6] : memref<1x32xf32, #tpu.memory_space<vmem>>, vector<1x32xf32>
    %18 = vector.broadcast %17 : vector<1x32xf32> to vector<10x32xf32>
    %19 = arith.mulf %16, %18 : vector<10x32xf32>
    %c0_7 = arith.constant 0 : index
    %c0_8 = arith.constant 0 : index
    %20 = vector.load %arg7[%c0_7, %c0_8] : memref<1x32xf32, #tpu.memory_space<vmem>>, vector<1x32xf32>
    %21 = vector.broadcast %20 : vector<1x32xf32> to vector<10x32xf32>
    %22 = arith.addf %19, %21 : vector<10x32xf32>
    %23 = arith.truncf %22 : vector<10x32xf32> to vector<10x32xbf16>
    %c0_9 = arith.constant 0 : index
    %c0_10 = arith.constant 0 : index
    %24 = vector.load %arg4[%c0_9, %c0_10] : memref<32x128xbf16, #tpu.memory_space<vmem>>, vector<32x128xbf16>
    %cst_11 = arith.constant dense<0.000000e+00> : vector<10x128xf32>
    %25 = tpu.matmul %23, %24, %cst_11 {dimension_numbers = #tpu.dot_dimension_numbers<[1], [0], [0], [1], [0, 0, 1, 1], [], []>} : vector<10x32xbf16>, vector<32x128xbf16>, vector<10x128xf32> -> vector<10x128xf32>
    %c0_12 = arith.constant 0 : index
    %c0_13 = arith.constant 0 : index
    %26 = vector.load %arg5[%c0_12, %c0_13] : memref<1x128xf32, #tpu.memory_space<vmem>>, vector<1x128xf32>
    %27 = vector.broadcast %26 : vector<1x128xf32> to vector<10x128xf32>
    %28 = arith.addf %25, %27 : vector<10x128xf32>
    %cst_14 = arith.constant 5.000000e-01 : f32
    %29 = vector.broadcast %cst_14 : f32 to vector<10x128xf32>
    %30 = arith.mulf %29, %28 : vector<10x128xf32>
    %cst_15 = arith.constant 0.707106769 : f32
    %31 = vector.broadcast %cst_15 : f32 to vector<10x128xf32>
    %32 = arith.mulf %28, %31 : vector<10x128xf32>
    %cst_16 = arith.constant 0.000000e+00 : f32
    %33 = vector.broadcast %cst_16 : f32 to vector<10x128xf32>
    %34 = arith.cmpf olt, %32, %33 : vector<10x128xf32>
    %cst_17 = arith.constant -1.000000e+00 : f32
    %cst_18 = arith.constant 1.000000e+00 : f32
    %35 = vector.broadcast %cst_17 : f32 to vector<10x128xf32>
    %36 = vector.broadcast %cst_18 : f32 to vector<10x128xf32>
    %37 = arith.select %34, %35, %36 : vector<10x128xi1>, vector<10x128xf32>
    %38 = math.absf %32 : vector<10x128xf32>
    %cst_19 = arith.constant 0.327591091 : f32
    %39 = vector.broadcast %cst_19 : f32 to vector<10x128xf32>
    %40 = arith.mulf %39, %38 : vector<10x128xf32>
    %cst_20 = arith.constant 1.000000e+00 : f32
    %41 = vector.broadcast %cst_20 : f32 to vector<10x128xf32>
    %42 = arith.addf %41, %40 : vector<10x128xf32>
    %cst_21 = arith.constant 1.000000e+00 : f32
    %43 = vector.broadcast %cst_21 : f32 to vector<10x128xf32>
    %44 = arith.divf %43, %42 : vector<10x128xf32>
    %cst_22 = arith.constant 1.06140542 : f32
    %45 = vector.broadcast %cst_22 : f32 to vector<10x128xf32>
    %46 = arith.mulf %45, %44 : vector<10x128xf32>
    %cst_23 = arith.constant -1.45315206 : f32
    %47 = vector.broadcast %cst_23 : f32 to vector<10x128xf32>
    %48 = arith.addf %46, %47 : vector<10x128xf32>
    %49 = arith.mulf %48, %44 : vector<10x128xf32>
    %cst_24 = arith.constant 1.42141378 : f32
    %50 = vector.broadcast %cst_24 : f32 to vector<10x128xf32>
    %51 = arith.addf %49, %50 : vector<10x128xf32>
    %52 = arith.mulf %51, %44 : vector<10x128xf32>
    %cst_25 = arith.constant -0.284496725 : f32
    %53 = vector.broadcast %cst_25 : f32 to vector<10x128xf32>
    %54 = arith.addf %52, %53 : vector<10x128xf32>
    %55 = arith.mulf %54, %44 : vector<10x128xf32>
    %cst_26 = arith.constant 0.254829586 : f32
    %56 = vector.broadcast %cst_26 : f32 to vector<10x128xf32>
    %57 = arith.addf %55, %56 : vector<10x128xf32>
    %58 = arith.mulf %57, %44 : vector<10x128xf32>
    %cst_27 = arith.constant 0.000000e+00 : f32
    %59 = vector.broadcast %cst_27 : f32 to vector<10x128xf32>
    %60 = arith.subf %59, %38 : vector<10x128xf32>
    %61 = arith.mulf %60, %38 : vector<10x128xf32>
    %62 = math.exp %61 : vector<10x128xf32>
    %63 = arith.mulf %58, %62 : vector<10x128xf32>
    %cst_28 = arith.constant 1.000000e+00 : f32
    %64 = vector.broadcast %cst_28 : f32 to vector<10x128xf32>
    %65 = arith.subf %64, %63 : vector<10x128xf32>
    %66 = arith.mulf %37, %65 : vector<10x128xf32>
    %cst_29 = arith.constant 1.000000e+00 : f32
    %67 = vector.broadcast %cst_29 : f32 to vector<10x128xf32>
    %68 = arith.addf %67, %66 : vector<10x128xf32>
    %69 = arith.mulf %30, %68 : vector<10x128xf32>
    %70 = arith.truncf %69 : vector<10x128xf32> to vector<10x128xbf16>
    %c0_30 = arith.constant 0 : index
    %c0_31 = arith.constant 0 : index
    %71 = vector.load %arg8[%c0_30, %c0_31] : memref<10x128xbf16, #tpu.memory_space<vmem>>, vector<10x128xbf16>
    tpu.vector_store %arg8[%c0_30, %c0_31], %70 {strides = array<i32>} : memref<10x128xbf16, #tpu.memory_space<vmem>>, vector<10x128xbf16>,
    return
  }
  func.func @transform_0(%arg0: i32, %arg1: i32, %arg2: i32) -> (i32, i32) {
    %c0_i32 = arith.constant 0 : i32
    return %arg0, %arg2 : i32, i32
  }
  func.func @transform_1(%arg0: i32, %arg1: i32, %arg2: i32) -> (i32, i32) {
    %c0_i32 = arith.constant 0 : i32
    return %arg2, %arg1 : i32, i32
  }
  func.func @transform_2(%arg0: i32, %arg1: i32, %arg2: i32) -> (i32, i32) {
    %c0_i32 = arith.constant 0 : i32
    %c0_i32_0 = arith.constant 0 : i32
    return %c0_i32, %arg1 : i32, i32
  }
  func.func @transform_3(%arg0: i32, %arg1: i32, %arg2: i32) -> (i32, i32) {
    %c0_i32 = arith.constant 0 : i32
    %c0_i32_0 = arith.constant 0 : i32
    return %c0_i32, %arg2 : i32, i32
  }
  func.func @transform_4(%arg0: i32, %arg1: i32, %arg2: i32) -> (i32, i32) {
    %c0_i32 = arith.constant 0 : i32
    %c0_i32_0 = arith.constant 0 : i32
    return %c0_i32, %arg2 : i32, i32
  }
  func.func @transform_5(%arg0: i32, %arg1: i32, %arg2: i32) -> (i32, i32) {
    %c0_i32 = arith.constant 0 : i32
    return %arg0, %arg1 : i32, i32
  }
}

module attributes {stable_mosaic.version = 11 : i64} {
  func.func @_fused_matmul_kernel(%arg0: i32, %arg1: i32, %arg2: i32, %arg3: memref<10x128xbf16, #tpu.memory_space<vmem>>, %arg4: memref<128x32xbf16, #tpu.memory_space<vmem>>, %arg5: memref<1x32xf32, #tpu.memory_space<vmem>>, %arg6: memref<10x32xf32, #tpu.memory_space<vmem>>, %arg7: memref<10x32xf32, #tpu.memory_space<vmem>>) attributes {dimension_semantics = [#tpu.dimension_semantics<parallel>, #tpu.dimension_semantics<parallel>, #tpu.dimension_semantics<arbitrary>], iteration_bounds = array<i64: 1, 1, 1>, scalar_prefetch = 0 : i64, scratch_operands = 0 : i64, tpu.core_type = #tpu.core_type<tc>, window_params = [{transform_indices = @transform_0, window_bounds = array<i64: 10, 128>}, {transform_indices = @transform_1, window_bounds = array<i64: 128, 32>}, {transform_indices = @transform_2, window_bounds = array<i64: 1, 32>}, {transform_indices = @transform_3, window_bounds = array<i64: 10, 32>}, {transform_indices = @transform_4, window_bounds = array<i64: 10, 32>}]} {
    %c0 = arith.constant 0 : index
    %c0_0 = arith.constant 0 : index
    %0 = vector.load %arg3[%c0, %c0_0] : memref<10x128xbf16, #tpu.memory_space<vmem>>, vector<10x128xbf16>
    %c0_1 = arith.constant 0 : index
    %c0_2 = arith.constant 0 : index
    %1 = vector.load %arg4[%c0_1, %c0_2] : memref<128x32xbf16, #tpu.memory_space<vmem>>, vector<128x32xbf16>
    %cst = arith.constant dense<0.000000e+00> : vector<10x32xf32>
    %2 = tpu.matmul %0, %1, %cst {dimension_numbers = #tpu.dot_dimension_numbers<[1], [0], [0], [1], [0, 0, 1, 1], [], []>} : vector<10x128xbf16>, vector<128x32xbf16>, vector<10x32xf32> -> vector<10x32xf32>
    %c0_3 = arith.constant 0 : index
    %c0_4 = arith.constant 0 : index
    %3 = vector.load %arg5[%c0_3, %c0_4] : memref<1x32xf32, #tpu.memory_space<vmem>>, vector<1x32xf32>
    %4 = vector.broadcast %3 : vector<1x32xf32> to vector<10x32xf32>
    %5 = arith.addf %2, %4 : vector<10x32xf32>
    %c0_5 = arith.constant 0 : index
    %c0_6 = arith.constant 0 : index
    %6 = vector.load %arg6[%c0_5, %c0_6] : memref<10x32xf32, #tpu.memory_space<vmem>>, vector<10x32xf32>
    %7 = arith.addf %5, %6 : vector<10x32xf32>
    %c0_7 = arith.constant 0 : index
    %c0_8 = arith.constant 0 : index
    %8 = vector.load %arg7[%c0_7, %c0_8] : memref<10x32xf32, #tpu.memory_space<vmem>>, vector<10x32xf32>
    tpu.vector_store %arg7[%c0_7, %c0_8], %7 {strides = array<i32>} : memref<10x32xf32, #tpu.memory_space<vmem>>, vector<10x32xf32>,
    return
  }
  func.func @transform_0(%arg0: i32, %arg1: i32, %arg2: i32) -> (i32, i32) {
    %c0_i32 = arith.constant 0 : i32
    return %arg0, %arg2 : i32, i32
  }
  func.func @transform_1(%arg0: i32, %arg1: i32, %arg2: i32) -> (i32, i32) {
    %c0_i32 = arith.constant 0 : i32
    return %arg2, %arg1 : i32, i32
  }
  func.func @transform_2(%arg0: i32, %arg1: i32, %arg2: i32) -> (i32, i32) {
    %c0_i32 = arith.constant 0 : i32
    %c0_i32_0 = arith.constant 0 : i32
    return %c0_i32, %arg1 : i32, i32
  }
  func.func @transform_3(%arg0: i32, %arg1: i32, %arg2: i32) -> (i32, i32) {
    %c0_i32 = arith.constant 0 : i32
    return %arg0, %arg1 : i32, i32
  }
  func.func @transform_4(%arg0: i32, %arg1: i32, %arg2: i32) -> (i32, i32) {
    %c0_i32 = arith.constant 0 : i32
    return %arg0, %arg1 : i32, i32
  }
}

module attributes {stable_mosaic.version = 11 : i64} {
  func.func @_fused_matmul_kernel(%arg0: i32, %arg1: i32, %arg2: i32, %arg3: memref<10x32xf32, #tpu.memory_space<vmem>>, %arg4: memref<32x32xbf16, #tpu.memory_space<vmem>>, %arg5: memref<1x32xf32, #tpu.memory_space<vmem>>, %arg6: memref<1x32xf32, #tpu.memory_space<vmem>>, %arg7: memref<1x32xf32, #tpu.memory_space<vmem>>, %arg8: memref<10x32xf32, #tpu.memory_space<vmem>>) attributes {dimension_semantics = [#tpu.dimension_semantics<parallel>, #tpu.dimension_semantics<parallel>, #tpu.dimension_semantics<arbitrary>], iteration_bounds = array<i64: 1, 1, 1>, scalar_prefetch = 0 : i64, scratch_operands = 0 : i64, tpu.core_type = #tpu.core_type<tc>, window_params = [{transform_indices = @transform_0, window_bounds = array<i64: 10, 32>}, {transform_indices = @transform_1, window_bounds = array<i64: 32, 32>}, {transform_indices = @transform_2, window_bounds = array<i64: 1, 32>}, {transform_indices = @transform_3, window_bounds = array<i64: 1, 32>}, {transform_indices = @transform_4, window_bounds = array<i64: 1, 32>}, {transform_indices = @transform_5, window_bounds = array<i64: 10, 32>}]} {
    %c0 = arith.constant 0 : index
    %c0_0 = arith.constant 0 : index
    %0 = vector.load %arg3[%c0, %c0_0] : memref<10x32xf32, #tpu.memory_space<vmem>>, vector<10x32xf32>
    %cst = arith.constant dense<0.000000e+00> : vector<10xf32>
    %1 = vector.multi_reduction <add>, %0, %cst [1] : vector<10x32xf32> to vector<10xf32>
    %2 = vector.shape_cast %1 : vector<10xf32> to vector<10x1xf32>
    %cst_1 = arith.constant 3.200000e+01 : f32
    %3 = vector.broadcast %cst_1 : f32 to vector<10x1xf32>
    %4 = arith.divf %2, %3 : vector<10x1xf32>
    %5 = vector.broadcast %4 : vector<10x1xf32> to vector<10x32xf32>
    %6 = arith.subf %0, %5 : vector<10x32xf32>
    %7 = arith.mulf %6, %6 : vector<10x32xf32>
    %cst_2 = arith.constant dense<0.000000e+00> : vector<10xf32>
    %8 = vector.multi_reduction <add>, %7, %cst_2 [1] : vector<10x32xf32> to vector<10xf32>
    %9 = vector.shape_cast %8 : vector<10xf32> to vector<10x1xf32>
    %cst_3 = arith.constant 3.200000e+01 : f32
    %10 = vector.broadcast %cst_3 : f32 to vector<10x1xf32>
    %11 = arith.divf %9, %10 : vector<10x1xf32>
    %cst_4 = arith.constant 9.99999997E-7 : f32
    %12 = vector.broadcast %cst_4 : f32 to vector<10x1xf32>
    %13 = arith.addf %11, %12 : vector<10x1xf32>
    %14 = math.rsqrt %13 : vector<10x1xf32>
    %15 = vector.broadcast %14 : vector<10x1xf32> to vector<10x32xf32>
    %16 = arith.mulf %6, %15 : vector<10x32xf32>
    %c0_5 = arith.constant 0 : index
    %c0_6 = arith.constant 0 : index
    %17 = vector.load %arg6[%c0_5, %c0_6] : memref<1x32xf32, #tpu.memory_space<vmem>>, vector<1x32xf32>
    %18 = vector.broadcast %17 : vector<1x32xf32> to vector<10x32xf32>
    %19 = arith.mulf %16, %18 : vector<10x32xf32>
    %c0_7 = arith.constant 0 : index
    %c0_8 = arith.constant 0 : index
    %20 = vector.load %arg7[%c0_7, %c0_8] : memref<1x32xf32, #tpu.memory_space<vmem>>, vector<1x32xf32>
    %21 = vector.broadcast %20 : vector<1x32xf32> to vector<10x32xf32>
    %22 = arith.addf %19, %21 : vector<10x32xf32>
    %23 = arith.truncf %22 : vector<10x32xf32> to vector<10x32xbf16>
    %c0_9 = arith.constant 0 : index
    %c0_10 = arith.constant 0 : index
    %24 = vector.load %arg4[%c0_9, %c0_10] : memref<32x32xbf16, #tpu.memory_space<vmem>>, vector<32x32xbf16>
    %cst_11 = arith.constant dense<0.000000e+00> : vector<10x32xf32>
    %25 = tpu.matmul %23, %24, %cst_11 {dimension_numbers = #tpu.dot_dimension_numbers<[1], [0], [0], [1], [0, 0, 1, 1], [], []>} : vector<10x32xbf16>, vector<32x32xbf16>, vector<10x32xf32> -> vector<10x32xf32>
    %c0_12 = arith.constant 0 : index
    %c0_13 = arith.constant 0 : index
    %26 = vector.load %arg5[%c0_12, %c0_13] : memref<1x32xf32, #tpu.memory_space<vmem>>, vector<1x32xf32>
    %27 = vector.broadcast %26 : vector<1x32xf32> to vector<10x32xf32>
    %28 = arith.addf %25, %27 : vector<10x32xf32>
    %c0_14 = arith.constant 0 : index
    %c0_15 = arith.constant 0 : index
    %29 = vector.load %arg8[%c0_14, %c0_15] : memref<10x32xf32, #tpu.memory_space<vmem>>, vector<10x32xf32>
    tpu.vector_store %arg8[%c0_14, %c0_15], %28 {strides = array<i32>} : memref<10x32xf32, #tpu.memory_space<vmem>>, vector<10x32xf32>,
    return
  }
  func.func @transform_0(%arg0: i32, %arg1: i32, %arg2: i32) -> (i32, i32) {
    %c0_i32 = arith.constant 0 : i32
    return %arg0, %arg2 : i32, i32
  }
  func.func @transform_1(%arg0: i32, %arg1: i32, %arg2: i32) -> (i32, i32) {
    %c0_i32 = arith.constant 0 : i32
    return %arg2, %arg1 : i32, i32
  }
  func.func @transform_2(%arg0: i32, %arg1: i32, %arg2: i32) -> (i32, i32) {
    %c0_i32 = arith.constant 0 : i32
    %c0_i32_0 = arith.constant 0 : i32
    return %c0_i32, %arg1 : i32, i32
  }
  func.func @transform_3(%arg0: i32, %arg1: i32, %arg2: i32) -> (i32, i32) {
    %c0_i32 = arith.constant 0 : i32
    %c0_i32_0 = arith.constant 0 : i32
    return %c0_i32, %arg2 : i32, i32
  }
  func.func @transform_4(%arg0: i32, %arg1: i32, %arg2: i32) -> (i32, i32) {
    %c0_i32 = arith.constant 0 : i32
    %c0_i32_0 = arith.constant 0 : i32
    return %c0_i32, %arg2 : i32, i32
  }
  func.func @transform_5(%arg0: i32, %arg1: i32, %arg2: i32) -> (i32, i32) {
    %c0_i32 = arith.constant 0 : i32
    return %arg0, %arg1 : i32, i32
  }
}

module attributes {stable_mosaic.version = 11 : i64} {
  func.func @_attention_packed_kernel(%arg0: i32, %arg1: memref<1x17x96xbf16, #tpu.memory_space<vmem>>, %arg2: memref<1x17x32xbf16, #tpu.memory_space<vmem>>) attributes {dimension_semantics = [#tpu.dimension_semantics<parallel>], iteration_bounds = array<i64: 2>, scalar_prefetch = 0 : i64, scratch_operands = 0 : i64, tpu.core_type = #tpu.core_type<tc>, window_params = [{transform_indices = @transform_0, window_bounds = array<i64: 1, 17, 96>}, {transform_indices = @transform_1, window_bounds = array<i64: 1, 17, 32>}]} {
    %c0 = arith.constant 0 : index
    %c0_0 = arith.constant 0 : index
    %c0_1 = arith.constant 0 : index
    %0 = vector.load %arg1[%c0, %c0_0, %c0_1] : memref<1x17x96xbf16, #tpu.memory_space<vmem>>, vector<1x17x96xbf16>
    %1 = vector.extract_strided_slice %0 {offsets = [0, 0, 0], sizes = [1, 17, 32], strides = [1, 1, 1]} : vector<1x17x96xbf16> to vector<1x17x32xbf16>
    %2 = vector.extract_strided_slice %0 {offsets = [0, 0, 32], sizes = [1, 17, 32], strides = [1, 1, 1]} : vector<1x17x96xbf16> to vector<1x17x32xbf16>
    %3 = vector.extract_strided_slice %0 {offsets = [0, 0, 64], sizes = [1, 17, 32], strides = [1, 1, 1]} : vector<1x17x96xbf16> to vector<1x17x32xbf16>
    %4 = vector.extract_strided_slice %1 {offsets = [0, 0, 0], sizes = [1, 17, 8], strides = [1, 1, 1]} : vector<1x17x32xbf16> to vector<1x17x8xbf16>
    %5 = arith.extf %4 : vector<1x17x8xbf16> to vector<1x17x8xf32>
    %cst = arith.constant 0.353553385 : f32
    %6 = vector.broadcast %cst : f32 to vector<1x17x8xf32>
    %7 = arith.mulf %5, %6 : vector<1x17x8xf32>
    %8 = vector.extract_strided_slice %2 {offsets = [0, 0, 0], sizes = [1, 17, 8], strides = [1, 1, 1]} : vector<1x17x32xbf16> to vector<1x17x8xbf16>
    %9 = vector.extract_strided_slice %3 {offsets = [0, 0, 0], sizes = [1, 17, 8], strides = [1, 1, 1]} : vector<1x17x32xbf16> to vector<1x17x8xbf16>
    %10 = arith.truncf %7 : vector<1x17x8xf32> to vector<1x17x8xbf16>
    "tpu.trace_start"() <{level = 10 : i32, message = "bqd,bkd->bqk"}> : () -> ()
    %cst_2 = arith.constant dense<0.000000e+00> : vector<1x17x17xf32>
    %11 = tpu.matmul %10, %8, %cst_2 {dimension_numbers = #tpu.dot_dimension_numbers<[2], [2], [1], [1], [0, 0, 0, 1, 1, 1], [0], [0]>} : vector<1x17x8xbf16>, vector<1x17x8xbf16>, vector<1x17x17xf32> -> vector<1x17x17xf32>
    "tpu.trace_stop"() : () -> ()
    %cst_3 = arith.constant dense<0xFF800000> : vector<1x17xf32>
    %12 = vector.multi_reduction <maximumf>, %11, %cst_3 [2] : vector<1x17x17xf32> to vector<1x17xf32>
    %13 = vector.shape_cast %12 : vector<1x17xf32> to vector<1x17x1xf32>
    %14 = vector.broadcast %13 : vector<1x17x1xf32> to vector<1x17x17xf32>
    %15 = arith.subf %11, %14 : vector<1x17x17xf32>
    %16 = math.exp %15 : vector<1x17x17xf32>
    %cst_4 = arith.constant dense<0.000000e+00> : vector<1x17xf32>
    %17 = vector.multi_reduction <add>, %16, %cst_4 [2] : vector<1x17x17xf32> to vector<1x17xf32>
    %18 = vector.shape_cast %17 : vector<1x17xf32> to vector<1x17x1xf32>
    %19 = tpu.reciprocal %18 {approx = true} : vector<1x17x1xf32> -> vector<1x17x1xf32>
    %20 = vector.broadcast %19 : vector<1x17x1xf32> to vector<1x17x17xf32>
    %21 = arith.mulf %16, %20 : vector<1x17x17xf32>
    %22 = arith.truncf %21 : vector<1x17x17xf32> to vector<1x17x17xbf16>
    "tpu.trace_start"() <{level = 10 : i32, message = "bqk,bkd->bqd"}> : () -> ()
    %cst_5 = arith.constant dense<0.000000e+00> : vector<1x17x8xf32>
    %23 = tpu.matmul %22, %9, %cst_5 {dimension_numbers = #tpu.dot_dimension_numbers<[2], [1], [1], [2], [0, 0, 0, 1, 1, 2], [0], [0]>} : vector<1x17x17xbf16>, vector<1x17x8xbf16>, vector<1x17x8xf32> -> vector<1x17x8xf32>
    "tpu.trace_stop"() : () -> ()
    %24 = arith.truncf %23 : vector<1x17x8xf32> to vector<1x17x8xbf16>
    %c0_6 = arith.constant 0 : index
    %c0_7 = arith.constant 0 : index
    %c0_8 = arith.constant 0 : index
    %25 = vector.load %arg2[%c0_6, %c0_7, %c0_8] : memref<1x17x32xbf16, #tpu.memory_space<vmem>>, vector<1x17x8xbf16>
    tpu.vector_store %arg2[%c0_6, %c0_7, %c0_8], %24 {strides = array<i32>} : memref<1x17x32xbf16, #tpu.memory_space<vmem>>, vector<1x17x8xbf16>,
    %26 = vector.extract_strided_slice %1 {offsets = [0, 0, 8], sizes = [1, 17, 8], strides = [1, 1, 1]} : vector<1x17x32xbf16> to vector<1x17x8xbf16>
    %27 = arith.extf %26 : vector<1x17x8xbf16> to vector<1x17x8xf32>
    %cst_9 = arith.constant 0.353553385 : f32
    %28 = vector.broadcast %cst_9 : f32 to vector<1x17x8xf32>
    %29 = arith.mulf %27, %28 : vector<1x17x8xf32>
    %30 = vector.extract_strided_slice %2 {offsets = [0, 0, 8], sizes = [1, 17, 8], strides = [1, 1, 1]} : vector<1x17x32xbf16> to vector<1x17x8xbf16>
    %31 = vector.extract_strided_slice %3 {offsets = [0, 0, 8], sizes = [1, 17, 8], strides = [1, 1, 1]} : vector<1x17x32xbf16> to vector<1x17x8xbf16>
    %32 = arith.truncf %29 : vector<1x17x8xf32> to vector<1x17x8xbf16>
    "tpu.trace_start"() <{level = 10 : i32, message = "bqd,bkd->bqk"}> : () -> ()
    %cst_10 = arith.constant dense<0.000000e+00> : vector<1x17x17xf32>
    %33 = tpu.matmul %32, %30, %cst_10 {dimension_numbers = #tpu.dot_dimension_numbers<[2], [2], [1], [1], [0, 0, 0, 1, 1, 1], [0], [0]>} : vector<1x17x8xbf16>, vector<1x17x8xbf16>, vector<1x17x17xf32> -> vector<1x17x17xf32>
    "tpu.trace_stop"() : () -> ()
    %cst_11 = arith.constant dense<0xFF800000> : vector<1x17xf32>
    %34 = vector.multi_reduction <maximumf>, %33, %cst_11 [2] : vector<1x17x17xf32> to vector<1x17xf32>
    %35 = vector.shape_cast %34 : vector<1x17xf32> to vector<1x17x1xf32>
    %36 = vector.broadcast %35 : vector<1x17x1xf32> to vector<1x17x17xf32>
    %37 = arith.subf %33, %36 : vector<1x17x17xf32>
    %38 = math.exp %37 : vector<1x17x17xf32>
    %cst_12 = arith.constant dense<0.000000e+00> : vector<1x17xf32>
    %39 = vector.multi_reduction <add>, %38, %cst_12 [2] : vector<1x17x17xf32> to vector<1x17xf32>
    %40 = vector.shape_cast %39 : vector<1x17xf32> to vector<1x17x1xf32>
    %41 = tpu.reciprocal %40 {approx = true} : vector<1x17x1xf32> -> vector<1x17x1xf32>
    %42 = vector.broadcast %41 : vector<1x17x1xf32> to vector<1x17x17xf32>
    %43 = arith.mulf %38, %42 : vector<1x17x17xf32>
    %44 = arith.truncf %43 : vector<1x17x17xf32> to vector<1x17x17xbf16>
    "tpu.trace_start"() <{level = 10 : i32, message = "bqk,bkd->bqd"}> : () -> ()
    %cst_13 = arith.constant dense<0.000000e+00> : vector<1x17x8xf32>
    %45 = tpu.matmul %44, %31, %cst_13 {dimension_numbers = #tpu.dot_dimension_numbers<[2], [1], [1], [2], [0, 0, 0, 1, 1, 2], [0], [0]>} : vector<1x17x17xbf16>, vector<1x17x8xbf16>, vector<1x17x8xf32> -> vector<1x17x8xf32>
    "tpu.trace_stop"() : () -> ()
    %46 = arith.truncf %45 : vector<1x17x8xf32> to vector<1x17x8xbf16>
    %c0_14 = arith.constant 0 : index
    %c0_15 = arith.constant 0 : index
    %c8 = arith.constant 8 : index
    %47 = vector.load %arg2[%c0_14, %c0_15, %c8] : memref<1x17x32xbf16, #tpu.memory_space<vmem>>, vector<1x17x8xbf16>
    tpu.vector_store %arg2[%c0_14, %c0_15, %c8], %46 {strides = array<i32>} : memref<1x17x32xbf16, #tpu.memory_space<vmem>>, vector<1x17x8xbf16>,
    %48 = vector.extract_strided_slice %1 {offsets = [0, 0, 16], sizes = [1, 17, 8], strides = [1, 1, 1]} : vector<1x17x32xbf16> to vector<1x17x8xbf16>
    %49 = arith.extf %48 : vector<1x17x8xbf16> to vector<1x17x8xf32>
    %cst_16 = arith.constant 0.353553385 : f32
    %50 = vector.broadcast %cst_16 : f32 to vector<1x17x8xf32>
    %51 = arith.mulf %49, %50 : vector<1x17x8xf32>
    %52 = vector.extract_strided_slice %2 {offsets = [0, 0, 16], sizes = [1, 17, 8], strides = [1, 1, 1]} : vector<1x17x32xbf16> to vector<1x17x8xbf16>
    %53 = vector.extract_strided_slice %3 {offsets = [0, 0, 16], sizes = [1, 17, 8], strides = [1, 1, 1]} : vector<1x17x32xbf16> to vector<1x17x8xbf16>
    %54 = arith.truncf %51 : vector<1x17x8xf32> to vector<1x17x8xbf16>
    "tpu.trace_start"() <{level = 10 : i32, message = "bqd,bkd->bqk"}> : () -> ()
    %cst_17 = arith.constant dense<0.000000e+00> : vector<1x17x17xf32>
    %55 = tpu.matmul %54, %52, %cst_17 {dimension_numbers = #tpu.dot_dimension_numbers<[2], [2], [1], [1], [0, 0, 0, 1, 1, 1], [0], [0]>} : vector<1x17x8xbf16>, vector<1x17x8xbf16>, vector<1x17x17xf32> -> vector<1x17x17xf32>
    "tpu.trace_stop"() : () -> ()
    %cst_18 = arith.constant dense<0xFF800000> : vector<1x17xf32>
    %56 = vector.multi_reduction <maximumf>, %55, %cst_18 [2] : vector<1x17x17xf32> to vector<1x17xf32>
    %57 = vector.shape_cast %56 : vector<1x17xf32> to vector<1x17x1xf32>
    %58 = vector.broadcast %57 : vector<1x17x1xf32> to vector<1x17x17xf32>
    %59 = arith.subf %55, %58 : vector<1x17x17xf32>
    %60 = math.exp %59 : vector<1x17x17xf32>
    %cst_19 = arith.constant dense<0.000000e+00> : vector<1x17xf32>
    %61 = vector.multi_reduction <add>, %60, %cst_19 [2] : vector<1x17x17xf32> to vector<1x17xf32>
    %62 = vector.shape_cast %61 : vector<1x17xf32> to vector<1x17x1xf32>
    %63 = tpu.reciprocal %62 {approx = true} : vector<1x17x1xf32> -> vector<1x17x1xf32>
    %64 = vector.broadcast %63 : vector<1x17x1xf32> to vector<1x17x17xf32>
    %65 = arith.mulf %60, %64 : vector<1x17x17xf32>
    %66 = arith.truncf %65 : vector<1x17x17xf32> to vector<1x17x17xbf16>
    "tpu.trace_start"() <{level = 10 : i32, message = "bqk,bkd->bqd"}> : () -> ()
    %cst_20 = arith.constant dense<0.000000e+00> : vector<1x17x8xf32>
    %67 = tpu.matmul %66, %53, %cst_20 {dimension_numbers = #tpu.dot_dimension_numbers<[2], [1], [1], [2], [0, 0, 0, 1, 1, 2], [0], [0]>} : vector<1x17x17xbf16>, vector<1x17x8xbf16>, vector<1x17x8xf32> -> vector<1x17x8xf32>
    "tpu.trace_stop"() : () -> ()
    %68 = arith.truncf %67 : vector<1x17x8xf32> to vector<1x17x8xbf16>
    %c0_21 = arith.constant 0 : index
    %c0_22 = arith.constant 0 : index
    %c16 = arith.constant 16 : index
    %69 = vector.load %arg2[%c0_21, %c0_22, %c16] : memref<1x17x32xbf16, #tpu.memory_space<vmem>>, vector<1x17x8xbf16>
    tpu.vector_store %arg2[%c0_21, %c0_22, %c16], %68 {strides = array<i32>} : memref<1x17x32xbf16, #tpu.memory_space<vmem>>, vector<1x17x8xbf16>,
    %70 = vector.extract_strided_slice %1 {offsets = [0, 0, 24], sizes = [1, 17, 8], strides = [1, 1, 1]} : vector<1x17x32xbf16> to vector<1x17x8xbf16>
    %71 = arith.extf %70 : vector<1x17x8xbf16> to vector<1x17x8xf32>
    %cst_23 = arith.constant 0.353553385 : f32
    %72 = vector.broadcast %cst_23 : f32 to vector<1x17x8xf32>
    %73 = arith.mulf %71, %72 : vector<1x17x8xf32>
    %74 = vector.extract_strided_slice %2 {offsets = [0, 0, 24], sizes = [1, 17, 8], strides = [1, 1, 1]} : vector<1x17x32xbf16> to vector<1x17x8xbf16>
    %75 = vector.extract_strided_slice %3 {offsets = [0, 0, 24], sizes = [1, 17, 8], strides = [1, 1, 1]} : vector<1x17x32xbf16> to vector<1x17x8xbf16>
    %76 = arith.truncf %73 : vector<1x17x8xf32> to vector<1x17x8xbf16>
    "tpu.trace_start"() <{level = 10 : i32, message = "bqd,bkd->bqk"}> : () -> ()
    %cst_24 = arith.constant dense<0.000000e+00> : vector<1x17x17xf32>
    %77 = tpu.matmul %76, %74, %cst_24 {dimension_numbers = #tpu.dot_dimension_numbers<[2], [2], [1], [1], [0, 0, 0, 1, 1, 1], [0], [0]>} : vector<1x17x8xbf16>, vector<1x17x8xbf16>, vector<1x17x17xf32> -> vector<1x17x17xf32>
    "tpu.trace_stop"() : () -> ()
    %cst_25 = arith.constant dense<0xFF800000> : vector<1x17xf32>
    %78 = vector.multi_reduction <maximumf>, %77, %cst_25 [2] : vector<1x17x17xf32> to vector<1x17xf32>
    %79 = vector.shape_cast %78 : vector<1x17xf32> to vector<1x17x1xf32>
    %80 = vector.broadcast %79 : vector<1x17x1xf32> to vector<1x17x17xf32>
    %81 = arith.subf %77, %80 : vector<1x17x17xf32>
    %82 = math.exp %81 : vector<1x17x17xf32>
    %cst_26 = arith.constant dense<0.000000e+00> : vector<1x17xf32>
    %83 = vector.multi_reduction <add>, %82, %cst_26 [2] : vector<1x17x17xf32> to vector<1x17xf32>
    %84 = vector.shape_cast %83 : vector<1x17xf32> to vector<1x17x1xf32>
    %85 = tpu.reciprocal %84 {approx = true} : vector<1x17x1xf32> -> vector<1x17x1xf32>
    %86 = vector.broadcast %85 : vector<1x17x1xf32> to vector<1x17x17xf32>
    %87 = arith.mulf %82, %86 : vector<1x17x17xf32>
    %88 = arith.truncf %87 : vector<1x17x17xf32> to vector<1x17x17xbf16>
    "tpu.trace_start"() <{level = 10 : i32, message = "bqk,bkd->bqd"}> : () -> ()
    %cst_27 = arith.constant dense<0.000000e+00> : vector<1x17x8xf32>
    %89 = tpu.matmul %88, %75, %cst_27 {dimension_numbers = #tpu.dot_dimension_numbers<[2], [1], [1], [2], [0, 0, 0, 1, 1, 2], [0], [0]>} : vector<1x17x17xbf16>, vector<1x17x8xbf16>, vector<1x17x8xf32> -> vector<1x17x8xf32>
    "tpu.trace_stop"() : () -> ()
    %90 = arith.truncf %89 : vector<1x17x8xf32> to vector<1x17x8xbf16>
    %c0_28 = arith.constant 0 : index
    %c0_29 = arith.constant 0 : index
    %c24 = arith.constant 24 : index
    %91 = vector.load %arg2[%c0_28, %c0_29, %c24] : memref<1x17x32xbf16, #tpu.memory_space<vmem>>, vector<1x17x8xbf16>
    tpu.vector_store %arg2[%c0_28, %c0_29, %c24], %90 {strides = array<i32>} : memref<1x17x32xbf16, #tpu.memory_space<vmem>>, vector<1x17x8xbf16>,
    return
  }
  func.func @transform_0(%arg0: i32) -> (i32, i32, i32) {
    %c0_i32 = arith.constant 0 : i32
    %c0_i32_0 = arith.constant 0 : i32
    %c0_i32_1 = arith.constant 0 : i32
    return %arg0, %c0_i32, %c0_i32_0 : i32, i32, i32
  }
  func.func @transform_1(%arg0: i32) -> (i32, i32, i32) {
    %c0_i32 = arith.constant 0 : i32
    %c0_i32_0 = arith.constant 0 : i32
    %c0_i32_1 = arith.constant 0 : i32
    return %arg0, %c0_i32, %c0_i32_0 : i32, i32, i32
  }
}

module attributes {stable_mosaic.version = 11 : i64} {
  func.func @_fused_matmul_kernel(%arg0: i32, %arg1: i32, %arg2: i32, %arg3: memref<34x32xf32, #tpu.memory_space<vmem>>, %arg4: memref<32x96xbf16, #tpu.memory_space<vmem>>, %arg5: memref<1x96xf32, #tpu.memory_space<vmem>>, %arg6: memref<1x32xf32, #tpu.memory_space<vmem>>, %arg7: memref<1x32xf32, #tpu.memory_space<vmem>>, %arg8: memref<34x96xbf16, #tpu.memory_space<vmem>>) attributes {dimension_semantics = [#tpu.dimension_semantics<parallel>, #tpu.dimension_semantics<parallel>, #tpu.dimension_semantics<arbitrary>], iteration_bounds = array<i64: 1, 1, 1>, scalar_prefetch = 0 : i64, scratch_operands = 0 : i64, tpu.core_type = #tpu.core_type<tc>, window_params = [{transform_indices = @transform_0, window_bounds = array<i64: 34, 32>}, {transform_indices = @transform_1, window_bounds = array<i64: 32, 96>}, {transform_indices = @transform_2, window_bounds = array<i64: 1, 96>}, {transform_indices = @transform_3, window_bounds = array<i64: 1, 32>}, {transform_indices = @transform_4, window_bounds = array<i64: 1, 32>}, {transform_indices = @transform_5, window_bounds = array<i64: 34, 96>}]} {
    %c0 = arith.constant 0 : index
    %c0_0 = arith.constant 0 : index
    %0 = vector.load %arg3[%c0, %c0_0] : memref<34x32xf32, #tpu.memory_space<vmem>>, vector<34x32xf32>
    %cst = arith.constant dense<0.000000e+00> : vector<34xf32>
    %1 = vector.multi_reduction <add>, %0, %cst [1] : vector<34x32xf32> to vector<34xf32>
    %2 = vector.shape_cast %1 : vector<34xf32> to vector<34x1xf32>
    %cst_1 = arith.constant 3.200000e+01 : f32
    %3 = vector.broadcast %cst_1 : f32 to vector<34x1xf32>
    %4 = arith.divf %2, %3 : vector<34x1xf32>
    %5 = vector.broadcast %4 : vector<34x1xf32> to vector<34x32xf32>
    %6 = arith.subf %0, %5 : vector<34x32xf32>
    %7 = arith.mulf %6, %6 : vector<34x32xf32>
    %cst_2 = arith.constant dense<0.000000e+00> : vector<34xf32>
    %8 = vector.multi_reduction <add>, %7, %cst_2 [1] : vector<34x32xf32> to vector<34xf32>
    %9 = vector.shape_cast %8 : vector<34xf32> to vector<34x1xf32>
    %cst_3 = arith.constant 3.200000e+01 : f32
    %10 = vector.broadcast %cst_3 : f32 to vector<34x1xf32>
    %11 = arith.divf %9, %10 : vector<34x1xf32>
    %cst_4 = arith.constant 9.99999997E-7 : f32
    %12 = vector.broadcast %cst_4 : f32 to vector<34x1xf32>
    %13 = arith.addf %11, %12 : vector<34x1xf32>
    %14 = math.rsqrt %13 : vector<34x1xf32>
    %15 = vector.broadcast %14 : vector<34x1xf32> to vector<34x32xf32>
    %16 = arith.mulf %6, %15 : vector<34x32xf32>
    %c0_5 = arith.constant 0 : index
    %c0_6 = arith.constant 0 : index
    %17 = vector.load %arg6[%c0_5, %c0_6] : memref<1x32xf32, #tpu.memory_space<vmem>>, vector<1x32xf32>
    %18 = vector.broadcast %17 : vector<1x32xf32> to vector<34x32xf32>
    %19 = arith.mulf %16, %18 : vector<34x32xf32>
    %c0_7 = arith.constant 0 : index
    %c0_8 = arith.constant 0 : index
    %20 = vector.load %arg7[%c0_7, %c0_8] : memref<1x32xf32, #tpu.memory_space<vmem>>, vector<1x32xf32>
    %21 = vector.broadcast %20 : vector<1x32xf32> to vector<34x32xf32>
    %22 = arith.addf %19, %21 : vector<34x32xf32>
    %23 = arith.truncf %22 : vector<34x32xf32> to vector<34x32xbf16>
    %c0_9 = arith.constant 0 : index
    %c0_10 = arith.constant 0 : index
    %24 = vector.load %arg4[%c0_9, %c0_10] : memref<32x96xbf16, #tpu.memory_space<vmem>>, vector<32x96xbf16>
    %cst_11 = arith.constant dense<0.000000e+00> : vector<34x96xf32>
    %25 = tpu.matmul %23, %24, %cst_11 {dimension_numbers = #tpu.dot_dimension_numbers<[1], [0], [0], [1], [0, 0, 1, 1], [], []>} : vector<34x32xbf16>, vector<32x96xbf16>, vector<34x96xf32> -> vector<34x96xf32>
    %c0_12 = arith.constant 0 : index
    %c0_13 = arith.constant 0 : index
    %26 = vector.load %arg5[%c0_12, %c0_13] : memref<1x96xf32, #tpu.memory_space<vmem>>, vector<1x96xf32>
    %27 = vector.broadcast %26 : vector<1x96xf32> to vector<34x96xf32>
    %28 = arith.addf %25, %27 : vector<34x96xf32>
    %29 = arith.truncf %28 : vector<34x96xf32> to vector<34x96xbf16>
    %c0_14 = arith.constant 0 : index
    %c0_15 = arith.constant 0 : index
    %30 = vector.load %arg8[%c0_14, %c0_15] : memref<34x96xbf16, #tpu.memory_space<vmem>>, vector<34x96xbf16>
    tpu.vector_store %arg8[%c0_14, %c0_15], %29 {strides = array<i32>} : memref<34x96xbf16, #tpu.memory_space<vmem>>, vector<34x96xbf16>,
    return
  }
  func.func @transform_0(%arg0: i32, %arg1: i32, %arg2: i32) -> (i32, i32) {
    %c0_i32 = arith.constant 0 : i32
    return %arg0, %arg2 : i32, i32
  }
  func.func @transform_1(%arg0: i32, %arg1: i32, %arg2: i32) -> (i32, i32) {
    %c0_i32 = arith.constant 0 : i32
    return %arg2, %arg1 : i32, i32
  }
  func.func @transform_2(%arg0: i32, %arg1: i32, %arg2: i32) -> (i32, i32) {
    %c0_i32 = arith.constant 0 : i32
    %c0_i32_0 = arith.constant 0 : i32
    return %c0_i32, %arg1 : i32, i32
  }
  func.func @transform_3(%arg0: i32, %arg1: i32, %arg2: i32) -> (i32, i32) {
    %c0_i32 = arith.constant 0 : i32
    %c0_i32_0 = arith.constant 0 : i32
    return %c0_i32, %arg2 : i32, i32
  }
  func.func @transform_4(%arg0: i32, %arg1: i32, %arg2: i32) -> (i32, i32) {
    %c0_i32 = arith.constant 0 : i32
    %c0_i32_0 = arith.constant 0 : i32
    return %c0_i32, %arg2 : i32, i32
  }
  func.func @transform_5(%arg0: i32, %arg1: i32, %arg2: i32) -> (i32, i32) {
    %c0_i32 = arith.constant 0 : i32
    return %arg0, %arg1 : i32, i32
  }
}

module attributes {stable_mosaic.version = 11 : i64} {
  func.func @_fused_matmul_kernel(%arg0: i32, %arg1: i32, %arg2: i32, %arg3: memref<34x32xbf16, #tpu.memory_space<vmem>>, %arg4: memref<32x32xbf16, #tpu.memory_space<vmem>>, %arg5: memref<1x32xf32, #tpu.memory_space<vmem>>, %arg6: memref<34x32xf32, #tpu.memory_space<vmem>>, %arg7: memref<34x32xf32, #tpu.memory_space<vmem>>) attributes {dimension_semantics = [#tpu.dimension_semantics<parallel>, #tpu.dimension_semantics<parallel>, #tpu.dimension_semantics<arbitrary>], iteration_bounds = array<i64: 1, 1, 1>, scalar_prefetch = 0 : i64, scratch_operands = 0 : i64, tpu.core_type = #tpu.core_type<tc>, window_params = [{transform_indices = @transform_0, window_bounds = array<i64: 34, 32>}, {transform_indices = @transform_1, window_bounds = array<i64: 32, 32>}, {transform_indices = @transform_2, window_bounds = array<i64: 1, 32>}, {transform_indices = @transform_3, window_bounds = array<i64: 34, 32>}, {transform_indices = @transform_4, window_bounds = array<i64: 34, 32>}]} {
    %c0 = arith.constant 0 : index
    %c0_0 = arith.constant 0 : index
    %0 = vector.load %arg3[%c0, %c0_0] : memref<34x32xbf16, #tpu.memory_space<vmem>>, vector<34x32xbf16>
    %c0_1 = arith.constant 0 : index
    %c0_2 = arith.constant 0 : index
    %1 = vector.load %arg4[%c0_1, %c0_2] : memref<32x32xbf16, #tpu.memory_space<vmem>>, vector<32x32xbf16>
    %cst = arith.constant dense<0.000000e+00> : vector<34x32xf32>
    %2 = tpu.matmul %0, %1, %cst {dimension_numbers = #tpu.dot_dimension_numbers<[1], [0], [0], [1], [0, 0, 1, 1], [], []>} : vector<34x32xbf16>, vector<32x32xbf16>, vector<34x32xf32> -> vector<34x32xf32>
    %c0_3 = arith.constant 0 : index
    %c0_4 = arith.constant 0 : index
    %3 = vector.load %arg5[%c0_3, %c0_4] : memref<1x32xf32, #tpu.memory_space<vmem>>, vector<1x32xf32>
    %4 = vector.broadcast %3 : vector<1x32xf32> to vector<34x32xf32>
    %5 = arith.addf %2, %4 : vector<34x32xf32>
    %c0_5 = arith.constant 0 : index
    %c0_6 = arith.constant 0 : index
    %6 = vector.load %arg6[%c0_5, %c0_6] : memref<34x32xf32, #tpu.memory_space<vmem>>, vector<34x32xf32>
    %7 = arith.addf %5, %6 : vector<34x32xf32>
    %c0_7 = arith.constant 0 : index
    %c0_8 = arith.constant 0 : index
    %8 = vector.load %arg7[%c0_7, %c0_8] : memref<34x32xf32, #tpu.memory_space<vmem>>, vector<34x32xf32>
    tpu.vector_store %arg7[%c0_7, %c0_8], %7 {strides = array<i32>} : memref<34x32xf32, #tpu.memory_space<vmem>>, vector<34x32xf32>,
    return
  }
  func.func @transform_0(%arg0: i32, %arg1: i32, %arg2: i32) -> (i32, i32) {
    %c0_i32 = arith.constant 0 : i32
    return %arg0, %arg2 : i32, i32
  }
  func.func @transform_1(%arg0: i32, %arg1: i32, %arg2: i32) -> (i32, i32) {
    %c0_i32 = arith.constant 0 : i32
    return %arg2, %arg1 : i32, i32
  }
  func.func @transform_2(%arg0: i32, %arg1: i32, %arg2: i32) -> (i32, i32) {
    %c0_i32 = arith.constant 0 : i32
    %c0_i32_0 = arith.constant 0 : i32
    return %c0_i32, %arg1 : i32, i32
  }
  func.func @transform_3(%arg0: i32, %arg1: i32, %arg2: i32) -> (i32, i32) {
    %c0_i32 = arith.constant 0 : i32
    return %arg0, %arg1 : i32, i32
  }
  func.func @transform_4(%arg0: i32, %arg1: i32, %arg2: i32) -> (i32, i32) {
    %c0_i32 = arith.constant 0 : i32
    return %arg0, %arg1 : i32, i32
  }
}

module attributes {stable_mosaic.version = 11 : i64} {
  func.func @_fused_matmul_kernel(%arg0: i32, %arg1: i32, %arg2: i32, %arg3: memref<34x32xf32, #tpu.memory_space<vmem>>, %arg4: memref<32x128xbf16, #tpu.memory_space<vmem>>, %arg5: memref<1x128xf32, #tpu.memory_space<vmem>>, %arg6: memref<1x32xf32, #tpu.memory_space<vmem>>, %arg7: memref<1x32xf32, #tpu.memory_space<vmem>>, %arg8: memref<34x128xbf16, #tpu.memory_space<vmem>>) attributes {dimension_semantics = [#tpu.dimension_semantics<parallel>, #tpu.dimension_semantics<parallel>, #tpu.dimension_semantics<arbitrary>], iteration_bounds = array<i64: 1, 1, 1>, scalar_prefetch = 0 : i64, scratch_operands = 0 : i64, tpu.core_type = #tpu.core_type<tc>, window_params = [{transform_indices = @transform_0, window_bounds = array<i64: 34, 32>}, {transform_indices = @transform_1, window_bounds = array<i64: 32, 128>}, {transform_indices = @transform_2, window_bounds = array<i64: 1, 128>}, {transform_indices = @transform_3, window_bounds = array<i64: 1, 32>}, {transform_indices = @transform_4, window_bounds = array<i64: 1, 32>}, {transform_indices = @transform_5, window_bounds = array<i64: 34, 128>}]} {
    %c0 = arith.constant 0 : index
    %c0_0 = arith.constant 0 : index
    %0 = vector.load %arg3[%c0, %c0_0] : memref<34x32xf32, #tpu.memory_space<vmem>>, vector<34x32xf32>
    %cst = arith.constant dense<0.000000e+00> : vector<34xf32>
    %1 = vector.multi_reduction <add>, %0, %cst [1] : vector<34x32xf32> to vector<34xf32>
    %2 = vector.shape_cast %1 : vector<34xf32> to vector<34x1xf32>
    %cst_1 = arith.constant 3.200000e+01 : f32
    %3 = vector.broadcast %cst_1 : f32 to vector<34x1xf32>
    %4 = arith.divf %2, %3 : vector<34x1xf32>
    %5 = vector.broadcast %4 : vector<34x1xf32> to vector<34x32xf32>
    %6 = arith.subf %0, %5 : vector<34x32xf32>
    %7 = arith.mulf %6, %6 : vector<34x32xf32>
    %cst_2 = arith.constant dense<0.000000e+00> : vector<34xf32>
    %8 = vector.multi_reduction <add>, %7, %cst_2 [1] : vector<34x32xf32> to vector<34xf32>
    %9 = vector.shape_cast %8 : vector<34xf32> to vector<34x1xf32>
    %cst_3 = arith.constant 3.200000e+01 : f32
    %10 = vector.broadcast %cst_3 : f32 to vector<34x1xf32>
    %11 = arith.divf %9, %10 : vector<34x1xf32>
    %cst_4 = arith.constant 9.99999997E-7 : f32
    %12 = vector.broadcast %cst_4 : f32 to vector<34x1xf32>
    %13 = arith.addf %11, %12 : vector<34x1xf32>
    %14 = math.rsqrt %13 : vector<34x1xf32>
    %15 = vector.broadcast %14 : vector<34x1xf32> to vector<34x32xf32>
    %16 = arith.mulf %6, %15 : vector<34x32xf32>
    %c0_5 = arith.constant 0 : index
    %c0_6 = arith.constant 0 : index
    %17 = vector.load %arg6[%c0_5, %c0_6] : memref<1x32xf32, #tpu.memory_space<vmem>>, vector<1x32xf32>
    %18 = vector.broadcast %17 : vector<1x32xf32> to vector<34x32xf32>
    %19 = arith.mulf %16, %18 : vector<34x32xf32>
    %c0_7 = arith.constant 0 : index
    %c0_8 = arith.constant 0 : index
    %20 = vector.load %arg7[%c0_7, %c0_8] : memref<1x32xf32, #tpu.memory_space<vmem>>, vector<1x32xf32>
    %21 = vector.broadcast %20 : vector<1x32xf32> to vector<34x32xf32>
    %22 = arith.addf %19, %21 : vector<34x32xf32>
    %23 = arith.truncf %22 : vector<34x32xf32> to vector<34x32xbf16>
    %c0_9 = arith.constant 0 : index
    %c0_10 = arith.constant 0 : index
    %24 = vector.load %arg4[%c0_9, %c0_10] : memref<32x128xbf16, #tpu.memory_space<vmem>>, vector<32x128xbf16>
    %cst_11 = arith.constant dense<0.000000e+00> : vector<34x128xf32>
    %25 = tpu.matmul %23, %24, %cst_11 {dimension_numbers = #tpu.dot_dimension_numbers<[1], [0], [0], [1], [0, 0, 1, 1], [], []>} : vector<34x32xbf16>, vector<32x128xbf16>, vector<34x128xf32> -> vector<34x128xf32>
    %c0_12 = arith.constant 0 : index
    %c0_13 = arith.constant 0 : index
    %26 = vector.load %arg5[%c0_12, %c0_13] : memref<1x128xf32, #tpu.memory_space<vmem>>, vector<1x128xf32>
    %27 = vector.broadcast %26 : vector<1x128xf32> to vector<34x128xf32>
    %28 = arith.addf %25, %27 : vector<34x128xf32>
    %cst_14 = arith.constant 5.000000e-01 : f32
    %29 = vector.broadcast %cst_14 : f32 to vector<34x128xf32>
    %30 = arith.mulf %29, %28 : vector<34x128xf32>
    %cst_15 = arith.constant 0.707106769 : f32
    %31 = vector.broadcast %cst_15 : f32 to vector<34x128xf32>
    %32 = arith.mulf %28, %31 : vector<34x128xf32>
    %cst_16 = arith.constant 0.000000e+00 : f32
    %33 = vector.broadcast %cst_16 : f32 to vector<34x128xf32>
    %34 = arith.cmpf olt, %32, %33 : vector<34x128xf32>
    %cst_17 = arith.constant -1.000000e+00 : f32
    %cst_18 = arith.constant 1.000000e+00 : f32
    %35 = vector.broadcast %cst_17 : f32 to vector<34x128xf32>
    %36 = vector.broadcast %cst_18 : f32 to vector<34x128xf32>
    %37 = arith.select %34, %35, %36 : vector<34x128xi1>, vector<34x128xf32>
    %38 = math.absf %32 : vector<34x128xf32>
    %cst_19 = arith.constant 0.327591091 : f32
    %39 = vector.broadcast %cst_19 : f32 to vector<34x128xf32>
    %40 = arith.mulf %39, %38 : vector<34x128xf32>
    %cst_20 = arith.constant 1.000000e+00 : f32
    %41 = vector.broadcast %cst_20 : f32 to vector<34x128xf32>
    %42 = arith.addf %41, %40 : vector<34x128xf32>
    %cst_21 = arith.constant 1.000000e+00 : f32
    %43 = vector.broadcast %cst_21 : f32 to vector<34x128xf32>
    %44 = arith.divf %43, %42 : vector<34x128xf32>
    %cst_22 = arith.constant 1.06140542 : f32
    %45 = vector.broadcast %cst_22 : f32 to vector<34x128xf32>
    %46 = arith.mulf %45, %44 : vector<34x128xf32>
    %cst_23 = arith.constant -1.45315206 : f32
    %47 = vector.broadcast %cst_23 : f32 to vector<34x128xf32>
    %48 = arith.addf %46, %47 : vector<34x128xf32>
    %49 = arith.mulf %48, %44 : vector<34x128xf32>
    %cst_24 = arith.constant 1.42141378 : f32
    %50 = vector.broadcast %cst_24 : f32 to vector<34x128xf32>
    %51 = arith.addf %49, %50 : vector<34x128xf32>
    %52 = arith.mulf %51, %44 : vector<34x128xf32>
    %cst_25 = arith.constant -0.284496725 : f32
    %53 = vector.broadcast %cst_25 : f32 to vector<34x128xf32>
    %54 = arith.addf %52, %53 : vector<34x128xf32>
    %55 = arith.mulf %54, %44 : vector<34x128xf32>
    %cst_26 = arith.constant 0.254829586 : f32
    %56 = vector.broadcast %cst_26 : f32 to vector<34x128xf32>
    %57 = arith.addf %55, %56 : vector<34x128xf32>
    %58 = arith.mulf %57, %44 : vector<34x128xf32>
    %cst_27 = arith.constant 0.000000e+00 : f32
    %59 = vector.broadcast %cst_27 : f32 to vector<34x128xf32>
    %60 = arith.subf %59, %38 : vector<34x128xf32>
    %61 = arith.mulf %60, %38 : vector<34x128xf32>
    %62 = math.exp %61 : vector<34x128xf32>
    %63 = arith.mulf %58, %62 : vector<34x128xf32>
    %cst_28 = arith.constant 1.000000e+00 : f32
    %64 = vector.broadcast %cst_28 : f32 to vector<34x128xf32>
    %65 = arith.subf %64, %63 : vector<34x128xf32>
    %66 = arith.mulf %37, %65 : vector<34x128xf32>
    %cst_29 = arith.constant 1.000000e+00 : f32
    %67 = vector.broadcast %cst_29 : f32 to vector<34x128xf32>
    %68 = arith.addf %67, %66 : vector<34x128xf32>
    %69 = arith.mulf %30, %68 : vector<34x128xf32>
    %70 = arith.truncf %69 : vector<34x128xf32> to vector<34x128xbf16>
    %c0_30 = arith.constant 0 : index
    %c0_31 = arith.constant 0 : index
    %71 = vector.load %arg8[%c0_30, %c0_31] : memref<34x128xbf16, #tpu.memory_space<vmem>>, vector<34x128xbf16>
    tpu.vector_store %arg8[%c0_30, %c0_31], %70 {strides = array<i32>} : memref<34x128xbf16, #tpu.memory_space<vmem>>, vector<34x128xbf16>,
    return
  }
  func.func @transform_0(%arg0: i32, %arg1: i32, %arg2: i32) -> (i32, i32) {
    %c0_i32 = arith.constant 0 : i32
    return %arg0, %arg2 : i32, i32
  }
  func.func @transform_1(%arg0: i32, %arg1: i32, %arg2: i32) -> (i32, i32) {
    %c0_i32 = arith.constant 0 : i32
    return %arg2, %arg1 : i32, i32
  }
  func.func @transform_2(%arg0: i32, %arg1: i32, %arg2: i32) -> (i32, i32) {
    %c0_i32 = arith.constant 0 : i32
    %c0_i32_0 = arith.constant 0 : i32
    return %c0_i32, %arg1 : i32, i32
  }
  func.func @transform_3(%arg0: i32, %arg1: i32, %arg2: i32) -> (i32, i32) {
    %c0_i32 = arith.constant 0 : i32
    %c0_i32_0 = arith.constant 0 : i32
    return %c0_i32, %arg2 : i32, i32
  }
  func.func @transform_4(%arg0: i32, %arg1: i32, %arg2: i32) -> (i32, i32) {
    %c0_i32 = arith.constant 0 : i32
    %c0_i32_0 = arith.constant 0 : i32
    return %c0_i32, %arg2 : i32, i32
  }
  func.func @transform_5(%arg0: i32, %arg1: i32, %arg2: i32) -> (i32, i32) {
    %c0_i32 = arith.constant 0 : i32
    return %arg0, %arg1 : i32, i32
  }
}

module attributes {stable_mosaic.version = 11 : i64} {
  func.func @_fused_matmul_kernel(%arg0: i32, %arg1: i32, %arg2: i32, %arg3: memref<34x128xbf16, #tpu.memory_space<vmem>>, %arg4: memref<128x32xbf16, #tpu.memory_space<vmem>>, %arg5: memref<1x32xf32, #tpu.memory_space<vmem>>, %arg6: memref<34x32xf32, #tpu.memory_space<vmem>>, %arg7: memref<34x32xf32, #tpu.memory_space<vmem>>) attributes {dimension_semantics = [#tpu.dimension_semantics<parallel>, #tpu.dimension_semantics<parallel>, #tpu.dimension_semantics<arbitrary>], iteration_bounds = array<i64: 1, 1, 1>, scalar_prefetch = 0 : i64, scratch_operands = 0 : i64, tpu.core_type = #tpu.core_type<tc>, window_params = [{transform_indices = @transform_0, window_bounds = array<i64: 34, 128>}, {transform_indices = @transform_1, window_bounds = array<i64: 128, 32>}, {transform_indices = @transform_2, window_bounds = array<i64: 1, 32>}, {transform_indices = @transform_3, window_bounds = array<i64: 34, 32>}, {transform_indices = @transform_4, window_bounds = array<i64: 34, 32>}]} {
    %c0 = arith.constant 0 : index
    %c0_0 = arith.constant 0 : index
    %0 = vector.load %arg3[%c0, %c0_0] : memref<34x128xbf16, #tpu.memory_space<vmem>>, vector<34x128xbf16>
    %c0_1 = arith.constant 0 : index
    %c0_2 = arith.constant 0 : index
    %1 = vector.load %arg4[%c0_1, %c0_2] : memref<128x32xbf16, #tpu.memory_space<vmem>>, vector<128x32xbf16>
    %cst = arith.constant dense<0.000000e+00> : vector<34x32xf32>
    %2 = tpu.matmul %0, %1, %cst {dimension_numbers = #tpu.dot_dimension_numbers<[1], [0], [0], [1], [0, 0, 1, 1], [], []>} : vector<34x128xbf16>, vector<128x32xbf16>, vector<34x32xf32> -> vector<34x32xf32>
    %c0_3 = arith.constant 0 : index
    %c0_4 = arith.constant 0 : index
    %3 = vector.load %arg5[%c0_3, %c0_4] : memref<1x32xf32, #tpu.memory_space<vmem>>, vector<1x32xf32>
    %4 = vector.broadcast %3 : vector<1x32xf32> to vector<34x32xf32>
    %5 = arith.addf %2, %4 : vector<34x32xf32>
    %c0_5 = arith.constant 0 : index
    %c0_6 = arith.constant 0 : index
    %6 = vector.load %arg6[%c0_5, %c0_6] : memref<34x32xf32, #tpu.memory_space<vmem>>, vector<34x32xf32>
    %7 = arith.addf %5, %6 : vector<34x32xf32>
    %c0_7 = arith.constant 0 : index
    %c0_8 = arith.constant 0 : index
    %8 = vector.load %arg7[%c0_7, %c0_8] : memref<34x32xf32, #tpu.memory_space<vmem>>, vector<34x32xf32>
    tpu.vector_store %arg7[%c0_7, %c0_8], %7 {strides = array<i32>} : memref<34x32xf32, #tpu.memory_space<vmem>>, vector<34x32xf32>,
    return
  }
  func.func @transform_0(%arg0: i32, %arg1: i32, %arg2: i32) -> (i32, i32) {
    %c0_i32 = arith.constant 0 : i32
    return %arg0, %arg2 : i32, i32
  }
  func.func @transform_1(%arg0: i32, %arg1: i32, %arg2: i32) -> (i32, i32) {
    %c0_i32 = arith.constant 0 : i32
    return %arg2, %arg1 : i32, i32
  }
  func.func @transform_2(%arg0: i32, %arg1: i32, %arg2: i32) -> (i32, i32) {
    %c0_i32 = arith.constant 0 : i32
    %c0_i32_0 = arith.constant 0 : i32
    return %c0_i32, %arg1 : i32, i32
  }
  func.func @transform_3(%arg0: i32, %arg1: i32, %arg2: i32) -> (i32, i32) {
    %c0_i32 = arith.constant 0 : i32
    return %arg0, %arg1 : i32, i32
  }
  func.func @transform_4(%arg0: i32, %arg1: i32, %arg2: i32) -> (i32, i32) {
    %c0_i32 = arith.constant 0 : i32
    return %arg0, %arg1 : i32, i32
  }
}

module attributes {stable_mosaic.version = 11 : i64} {
  func.func @_fused_matmul_kernel(%arg0: i32, %arg1: i32, %arg2: i32, %arg3: memref<34x32xf32, #tpu.memory_space<vmem>>, %arg4: memref<32x48xbf16, #tpu.memory_space<vmem>>, %arg5: memref<1x48xf32, #tpu.memory_space<vmem>>, %arg6: memref<1x32xf32, #tpu.memory_space<vmem>>, %arg7: memref<1x32xf32, #tpu.memory_space<vmem>>, %arg8: memref<34x48xf32, #tpu.memory_space<vmem>>) attributes {dimension_semantics = [#tpu.dimension_semantics<parallel>, #tpu.dimension_semantics<parallel>, #tpu.dimension_semantics<arbitrary>], iteration_bounds = array<i64: 1, 1, 1>, scalar_prefetch = 0 : i64, scratch_operands = 0 : i64, tpu.core_type = #tpu.core_type<tc>, window_params = [{transform_indices = @transform_0, window_bounds = array<i64: 34, 32>}, {transform_indices = @transform_1, window_bounds = array<i64: 32, 48>}, {transform_indices = @transform_2, window_bounds = array<i64: 1, 48>}, {transform_indices = @transform_3, window_bounds = array<i64: 1, 32>}, {transform_indices = @transform_4, window_bounds = array<i64: 1, 32>}, {transform_indices = @transform_5, window_bounds = array<i64: 34, 48>}]} {
    %c0 = arith.constant 0 : index
    %c0_0 = arith.constant 0 : index
    %0 = vector.load %arg3[%c0, %c0_0] : memref<34x32xf32, #tpu.memory_space<vmem>>, vector<34x32xf32>
    %cst = arith.constant dense<0.000000e+00> : vector<34xf32>
    %1 = vector.multi_reduction <add>, %0, %cst [1] : vector<34x32xf32> to vector<34xf32>
    %2 = vector.shape_cast %1 : vector<34xf32> to vector<34x1xf32>
    %cst_1 = arith.constant 3.200000e+01 : f32
    %3 = vector.broadcast %cst_1 : f32 to vector<34x1xf32>
    %4 = arith.divf %2, %3 : vector<34x1xf32>
    %5 = vector.broadcast %4 : vector<34x1xf32> to vector<34x32xf32>
    %6 = arith.subf %0, %5 : vector<34x32xf32>
    %7 = arith.mulf %6, %6 : vector<34x32xf32>
    %cst_2 = arith.constant dense<0.000000e+00> : vector<34xf32>
    %8 = vector.multi_reduction <add>, %7, %cst_2 [1] : vector<34x32xf32> to vector<34xf32>
    %9 = vector.shape_cast %8 : vector<34xf32> to vector<34x1xf32>
    %cst_3 = arith.constant 3.200000e+01 : f32
    %10 = vector.broadcast %cst_3 : f32 to vector<34x1xf32>
    %11 = arith.divf %9, %10 : vector<34x1xf32>
    %cst_4 = arith.constant 9.99999997E-7 : f32
    %12 = vector.broadcast %cst_4 : f32 to vector<34x1xf32>
    %13 = arith.addf %11, %12 : vector<34x1xf32>
    %14 = math.rsqrt %13 : vector<34x1xf32>
    %15 = vector.broadcast %14 : vector<34x1xf32> to vector<34x32xf32>
    %16 = arith.mulf %6, %15 : vector<34x32xf32>
    %c0_5 = arith.constant 0 : index
    %c0_6 = arith.constant 0 : index
    %17 = vector.load %arg6[%c0_5, %c0_6] : memref<1x32xf32, #tpu.memory_space<vmem>>, vector<1x32xf32>
    %18 = vector.broadcast %17 : vector<1x32xf32> to vector<34x32xf32>
    %19 = arith.mulf %16, %18 : vector<34x32xf32>
    %c0_7 = arith.constant 0 : index
    %c0_8 = arith.constant 0 : index
    %20 = vector.load %arg7[%c0_7, %c0_8] : memref<1x32xf32, #tpu.memory_space<vmem>>, vector<1x32xf32>
    %21 = vector.broadcast %20 : vector<1x32xf32> to vector<34x32xf32>
    %22 = arith.addf %19, %21 : vector<34x32xf32>
    %23 = arith.truncf %22 : vector<34x32xf32> to vector<34x32xbf16>
    %c0_9 = arith.constant 0 : index
    %c0_10 = arith.constant 0 : index
    %24 = vector.load %arg4[%c0_9, %c0_10] : memref<32x48xbf16, #tpu.memory_space<vmem>>, vector<32x48xbf16>
    %cst_11 = arith.constant dense<0.000000e+00> : vector<34x48xf32>
    %25 = tpu.matmul %23, %24, %cst_11 {dimension_numbers = #tpu.dot_dimension_numbers<[1], [0], [0], [1], [0, 0, 1, 1], [], []>} : vector<34x32xbf16>, vector<32x48xbf16>, vector<34x48xf32> -> vector<34x48xf32>
    %c0_12 = arith.constant 0 : index
    %c0_13 = arith.constant 0 : index
    %26 = vector.load %arg5[%c0_12, %c0_13] : memref<1x48xf32, #tpu.memory_space<vmem>>, vector<1x48xf32>
    %27 = vector.broadcast %26 : vector<1x48xf32> to vector<34x48xf32>
    %28 = arith.addf %25, %27 : vector<34x48xf32>
    %c0_14 = arith.constant 0 : index
    %c0_15 = arith.constant 0 : index
    %29 = vector.load %arg8[%c0_14, %c0_15] : memref<34x48xf32, #tpu.memory_space<vmem>>, vector<34x48xf32>
    tpu.vector_store %arg8[%c0_14, %c0_15], %28 {strides = array<i32>} : memref<34x48xf32, #tpu.memory_space<vmem>>, vector<34x48xf32>,
    return
  }
  func.func @transform_0(%arg0: i32, %arg1: i32, %arg2: i32) -> (i32, i32) {
    %c0_i32 = arith.constant 0 : i32
    return %arg0, %arg2 : i32, i32
  }
  func.func @transform_1(%arg0: i32, %arg1: i32, %arg2: i32) -> (i32, i32) {
    %c0_i32 = arith.constant 0 : i32
    return %arg2, %arg1 : i32, i32
  }
  func.func @transform_2(%arg0: i32, %arg1: i32, %arg2: i32) -> (i32, i32) {
    %c0_i32 = arith.constant 0 : i32
    %c0_i32_0 = arith.constant 0 : i32
    return %c0_i32, %arg1 : i32, i32
  }
  func.func @transform_3(%arg0: i32, %arg1: i32, %arg2: i32) -> (i32, i32) {
    %c0_i32 = arith.constant 0 : i32
    %c0_i32_0 = arith.constant 0 : i32
    return %c0_i32, %arg2 : i32, i32
  }
  func.func @transform_4(%arg0: i32, %arg1: i32, %arg2: i32) -> (i32, i32) {
    %c0_i32 = arith.constant 0 : i32
    %c0_i32_0 = arith.constant 0 : i32
    return %c0_i32, %arg2 : i32, i32
  }
  func.func @transform_5(%arg0: i32, %arg1: i32, %arg2: i32) -> (i32, i32) {
    %c0_i32 = arith.constant 0 : i32
    return %arg0, %arg1 : i32, i32
  }
}

module attributes {stable_mosaic.version = 11 : i64} {
  func.func @_mae_loss_kernel(%arg0: i32, %arg1: memref<32x48xf32, #tpu.memory_space<vmem>>, %arg2: memref<32x48xf32, #tpu.memory_space<vmem>>, %arg3: memref<32x1xf32, #tpu.memory_space<vmem>>, %arg4: memref<1x1xf32, #tpu.memory_space<vmem>>, %arg5: memref<1x1xf32, #tpu.memory_space<vmem>>, %arg6: memref<1x1xf32, #tpu.memory_space<vmem>>) attributes {dimension_semantics = [#tpu.dimension_semantics<arbitrary>], iteration_bounds = array<i64: 1>, scalar_prefetch = 0 : i64, scratch_operands = 2 : i64, tpu.core_type = #tpu.core_type<tc>, window_params = [{transform_indices = @transform_0, window_bounds = array<i64: 32, 48>}, {transform_indices = @transform_1, window_bounds = array<i64: 32, 48>}, {transform_indices = @transform_2, window_bounds = array<i64: 32, 1>}, {pipeline_mode = #tpu.pipeline_mode<synchronous>, transform_indices = @transform_3, window_bounds = array<i64: 1, 1>}]} {
    %c0_i32 = arith.constant 0 : i32
    %0 = arith.cmpi eq, %arg0, %c0_i32 : i32
    %1 = arith.extui %0 : i1 to i32
    %c0_i32_0 = arith.constant 0 : i32
    %2 = arith.cmpi ne, %1, %c0_i32_0 : i32
    scf.if %2 {
      %cst_22 = arith.constant 0.000000e+00 : f32
      %42 = vector.broadcast %cst_22 : f32 to vector<1x1xf32>
      %c0_23 = arith.constant 0 : index
      %c0_24 = arith.constant 0 : index
      %43 = vector.load %arg5[%c0_23, %c0_24] : memref<1x1xf32, #tpu.memory_space<vmem>>, vector<1x1xf32>
      tpu.vector_store %arg5[%c0_23, %c0_24], %42 {strides = array<i32>} : memref<1x1xf32, #tpu.memory_space<vmem>>, vector<1x1xf32>,
      %cst_25 = arith.constant 0.000000e+00 : f32
      %44 = vector.broadcast %cst_25 : f32 to vector<1x1xf32>
      %c0_26 = arith.constant 0 : index
      %c0_27 = arith.constant 0 : index
      %45 = vector.load %arg6[%c0_26, %c0_27] : memref<1x1xf32, #tpu.memory_space<vmem>>, vector<1x1xf32>
      tpu.vector_store %arg6[%c0_26, %c0_27], %44 {strides = array<i32>} : memref<1x1xf32, #tpu.memory_space<vmem>>, vector<1x1xf32>,
    } else {
    }
    %3 = tpu.iota {dimensions = array<i32: 0>} : vector<32x1xi32>
    %c32_i32 = arith.constant 32 : i32
    %4 = arith.muli %arg0, %c32_i32 : i32
    %5 = vector.broadcast %4 : i32 to vector<32x1xi32>
    %6 = arith.addi %3, %5 : vector<32x1xi32>
    %c32_i32_1 = arith.constant 32 : i32
    %7 = vector.broadcast %c32_i32_1 : i32 to vector<32x1xi32>
    %8 = arith.cmpi slt, %6, %7 : vector<32x1xi32>
    %c0 = arith.constant 0 : index
    %c0_2 = arith.constant 0 : index
    %9 = vector.load %arg1[%c0, %c0_2] : memref<32x48xf32, #tpu.memory_space<vmem>>, vector<32x48xf32>
    %c0_3 = arith.constant 0 : index
    %c0_4 = arith.constant 0 : index
    %10 = vector.load %arg2[%c0_3, %c0_4] : memref<32x48xf32, #tpu.memory_space<vmem>>, vector<32x48xf32>
    %11 = arith.subf %9, %10 : vector<32x48xf32>
    %12 = arith.mulf %11, %11 : vector<32x48xf32>
    %cst = arith.constant dense<0.000000e+00> : vector<32xf32>
    %13 = vector.multi_reduction <add>, %12, %cst [1] : vector<32x48xf32> to vector<32xf32>
    %14 = vector.shape_cast %13 : vector<32xf32> to vector<32x1xf32>
    %cst_5 = arith.constant 4.800000e+01 : f32
    %15 = vector.broadcast %cst_5 : f32 to vector<32x1xf32>
    %16 = arith.divf %14, %15 : vector<32x1xf32>
    %cst_6 = arith.constant 0.000000e+00 : f32
    %17 = vector.broadcast %cst_6 : f32 to vector<32x1xf32>
    %18 = arith.select %8, %16, %17 : vector<32x1xi1>, vector<32x1xf32>
    %c0_7 = arith.constant 0 : index
    %c0_8 = arith.constant 0 : index
    %19 = vector.load %arg3[%c0_7, %c0_8] : memref<32x1xf32, #tpu.memory_space<vmem>>, vector<32x1xf32>
    %cst_9 = arith.constant 0.000000e+00 : f32
    %20 = vector.broadcast %cst_9 : f32 to vector<32x1xf32>
    %21 = arith.select %8, %19, %20 : vector<32x1xi1>, vector<32x1xf32>
    %c0_10 = arith.constant 0 : index
    %c0_11 = arith.constant 0 : index
    %22 = vector.load %arg5[%c0_10, %c0_11] : memref<1x1xf32, #tpu.memory_space<vmem>>, vector<1x1xf32>
    %23 = arith.mulf %18, %21 : vector<32x1xf32>
    %24 = vector.shape_cast %23 : vector<32x1xf32> to vector<1x32x1xf32>
    %cst_12 = arith.constant dense<0.000000e+00> : vector<1xf32>
    %25 = vector.multi_reduction <add>, %24, %cst_12 [1, 2] : vector<1x32x1xf32> to vector<1xf32>
    %26 = vector.shape_cast %25 : vector<1xf32> to vector<1x1x1xf32>
    %27 = vector.extract %26[0, 0, 0] : f32 from vector<1x1x1xf32>
    %28 = vector.broadcast %27 : f32 to vector<1x1xf32>
    %29 = arith.addf %22, %28 : vector<1x1xf32>
    %c0_13 = arith.constant 0 : index
    %c0_14 = arith.constant 0 : index
    %30 = vector.load %arg5[%c0_13, %c0_14] : memref<1x1xf32, #tpu.memory_space<vmem>>, vector<1x1xf32>
    tpu.vector_store %arg5[%c0_13, %c0_14], %29 {strides = array<i32>} : memref<1x1xf32, #tpu.memory_space<vmem>>, vector<1x1xf32>,
    %c0_15 = arith.constant 0 : index
    %c0_16 = arith.constant 0 : index
    %31 = vector.load %arg6[%c0_15, %c0_16] : memref<1x1xf32, #tpu.memory_space<vmem>>, vector<1x1xf32>
    %32 = vector.shape_cast %21 : vector<32x1xf32> to vector<1x32x1xf32>
    %cst_17 = arith.constant dense<0.000000e+00> : vector<1xf32>
    %33 = vector.multi_reduction <add>, %32, %cst_17 [1, 2] : vector<1x32x1xf32> to vector<1xf32>
    %34 = vector.shape_cast %33 : vector<1xf32> to vector<1x1x1xf32>
    %35 = vector.extract %34[0, 0, 0] : f32 from vector<1x1x1xf32>
    %36 = vector.broadcast %35 : f32 to vector<1x1xf32>
    %37 = arith.addf %31, %36 : vector<1x1xf32>
    %c0_18 = arith.constant 0 : index
    %c0_19 = arith.constant 0 : index
    %38 = vector.load %arg6[%c0_18, %c0_19] : memref<1x1xf32, #tpu.memory_space<vmem>>, vector<1x1xf32>
    tpu.vector_store %arg6[%c0_18, %c0_19], %37 {strides = array<i32>} : memref<1x1xf32, #tpu.memory_space<vmem>>, vector<1x1xf32>,
    %c0_i32_20 = arith.constant 0 : i32
    %39 = arith.cmpi eq, %arg0, %c0_i32_20 : i32
    %40 = arith.extui %39 : i1 to i32
    %c0_i32_21 = arith.constant 0 : i32
    %41 = arith.cmpi ne, %40, %c0_i32_21 : i32
    scf.if %41 {
      %c0_22 = arith.constant 0 : index
      %c0_23 = arith.constant 0 : index
      %42 = vector.load %arg5[%c0_22, %c0_23] : memref<1x1xf32, #tpu.memory_space<vmem>>, vector<1x1xf32>
      %c0_24 = arith.constant 0 : index
      %c0_25 = arith.constant 0 : index
      %43 = vector.load %arg6[%c0_24, %c0_25] : memref<1x1xf32, #tpu.memory_space<vmem>>, vector<1x1xf32>
      %44 = arith.divf %42, %43 : vector<1x1xf32>
      %c0_26 = arith.constant 0 : index
      %c0_27 = arith.constant 0 : index
      %45 = vector.load %arg4[%c0_26, %c0_27] : memref<1x1xf32, #tpu.memory_space<vmem>>, vector<1x1xf32>
      tpu.vector_store %arg4[%c0_26, %c0_27], %44 {strides = array<i32>} : memref<1x1xf32, #tpu.memory_space<vmem>>, vector<1x1xf32>,
    } else {
    }
    return
  }
  func.func @transform_0(%arg0: i32) -> (i32, i32) {
    %c0_i32 = arith.constant 0 : i32
    %c0_i32_0 = arith.constant 0 : i32
    return %arg0, %c0_i32 : i32, i32
  }
  func.func @transform_1(%arg0: i32) -> (i32, i32) {
    %c0_i32 = arith.constant 0 : i32
    %c0_i32_0 = arith.constant 0 : i32
    return %arg0, %c0_i32 : i32, i32
  }
  func.func @transform_2(%arg0: i32) -> (i32, i32) {
    %c0_i32 = arith.constant 0 : i32
    %c0_i32_0 = arith.constant 0 : i32
    return %arg0, %c0_i32 : i32, i32
  }
  func.func @transform_3(%arg0: i32) -> (i32, i32) {
    %c0_i32 = arith.constant 0 : i32
    %c0_i32_0 = arith.constant 0 : i32
    %c0_i32_1 = arith.constant 0 : i32
    return %c0_i32, %c0_i32_0 : i32, i32
  }
}

</mosaic_0001>

<bundles_post_ra>
// kernel: mae_forward.19
= control target key start
LH: loop header
LB: loop body
LE: loop exit
PB: predicated region body
PF: predicated region fallthrough
CT: control target
= control target key end

     0   :  { %vm52_vm0 = vcmask 392192   ;;  %vm108_vm1 = vcmask 261120   ;;  %s197_s1 = inlined_call_operand.vmem [shape: bf16[48,32], index: 1, kind: input, shape index: {}]   ;;  %s198_s0 = inlined_call_operand.vmem [shape: f32[32,48], index: 0, kind: input, shape index: {}]   ;;  %s199_s2 = inlined_call_operand.vmem [shape: f32[1,32], index: 2, kind: input, shape index: {}]   ;;  %s200_s3 = inlined_call_operand.vmem [shape: f32[32,32], index: 3, kind: output, shape index: {}]  }
   0x1   :  { %v138_v0 = vld [vmem:[%s197_s1 + $0x10] sm:$0xff]   ;;  %v139_v1 = vld [vmem:[%s197_s1 + $0x8] sm:$0xff]   ;;  %v15_v2 = vld [vmem:[%s198_s0] sm:$0xff] }
   0x2   :  { %128 = vmatprep.subr.bf16.mxu0 %v138_v0  ;;  %v16_v3 = vld [vmem:[%s198_s0 + $0x8] sm:$0xff]  ;;  %v140_v4 = vld [vmem:[%s197_s1] sm:$0xff]   ;;  %v17_v6 = vld [vmem:[%s198_s0 + $0x10] sm:$0xff] }
   0x3   :  { %129 = vmatpush3.bf16.msra.mxu0 %v138_v0  ;;  %v19_v5 = vpack.c.bf16 %v16_v3, %v15_v2  ;;  %v18_v7 = vld [vmem:[%s198_s0 + $0x18] sm:$0xff]  ;;  %v117_v9 = vld [vmem:[%s199_s2] ss:$0 sm:$0xff] }
   0x4   :  { %130 = vmatprep.subr.bf16.mxu0 %v139_v1  ;;  %v20_v8 = vpack.c.bf16 %v18_v7, %v17_v6 }
   0x5   :  { %134 = vmatprep.mubr.msk.bf16.mxu0 %vm52_vm0, %v19_v5 }
   0x7   :  { %131 = vmatpush3.bf16.msra.mxu0 %v139_v1 }
   0x8   :  { %132 = vmatprep.subr.bf16.mxu0 %v140_v4 }
   0xb   :  { %133 = vmatpush3.bf16.msra.mxu0 %v140_v4 }
   0xe   :  { %135 = vmatmul.mubr.msk.bf16.vlgmr.msra.gmra.mxu0 %vm52_vm0, %v20_v8 }
  0xce   :  { %v136_v10 = vpop.f32.mrf.mxu0 }
  0xcf   :  { %v102_v11 = vadd.f32 %v136_v10, %v117_v9 }
  0xd0   :  { %v93_v12 = vpop.f32.mrf.mxu0 }
  0xd1   :  { %111 = vst.msk [vmem:[%s200_s3 + $0x10] sm:$0xff] %vm108_vm1, %v102_v11  ;;  %v94_v13 = vadd.f32 %v117_v9, %v93_v12 }
  0xd2   :  { %v137_v14 = vpop.f32.mrf.mxu0 }
  0xd3   :  { %109 = vst.msk [vmem:[%s200_s3] sm:$0xff] %vm108_vm1, %v94_v13  ;;  %v105_v15 = vadd.f32 %v137_v14, %v117_v9 }
  0xd4   :  { %v96_v16 = vpop.f32.mrf.mxu0 }
  0xd5   :  { %112 = vst.msk [vmem:[%s200_s3 + $0x18] sm:$0xff] %vm108_vm1, %v105_v15  ;;  %v97_v17 = vadd.f32 %v117_v9, %v96_v16 }
  0xd7   :  { %110 = vst.msk [vmem:[%s200_s3 + $0x8] sm:$0xff] %vm108_vm1, %v97_v17 }

// kernel: mae_forward.20
= control target key start
LH: loop header
LB: loop body
LE: loop exit
PB: predicated region body
PF: predicated region fallthrough
CT: control target
= control target key end

     0   :  { %vm23_vm0 = vcmask 261120   ;;  %vm27_vm1 = vcmask 254976   ;;  %v183_v14 = vmov 0.0   ;;  %vm184_vm2 = vmmov 0   ;;  %s245_s0 = inlined_call_operand.vmem [shape: f32[10,32], index: 0, kind: input, shape index: {}]   ;;  %s246_s1 = inlined_call_operand.vmem [shape: bf16[32,96], index: 1, kind: input, shape index: {}]   ;;  %s247_s3 = inlined_call_operand.vmem [shape: f32[1,32], index: 3, kind: input, shape index: {}]   ;;  %s248_s4 = inlined_call_operand.vmem [shape: f32[1,32], index: 4, kind: input, shape index: {}]   ;;  %s249_s2 = inlined_call_operand.vmem [shape: f32[1,96], index: 2, kind: input, shape index: {}]   ;;  %s250_s5 = inlined_call_operand.vmem [shape: bf16[10,96], index: 5, kind: output, shape index: {}]  }
   0x1   :  { %v21_v0 = vld [vmem:[%s245_s0] sm:$0xff]  ;;  %v22_v1 = vld [vmem:[%s245_s0 + $0x8] sm:$0x3]  ;;  %167 = vmatprep.subr.bf16.mxu0 %v183_v14  ;;  %171 = vmatprep.mubr.msk.bf16.mxu0 %vm184_vm2, %v183_v14  ;;  %vm146_vm3 = vcmask 781312   ;;  %vm148_vm4 = vcmask 778240  }
   0x2   :  { %v24_v2 = vsel %vm23_vm0, %v21_v0, 0.0  ;;  %v28_v3 = vsel %vm27_vm1, %v22_v1, 0.0  ;;  %v177_v15 = vld [vmem:[%s246_s1 + $0x8] sm:$0xff]   ;;  %v178_v16 = vld [vmem:[%s246_s1] sm:$0xff]  }
   0x3   :  { %25 = vadd.xlane.f32.xlu0 %v24_v2  ;;  %168 = vmatpush3.bf16.msra.mxu0 %v177_v15  ;;  %v154_v25 = vld [vmem:[%s247_s3] ss:$0 sm:$0xff] }
   0x4   :  { %169 = vmatprep.subr.bf16.mxu0 %v183_v14  ;;  %v155_v29 = vld [vmem:[%s248_s4] ss:$0 sm:$0xff] }
   0x5   :  { %v156_v34 = vld [vmem:[%s249_s2] ss:$0 sm:$0xff] }
   0x7   :  { %29 = vadd.xlane.f32.xlu0 %v28_v3  ;;  %170 = vmatpush3.bf16.msra.mxu0 %v178_v16 }
  0x8c   :  { %v26_v4 = vpop.xlane.xlu0 %25 }
  0x8d   :  { %v32_v5 = vmul.f32 0.03125, %v26_v4 }
  0x8f   :  { %v34_v6 = vsub.f32 %v21_v0, %v32_v5 }
  0x90   :  { %v30_v7 = vpop.xlane.xlu0 %29 }
  0x91   :  { %v33_v8 = vmul.f32 0.03125, %v30_v7  ;;  %v36_v9 = vmul.f32 %v34_v6, %v34_v6 }
  0x93   :  { %v35_v10 = vsub.f32 %v22_v1, %v33_v8  ;;  %v38_v11 = vsel %vm23_vm0, %v36_v9, 0.0 }
  0x94   :  { %39 = vadd.xlane.f32.xlu1 %v38_v11 }
  0x95   :  { %v37_v12 = vmul.f32 %v35_v10, %v35_v10 }
  0x97   :  { %v41_v13 = vsel %vm27_vm1, %v37_v12, 0.0 }
  0x98   :  { %42 = vadd.xlane.f32.xlu1 %v41_v13 }
 0x11d   :  { %v40_v17 = vpop.xlane.xlu1 %39 }
 0x11e   :  { %v44_v18 = vmul.f32 0.03125, %v40_v17 }
 0x120   :  { %v46_v19 = vadd.f32 1e-06, %v44_v18 }
 0x121   :  { %v43_v20 = vpop.xlane.xlu1 %42 }
 0x122   :  { %179 = vrsqrt.f32 %v46_v19  ;;  %v45_v21 = vmul.f32 0.03125, %v43_v20 }
 0x124   :  { %v47_v22 = vadd.f32 1e-06, %v45_v21 }
 0x126   :  { %181 = vrsqrt.f32 %v47_v22 }
 0x12f   :  { %v180_v23 = vpop.eup %179 }
 0x130   :  { %v50_v24 = vmul.f32 %v180_v23, %v34_v6 }
 0x132   :  { %v59_v28 = vmul.f32 %v154_v25, %v50_v24 }
 0x133   :  { %v182_v26 = vpop.eup %181 }
 0x134   :  { %v51_v27 = vmul.f32 %v182_v26, %v35_v10  ;;  %v68_v31 = vadd.f32 %v155_v29, %v59_v28 }
 0x136   :  { %v60_v30 = vmul.f32 %v154_v25, %v51_v27 }
 0x138   :  { %v69_v32 = vadd.f32 %v155_v29, %v60_v30 }
 0x13a   :  { %v70_v33 = vpack.c.bf16 %v69_v32, %v68_v31 }
 0x13c   :  { %172 = vmatmul.mubr.msk.bf16.vlgmr.msra.gmra.mxu0 %vm23_vm0, %v70_v33 }
 0x1fc   :  { %v131_v35 = vpop.f32.mrf.mxu0 }
 0x1fd   :  { %v132_v36 = vadd.f32 %v156_v34, %v131_v35 }
 0x1fe   :  { %v173_v37 = vpop.f32.mrf.mxu0 }
 0x1ff   :  { %v162_v38 = vpack.c.bf16 %v132_v36, %v132_v36 }
 0x200   :  { %v134_v39 = vpop.f32.mrf.mxu0 }
 0x201   :  { %147 = vst.msk [vmem:[%s250_s5] sm:$0xf] %vm146_vm3, %v162_v38  ;;  %v135_v40 = vadd.f32 %v156_v34, %v134_v39 }
 0x202   :  { %v174_v41 = vpop.f32.mrf.mxu0 }
 0x203   :  { %v163_v42 = vpack.c.bf16 %v135_v40, %v135_v40 }
 0x205   :  { %149 = vst.msk [vmem:[%s250_s5 + $0x4] sm:$0x1] %vm148_vm4, %v163_v42 }

// kernel: mae_forward.22
= control target key start
LH: loop header
LB: loop body
LE: loop exit
PB: predicated region body
PF: predicated region fallthrough
CT: control target
= control target key end

     0   :  { %v125_v0 = vmov 0.0   ;;  %vm126_vm0 = vmmov 0   ;;  %vm48_vm1 = vcmask 261120   ;;  %vm98_vm2 = vcmask 254976   ;;  %s176_s1 = inlined_call_operand.vmem [shape: bf16[32,32], index: 1, kind: input, shape index: {}]   ;;  %s177_s0 = inlined_call_operand.vmem [shape: bf16[10,32], index: 0, kind: input, shape index: {}]   ;;  %s178_s2 = inlined_call_operand.vmem [shape: f32[1,32], index: 2, kind: input, shape index: {}]   ;;  %s179_s3 = inlined_call_operand.vmem [shape: f32[10,32], index: 3, kind: input, shape index: {}]   ;;  %s180_s4 = inlined_call_operand.vmem [shape: f32[10,32], index: 4, kind: output, shape index: {}]  }
   0x1   :  { %112 = vmatprep.subr.bf16.mxu0 %v125_v0  ;;  %v122_v1 = vld [vmem:[%s176_s1 + $0x8] sm:$0xff]   ;;  %116 = vmatprep.mubr.msk.bf16.mxu0 %vm126_vm0, %v125_v0  ;;  %v123_v2 = vld [vmem:[%s176_s1] sm:$0xff]  }
   0x2   :  { %113 = vmatpush3.bf16.msra.mxu0 %v122_v1  ;;  %v124_v3 = vld [vmem:[%s177_s0] sm:$0x1f]   ;;  %v94_v11 = vld [vmem:[%s179_s3 + $0x8] sm:$0x3] }
   0x3   :  { %114 = vmatprep.subr.bf16.mxu0 %v125_v0  ;;  %v104_v4 = vld [vmem:[%s178_s2] ss:$0 sm:$0xff] }
   0x4   :  { %v93_v6 = vld [vmem:[%s179_s3] sm:$0xff] }
   0x6   :  { %115 = vmatpush3.bf16.msra.mxu0 %v123_v2 }
   0x9   :  { %117 = vmatmul.mubr.msk.bf16.vlgmr.msra.gmra.mxu0 %vm48_vm1, %v124_v3 }
  0xc9   :  { %v86_v5 = vpop.f32.mrf.mxu0 }
  0xca   :  { %v87_v7 = vadd.f32 %v104_v4, %v86_v5 }
  0xcb   :  { %v118_v8 = vpop.f32.mrf.mxu0 }
  0xcc   :  { %v95_v9 = vadd.f32 %v93_v6, %v87_v7 }
  0xcd   :  { %v89_v10 = vpop.f32.mrf.mxu0 }
  0xce   :  { %97 = vst.msk [vmem:[%s180_s4] sm:$0xff] %vm48_vm1, %v95_v9  ;;  %v90_v12 = vadd.f32 %v104_v4, %v89_v10 }
  0xcf   :  { %v119_v13 = vpop.f32.mrf.mxu0 }
  0xd0   :  { %v96_v14 = vadd.f32 %v94_v11, %v90_v12 }
  0xd2   :  { %99 = vst.msk [vmem:[%s180_s4 + $0x8] sm:$0x3] %vm98_vm2, %v96_v14 }

// kernel: mae_forward.21
= control target key start
LH: loop header
LB: loop body
LE: loop exit
PB: predicated region body
PF: predicated region fallthrough
CT: control target
= control target key end

     0   :  { %s827_s6 = smov 0   ;;  %s925_s0 = inlined_call_operand.vmem [shape: bf16[2,5,96], index: 0, kind: input, shape index: {}]   ;;  %s926_s1 = inlined_call_operand.vmem [shape: bf16[2,5,32], index: 1, kind: output, shape index: {}]  }
   0x1 LB: > { %s662_s7 = sadd.s32 4294967295, %s798_s6   ;;  %p666_p0 = scmp.ge.s32.totalorder %s798_s6, 1  ;;  %s798_s6 = sphi %s827_s6, %s11_s6  }
   0x2   : > { %p86_p1 = scmp.lt.s32.totalorder %s798_s6, 3 }
   0x4   : > { %p87_p2 = pnand %p666_p0, %p86_p1 }
   0x5   : > { %p104_p3 = scmp.lt.s32.totalorder (!%p87_p2), %s662_s7, 1  ;;  %s802_s12 = smov (!%p87_p2), 96  }
   0x6   : > { %90 = sbr.rel (%p87_p2) target bundleno = 1536 (0x600), region = 24  ;;  %s803_s13 = smov (!%p87_p2), 64  }
   0x7   : > { %s804_s14 = smov (!%p87_p2), 88   ;;  %s805_s15 = smov (!%p87_p2), 72  }
   0x8   : > { %s807_s16 = smov (!%p87_p2), 120   ;;  %s808_s17 = smov (!%p87_p2), 80  }
   0x9   : > { %s809_s18 = smov (!%p87_p2), 112   ;;  %s810_s19 = smov (!%p87_p2), 104  }
   0xa   : > { %s811_s23 = smov (!%p87_p2), 56   ;;  %s812_s24 = smov (!%p87_p2), 48  }
   0xb   : > { %v800_v0 = vmov 0.0   ;;  %vm801_vm0 = vmmov 0   ;;  %s928_s7 = smov (!%p104_p3, %s662_s7), 1  ;;  %vm122_vm1 = vcmask 64512   ;;  %vm169_vm2 = vcmask 36864   ;;  %s813_s25 = smov 40  }
   0xc   : > { %702 = vmatprep.subr.bf16.mxu0 %v800_v0  ;;  %704 = vmatprep.mubr.msk.bf16.mxu0 %vm801_vm0, %v800_v0  ;;  %s667_s8 = sshll.u32 %s928_s7, 2  ;;  %vm188_vm3 = vcmask 1041408   ;;  %vm189_vm4 = vcmask 1042432   ;;  %v806_v14 = vmov 65535   ;;  %vm184_vm5 = vcmask 39936   ;;  %s814_s26 = smov 8  }
   0xd   : > { %708 = vmatprep.subr.bf16.mxu1 %v800_v0  ;;  %710 = vmatprep.mubr.msk.bf16.mxu1 %vm801_vm0, %v800_v0  ;;  %s107_s11 = scalar_lea.vmem %s925_s0, %s667_s8  ;;  %v190_v15 = vsel %vm188_vm3, 4294967295, %v806_v14  ;;  %s887_s22 = scalar_lea.vmem %s926_s1, %s667_s8  ;;  %vm236_vm6 = vcmask 59392   ;;  %vm237_vm7 = vsmask.f32 2304  ;;  %vm360_vm9 = vcmask 124992  }
   0xe   : > { %v113_v1 = vld [vmem:[%s107_s11] sm:$0x7]  ;;  %v861_v16 = vsel %vm189_vm4, %v190_v15, 0  ;;  %vm238_vm8 = vmand %vm236_vm6, %vm237_vm7  ;;  %s815_s27 = smov 16   ;;  %s816_s28 = smov 24   ;;  %vm482_vm11 = vcmask 190592  }
   0xf   : > { %v849_v2 = vcombine.low %v113_v1, %v113_v1  ;;  %v114_v3 = vunpack.c.l.bf16 %v113_v1  ;;  %v239_v37 = vld [vmem:[%s887_s22] sm:$0x7]  ;;  %vm361_vm10 = vmand %vm360_vm9, %vm237_vm7  ;;  %vm604_vm13 = vcmask 256192  }
  0x10   : > { %vm483_vm12 = vmand %vm482_vm11, %vm237_vm7 }
  0x11   : > { %120 = vrot.lane.b32.xlu0 %v849_v2, %s802_s12  ;;  %v115_v6 = vmul.f32 0.35355338, %v114_v3  ;;  %182 = vrot.lane.b32.xlu1 %v849_v2, %s803_s13  ;;  %vm605_vm14 = vmand %vm604_vm13, %vm237_vm7 }
  0x13   : > { %v116_v7 = vpack.c.bf16 %v115_v6, %v115_v6 }
  0x15   : > { %245 = vrot.lane.b32.xlu1 %v849_v2, %s804_s14 }
  0x83   : > { %v121_v4 = vpop.permute.xlu0 %120  ;;  %v183_v13 = vpop.permute.xlu1 %182 }
  0x84   : > { %v127_v5 = vsel %vm122_vm1, %v121_v4, 0  ;;  %v193_v17 = vand.u32 %v861_v16, %v183_v13 }
  0x85   : > { %703 = vmatpush3.bf16.xpose.msra.mxu0 %v127_v5 }
  0x86   : > { %720 = vmatprep.subr.bf16.mxu0 %v800_v0  ;;  %709 = vmatpush3.bf16.msra.mxu1 %v193_v17 }
  0x87   : > { %714 = vmatprep.subr.bf16.mxu1 %v800_v0  ;;  %v246_v23 = vpop.permute.xlu1 %245 }
  0x88   : > { %v251_v29 = vsel %vm122_vm1, %v246_v23, 0 }
  0x8c   : > { %705 = vmatmul.mubr.msk.bf16.vlgmr.msra.gmra.mxu0 %vm122_vm1, %v116_v7 }
  0x8d   : > { %722 = vmatprep.mubr.msk.bf16.mxu0 %vm801_vm0, %v800_v0 }
 0x14c   : > { %v163_v8 = vpop.f32.mrf.mxu0 }
 0x14d   : > { %v170_v9 = vsel %vm169_vm2, %v163_v8, -inf }
 0x14e   : > { %171 = vmax.xlane.f32.xlu0 %v170_v9  ;;  %v706_v10 = vpop.f32.mrf.mxu0 }
 0x150   : > { %v166_v11 = vpop.f32.mrf.mxu0 }
 0x152   : > { %v707_v12 = vpop.f32.mrf.mxu0 }
 0x164   : > { %489 = vrot.lane.b32.xlu0 %v849_v2, %s805_s15 }
 0x1d7   : > { %v172_v18 = vpop.xlane.xlu0 %171 }
 0x1d8   : > { %v173_v19 = vsub.f32 %v163_v8, %v172_v18 }
 0x1da   : > { %v174_v20 = vmul.f32 1.442695, %v173_v19 }
 0x1db   : > { %v490_v32 = vpop.permute.xlu0 %489 }
 0x1dc   : > { %776 = vpow2.f32 %v174_v20  ;;  %v495_v34 = vsel %vm122_vm1, %v490_v32, 0 }
 0x1e9   : > { %v777_v21 = vpop.eup %776 }
 0x1ea   : > { %v176_v22 = vsel %vm169_vm2, %v777_v21, 0.0 }
 0x1eb   : > { %177 = vadd.xlane.f32.xlu1 %v176_v22 }
 0x1fc   : > { %243 = vrot.lane.b32.xlu1 %v116_v7, %s807_s16 }
 0x200   : > { %367 = vrot.lane.b32.xlu1 %v849_v2, %s808_s17 }
 0x204   : > { %365 = vrot.lane.b32.xlu1 %v116_v7, %s809_s18 }
 0x208   : > { %487 = vrot.lane.b32.xlu1 %v116_v7, %s810_s19 }
 0x274   : > { %v178_v24 = vpop.xlane.xlu1 %177 }
 0x275   : > { %778 = vrcp.f32 %v178_v24 }
 0x278   : > { %v244_v27 = vpop.permute.xlu1 %243 }
 0x27c   : > { %v368_v30 = vpop.permute.xlu1 %367 }
 0x27d   : > { %v373_v31 = vsel %vm122_vm1, %v368_v30, 0 }
 0x280   : > { %v366_v33 = vpop.permute.xlu1 %365 }
 0x282   : > { %v779_v25 = vpop.eup %778 }
 0x283   : > { %v180_v26 = vmul.f32 %v779_v25, %v777_v21 }
 0x284   : > { %v488_v35 = vpop.permute.xlu1 %487 }
 0x285   : > { %v181_v28 = vpack.c.bf16 %v180_v26, %v180_v26 }
 0x287   : > { %711 = vmatmul.mubr.msk.bf16.vlgmr.msra.gmra.mxu1 %vm184_vm5, %v181_v28 }
 0x288   : > { %715 = vmatpush3.bf16.xpose.msra.mxu1 %v251_v29  ;;  %716 = vmatprep.mubr.msk.bf16.mxu1 %vm801_vm0, %v800_v0 }
 0x289   : > { %726 = vmatprep.subr.bf16.mxu1 %v800_v0 }
 0x28f   : > { %717 = vmatmul.mubr.msk.bf16.vlgmr.msra.gmra.mxu1 %vm122_vm1, %v244_v27 }
 0x290   : > { %727 = vmatpush3.bf16.xpose.msra.mxu1 %v373_v31  ;;  %728 = vmatprep.mubr.msk.bf16.mxu1 %vm801_vm0, %v800_v0 }
 0x291   : > { %738 = vmatprep.subr.bf16.mxu1 %v800_v0 }
 0x297   : > { %729 = vmatmul.mubr.msk.bf16.vlgmr.msra.gmra.mxu1 %vm122_vm1, %v366_v33 }
 0x298   : > { %739 = vmatpush3.bf16.xpose.msra.mxu1 %v495_v34  ;;  %740 = vmatprep.mubr.msk.bf16.mxu1 %vm801_vm0, %v800_v0 }
 0x29f   : > { %741 = vmatmul.mubr.msk.bf16.vlgmr.msra.gmra.mxu1 %vm122_vm1, %v488_v35 }
 0x347   : > { %v229_v36 = vpop.f32.mrf.mxu1 }
 0x348   : > { %v235_v38 = vpack.c.bf16 %v229_v36, %v229_v36 }
 0x349   : > { %v712_v39 = vpop.f32.mrf.mxu1 }
 0x34a   : > { %v240_v40 = vsel %vm238_vm8, %v235_v38, %v239_v37 }
 0x34b   : > { %241 = vst [vmem:[%s887_s22] sm:$0x7] %v240_v40  ;;  %v232_v41 = vpop.f32.mrf.mxu1 }
 0x34d   : > { %v713_v42 = vpop.f32.mrf.mxu1 }
 0x34f   : > { %v287_v43 = vpop.f32.mrf.mxu1 }
 0x350   : > { %v293_v44 = vsel %vm169_vm2, %v287_v43, -inf }
 0x351   : > { %294 = vmax.xlane.f32.xlu1 %v293_v44  ;;  %v718_v45 = vpop.f32.mrf.mxu1 }
 0x352   : > { %v362_v42 = vld [vmem:[%s887_s22] sm:$0x7] }
 0x353   : > { %v290_v46 = vpop.f32.mrf.mxu1 }
 0x355   : > { %v719_v47 = vpop.f32.mrf.mxu1 }
 0x357   : > { %v409_v48 = vpop.f32.mrf.mxu1 }
 0x358   : > { %v415_v49 = vsel %vm169_vm2, %v409_v48, -inf }
 0x359   : > { %416 = vmax.xlane.f32.xlu0 %v415_v49  ;;  %v730_v50 = vpop.f32.mrf.mxu1 }
 0x35b   : > { %v412_v51 = vpop.f32.mrf.mxu1 }
 0x35d   : > { %v731_v52 = vpop.f32.mrf.mxu1 }
 0x35f   : > { %v531_v53 = vpop.f32.mrf.mxu1 }
 0x360   : > { %v537_v54 = vsel %vm169_vm2, %v531_v53, -inf }
 0x361   : > { %538 = vmax.xlane.f32.xlu1 %v537_v54  ;;  %v742_v55 = vpop.f32.mrf.mxu1 }
 0x363   : > { %v534_v56 = vpop.f32.mrf.mxu1 }
 0x365   : > { %v743_v57 = vpop.f32.mrf.mxu1 }
 0x3da   : > { %v295_v58 = vpop.xlane.xlu1 %294 }
 0x3db   : > { %v296_v59 = vsub.f32 %v287_v43, %v295_v58 }
 0x3dd   : > { %v297_v60 = vmul.f32 1.442695, %v296_v59 }
 0x3df   : > { %780 = vpow2.f32 %v297_v60 }
 0x3e2   : > { %v417_v6 = vpop.xlane.xlu0 %416 }
 0x3e3   : > { %v418_v7 = vsub.f32 %v409_v48, %v417_v6 }
 0x3e5   : > { %v419_v8 = vmul.f32 1.442695, %v418_v7 }
 0x3ea   : > { %v539_v61 = vpop.xlane.xlu1 %538 }
 0x3eb   : > { %v540_v62 = vsub.f32 %v531_v53, %v539_v61 }
 0x3ec   : > { %v781_v63 = vpop.eup %780 }
 0x3ed   : > { %v541_v1 = vmul.f32 1.442695, %v540_v62  ;;  %v299_v3 = vsel %vm169_vm2, %v781_v63, 0.0 }
 0x3ee   : > { %300 = vadd.xlane.f32.xlu1 %v299_v3 }
 0x3ef   : > { %782 = vpow2.f32 %v541_v1 }
 0x3f0   : > { %784 = vpow2.f32 %v419_v8 }
 0x3fc   : > { %v783_v4 = vpop.eup %782 }
 0x3fd   : > { %v543_v5 = vsel %vm169_vm2, %v783_v4, 0.0  ;;  %v785_v9 = vpop.eup %784 }
 0x3fe   : > { %544 = vadd.xlane.f32.xlu0 %v543_v5  ;;  %v421_v10 = vsel %vm169_vm2, %v785_v9, 0.0 }
 0x3ff   : > { %305 = vrot.lane.b32.xlu1 %v849_v2, %s811_s23 }
 0x414   : > { %427 = vrot.lane.b32.xlu0 %v849_v2, %s812_s24 }
 0x423   : > { %422 = vadd.xlane.f32.xlu1 %v421_v10 }
 0x434   : > { %549 = vrot.lane.b32.xlu1 %v849_v2, %s813_s25 }
 0x477   : > { %v301_v11 = vpop.xlane.xlu1 %300 }
 0x478   : > { %786 = vrcp.f32 %v301_v11 }
 0x47b   : > { %v306_v12 = vpop.permute.xlu1 %305 }
 0x47c   : > { %v311_v13 = vand.u32 %v306_v12, %v861_v16 }
 0x47e   : > { %721 = vmatpush3.bf16.msra.mxu0 %v311_v13 }
 0x47f   : > { %732 = vmatprep.subr.bf16.mxu0 %v800_v0 }
 0x485   : > { %v787_v14 = vpop.eup %786 }
 0x486   : > { %v303_v15 = vmul.f32 %v787_v14, %v781_v63 }
 0x487   : > { %v545_v17 = vpop.xlane.xlu0 %544 }
 0x488   : > { %v304_v18 = vpack.c.bf16 %v303_v15, %v303_v15 }
 0x48a   : > { %723 = vmatmul.mubr.msk.bf16.vlgmr.msra.gmra.mxu0 %vm184_vm5, %v304_v18 }
 0x48b   : > { %v428_v19 = vpop.permute.xlu0 %427  ;;  %734 = vmatprep.mubr.msk.bf16.mxu0 %vm801_vm0, %v800_v0 }
 0x48c   : > { %v433_v2 = vand.u32 %v428_v19, %v861_v16 }
 0x48e   : > { %733 = vmatpush3.bf16.msra.mxu0 %v433_v2 }
 0x48f   : > { %744 = vmatprep.subr.bf16.mxu0 %v800_v0 }
 0x4ac   : > { %v423_v20 = vpop.xlane.xlu1 %422 }
 0x4ad   : > { %788 = vrcp.f32 %v423_v20 }
 0x4ae   : > { %790 = vrcp.f32 %v545_v17 }
 0x4b0   : > { %v550_v21 = vpop.permute.xlu1 %549 }
 0x4b1   : > { %v555_v24 = vand.u32 %v550_v21, %v861_v16 }
 0x4ba   : > { %v789_v22 = vpop.eup %788 }
 0x4bb   : > { %v425_v23 = vmul.f32 %v789_v22, %v785_v9  ;;  %v791_v26 = vpop.eup %790 }
 0x4bc   : > { %v547_v27 = vmul.f32 %v791_v26, %v783_v4 }
 0x4bd   : > { %v426_v25 = vpack.c.bf16 %v425_v23, %v425_v23 }
 0x4be   : > { %v548_v28 = vpack.c.bf16 %v547_v27, %v547_v27 }
 0x4bf   : > { %735 = vmatmul.mubr.msk.bf16.vlgmr.msra.gmra.mxu0 %vm184_vm5, %v426_v25 }
 0x4c0   : > { %745 = vmatpush3.bf16.msra.mxu0 %v555_v24  ;;  %746 = vmatprep.mubr.msk.bf16.mxu0 %vm801_vm0, %v800_v0 }
 0x4c7   : > { %747 = vmatmul.mubr.msk.bf16.vlgmr.msra.gmra.mxu0 %vm184_vm5, %v548_v28 }
 0x54a   : > { %v347_v29 = vpop.f32.mrf.mxu0 }
 0x54b   : > { %v683_v30 = vpack.c.bf16 %v347_v29, %v347_v29 }
 0x54c   : > { %v724_v31 = vpop.f32.mrf.mxu0 }
 0x54d   : > { %357 = vrot.lane.b32.xlu1 %v683_v30, %s814_s26 }
 0x54e   : > { %v350_v32 = vpop.f32.mrf.mxu0 }
 0x550   : > { %v725_v33 = vpop.f32.mrf.mxu0 }
 0x57f   : > { %v469_v16 = vpop.f32.mrf.mxu0 }
 0x580   : > { %v684_v34 = vpack.c.bf16 %v469_v16, %v469_v16 }
 0x581   : > { %v736_v35 = vpop.f32.mrf.mxu0 }
 0x582   : > { %479 = vrot.lane.b32.xlu0 %v684_v34, %s815_s27 }
 0x583   : > { %v472_v36 = vpop.f32.mrf.mxu0 }
 0x585   : > { %v737_v0 = vpop.f32.mrf.mxu0 }
 0x587   : > { %v591_v37 = vpop.f32.mrf.mxu0 }
 0x588   : > { %v685_v38 = vpack.c.bf16 %v591_v37, %v591_v37 }
 0x589   : > { %v748_v39 = vpop.f32.mrf.mxu0 }
 0x58a   : > { %601 = vrot.lane.b32.xlu1 %v685_v38, %s816_s28 }
 0x58b   : > { %v594_v40 = vpop.f32.mrf.mxu0 }
 0x58d   : > { %v749_v41 = vpop.f32.mrf.mxu0 }
 0x5bf   : > { %v358_v43 = vpop.permute.xlu1 %357 }
 0x5c0   : > { %v363_v44 = vsel %vm361_vm10, %v358_v43, %v362_v42 }
 0x5c1   : > { %364 = vst [vmem:[%s887_s22] sm:$0x7] %v363_v44 }
 0x5c8   : > { %v484_v45 = vld [vmem:[%s887_s22] sm:$0x7] }
 0x5f4   : > { %v480_v46 = vpop.permute.xlu0 %479 }
 0x5f5   : > { %v485_v47 = vsel %vm483_vm12, %v480_v46, %v484_v45 }
 0x5f6   : > { %486 = vst [vmem:[%s887_s22] sm:$0x7] %v485_v47 }
 0x5fc   : > { %v602_v48 = vpop.permute.xlu1 %601 }
 0x5fd   : > { %v606_v49 = vld [vmem:[%s887_s22] sm:$0x7] }
 0x5fe   : > { %v607_v50 = vsel %vm605_vm14, %v602_v48, %v606_v49 }
 0x5ff   : > { %608 = vst [vmem:[%s887_s22] sm:$0x7] %v607_v50 }
 0x600 PF: > { %s11_s6 = sadd.s32 1, %s798_s6  }
 0x601   : > { %p8_p4 = scmp.ge.s32.totalorder %s11_s6, 4  }
 0x603   :  { %10 = sbr.rel (!%p8_p4) target bundleno = 1 (0x1), region = 54 }

// kernel: mae_forward.24
= control target key start
LH: loop header
LB: loop body
LE: loop exit
PB: predicated region body
PF: predicated region fallthrough
CT: control target
= control target key end

     0   :  { %v200_v0 = vmov 0.0   ;;  %vm201_vm0 = vmmov 0   ;;  %vm142_vm1 = vcmask 261120   ;;  %vm144_vm2 = vcmask 254976   ;;  %s269_s1 = inlined_call_operand.vmem [shape: bf16[128,32], index: 1, kind: input, shape index: {}]   ;;  %s270_s0 = inlined_call_operand.vmem [shape: bf16[10,128], index: 0, kind: input, shape index: {}]   ;;  %s271_s2 = inlined_call_operand.vmem [shape: f32[1,32], index: 2, kind: input, shape index: {}]   ;;  %s272_s3 = inlined_call_operand.vmem [shape: f32[10,32], index: 3, kind: input, shape index: {}]   ;;  %s273_s4 = inlined_call_operand.vmem [shape: f32[10,32], index: 4, kind: output, shape index: {}]  }
   0x1   :  { %169 = vmatprep.subr.bf16.mxu0 %v200_v0  ;;  %v191_v1 = vld [vmem:[%s269_s1 + $0x38] sm:$0xff]   ;;  %185 = vmatprep.mubr.msk.bf16.mxu0 %vm201_vm0, %v200_v0  ;;  %v192_v2 = vld [vmem:[%s269_s1 + $0x30] sm:$0xff]   ;;  %v193_v3 = vld [vmem:[%s269_s1 + $0x28] sm:$0xff]  }
   0x2   :  { %170 = vmatpush3.bf16.msra.mxu0 %v191_v1  ;;  %v194_v4 = vld [vmem:[%s269_s1 + $0x20] sm:$0xff]   ;;  %v195_v5 = vld [vmem:[%s269_s1 + $0x18] sm:$0xff]   ;;  %v196_v6 = vld [vmem:[%s269_s1 + $0x10] sm:$0xff]  }
   0x3   :  { %171 = vmatprep.subr.bf16.mxu0 %v200_v0  ;;  %v197_v7 = vld [vmem:[%s269_s1 + $0x8] sm:$0xff]   ;;  %v198_v8 = vld [vmem:[%s269_s1] sm:$0xff]  }
   0x4   :  { %v199_v9 = vld [vmem:[%s270_s0] sm:$0x1f]   ;;  %v139_v17 = vld [vmem:[%s272_s3 + $0x8] sm:$0x3] }
   0x5   :  { %v150_v10 = vld [vmem:[%s271_s2] ss:$0 sm:$0xff] }
   0x6   :  { %172 = vmatpush3.bf16.msra.mxu0 %v192_v2  ;;  %v138_v12 = vld [vmem:[%s272_s3] sm:$0xff] }
   0x7   :  { %173 = vmatprep.subr.bf16.mxu0 %v200_v0 }
   0xa   :  { %174 = vmatpush3.bf16.msra.mxu0 %v193_v3 }
   0xb   :  { %175 = vmatprep.subr.bf16.mxu0 %v200_v0 }
   0xe   :  { %176 = vmatpush3.bf16.msra.mxu0 %v194_v4 }
   0xf   :  { %177 = vmatprep.subr.bf16.mxu0 %v200_v0 }
  0x12   :  { %178 = vmatpush3.bf16.msra.mxu0 %v195_v5 }
  0x13   :  { %179 = vmatprep.subr.bf16.mxu0 %v200_v0 }
  0x16   :  { %180 = vmatpush3.bf16.msra.mxu0 %v196_v6 }
  0x17   :  { %181 = vmatprep.subr.bf16.mxu0 %v200_v0 }
  0x1a   :  { %182 = vmatpush3.bf16.msra.mxu0 %v197_v7 }
  0x1b   :  { %183 = vmatprep.subr.bf16.mxu0 %v200_v0 }
  0x1e   :  { %184 = vmatpush3.bf16.msra.mxu0 %v198_v8 }
  0x21   :  { %186 = vmatmul.mubr.bf16.vlgmr.msra.gmra.mxu0 %v199_v9 }
  0xe1   :  { %v131_v11 = vpop.f32.mrf.mxu0 }
  0xe2   :  { %v132_v13 = vadd.f32 %v150_v10, %v131_v11 }
  0xe3   :  { %v187_v14 = vpop.f32.mrf.mxu0 }
  0xe4   :  { %v140_v15 = vadd.f32 %v138_v12, %v132_v13 }
  0xe5   :  { %v134_v16 = vpop.f32.mrf.mxu0 }
  0xe6   :  { %143 = vst.msk [vmem:[%s273_s4] sm:$0xff] %vm142_vm1, %v140_v15  ;;  %v135_v18 = vadd.f32 %v150_v10, %v134_v16 }
  0xe7   :  { %v188_v19 = vpop.f32.mrf.mxu0 }
  0xe8   :  { %v141_v20 = vadd.f32 %v139_v17, %v135_v18 }
  0xea   :  { %145 = vst.msk [vmem:[%s273_s4 + $0x8] sm:$0x3] %vm144_vm2, %v141_v20 }

// kernel: mae_forward.23
= control target key start
LH: loop header
LB: loop body
LE: loop exit
PB: predicated region body
PF: predicated region fallthrough
CT: control target
= control target key end

     0   :  { %vm23_vm0 = vcmask 261120   ;;  %vm27_vm1 = vcmask 254976   ;;  %v244_v14 = vmov 0.0   ;;  %vm245_vm2 = vmmov 0   ;;  %s307_s0 = inlined_call_operand.vmem [shape: f32[10,32], index: 0, kind: input, shape index: {}]   ;;  %s308_s1 = inlined_call_operand.vmem [shape: bf16[32,128], index: 1, kind: input, shape index: {}]   ;;  %s309_s3 = inlined_call_operand.vmem [shape: f32[1,32], index: 3, kind: input, shape index: {}]   ;;  %s310_s4 = inlined_call_operand.vmem [shape: f32[1,32], index: 4, kind: input, shape index: {}]   ;;  %s311_s2 = inlined_call_operand.vmem [shape: f32[1,128], index: 2, kind: input, shape index: {}]   ;;  %s312_s5 = inlined_call_operand.vmem [shape: bf16[10,128], index: 5, kind: output, shape index: {}]  }
   0x1   :  { %v21_v0 = vld [vmem:[%s307_s0] sm:$0xff]  ;;  %v22_v1 = vld [vmem:[%s307_s0 + $0x8] sm:$0x3]  ;;  %219 = vmatprep.subr.bf16.mxu0 %v244_v14  ;;  %223 = vmatprep.mubr.msk.bf16.mxu0 %vm245_vm2, %v244_v14 }
   0x2   :  { %v24_v2 = vsel %vm23_vm0, %v21_v0, 0.0  ;;  %v28_v3 = vsel %vm27_vm1, %v22_v1, 0.0  ;;  %v230_v15 = vld [vmem:[%s308_s1 + $0x8] sm:$0xff]   ;;  %v231_v16 = vld [vmem:[%s308_s1] sm:$0xff]  }
   0x3   :  { %25 = vadd.xlane.f32.xlu0 %v24_v2  ;;  %220 = vmatpush3.bf16.msra.mxu0 %v230_v15  ;;  %v206_v25 = vld [vmem:[%s309_s3] ss:$0 sm:$0xff]  ;;  %v246_v15 = vmov 1.0  }
   0x4   :  { %221 = vmatprep.subr.bf16.mxu0 %v244_v14  ;;  %v207_v29 = vld [vmem:[%s310_s4] ss:$0 sm:$0xff] }
   0x5   :  { %v208_v34 = vld [vmem:[%s311_s2] ss:$0 sm:$0xff] }
   0x7   :  { %29 = vadd.xlane.f32.xlu0 %v28_v3  ;;  %222 = vmatpush3.bf16.msra.mxu0 %v231_v16 }
  0x8c   :  { %v26_v4 = vpop.xlane.xlu0 %25 }
  0x8d   :  { %v32_v5 = vmul.f32 0.03125, %v26_v4 }
  0x8f   :  { %v34_v6 = vsub.f32 %v21_v0, %v32_v5 }
  0x90   :  { %v30_v7 = vpop.xlane.xlu0 %29 }
  0x91   :  { %v33_v8 = vmul.f32 0.03125, %v30_v7  ;;  %v36_v9 = vmul.f32 %v34_v6, %v34_v6 }
  0x93   :  { %v35_v10 = vsub.f32 %v22_v1, %v33_v8  ;;  %v38_v11 = vsel %vm23_vm0, %v36_v9, 0.0 }
  0x94   :  { %39 = vadd.xlane.f32.xlu1 %v38_v11 }
  0x95   :  { %v37_v12 = vmul.f32 %v35_v10, %v35_v10 }
  0x97   :  { %v41_v13 = vsel %vm27_vm1, %v37_v12, 0.0 }
  0x98   :  { %42 = vadd.xlane.f32.xlu1 %v41_v13 }
 0x11d   :  { %v40_v17 = vpop.xlane.xlu1 %39 }
 0x11e   :  { %v44_v18 = vmul.f32 0.03125, %v40_v17 }
 0x120   :  { %v46_v19 = vadd.f32 1e-06, %v44_v18 }
 0x121   :  { %v43_v20 = vpop.xlane.xlu1 %42 }
 0x122   :  { %232 = vrsqrt.f32 %v46_v19  ;;  %v45_v21 = vmul.f32 0.03125, %v43_v20 }
 0x124   :  { %v47_v22 = vadd.f32 1e-06, %v45_v21 }
 0x126   :  { %234 = vrsqrt.f32 %v47_v22 }
 0x12f   :  { %v233_v23 = vpop.eup %232 }
 0x130   :  { %v50_v24 = vmul.f32 %v233_v23, %v34_v6 }
 0x132   :  { %v59_v28 = vmul.f32 %v206_v25, %v50_v24 }
 0x133   :  { %v235_v26 = vpop.eup %234 }
 0x134   :  { %v51_v27 = vmul.f32 %v235_v26, %v35_v10  ;;  %v68_v31 = vadd.f32 %v207_v29, %v59_v28 }
 0x136   :  { %v60_v30 = vmul.f32 %v206_v25, %v51_v27 }
 0x138   :  { %v69_v32 = vadd.f32 %v207_v29, %v60_v30 }
 0x13a   :  { %v70_v33 = vpack.c.bf16 %v69_v32, %v68_v31 }
 0x13c   :  { %224 = vmatmul.mubr.msk.bf16.vlgmr.msra.gmra.mxu0 %vm23_vm0, %v70_v33 }
 0x1fc   :  { %v131_v35 = vpop.f32.mrf.mxu0 }
 0x1fd   :  { %v132_v36 = vadd.f32 %v208_v34, %v131_v35 }
 0x1fe   :  { %v225_v37 = vpop.f32.mrf.mxu0 }
 0x1ff   :  { %v140_v38 = vmul.f32 0.70710677, %v132_v36  ;;  %v138_v19 = vmul.f32 0.5, %v132_v36 }
 0x200   :  { %v134_v39 = vpop.f32.mrf.mxu0 }
 0x201   :  { %v146_v40 = vand.u32 2147483647, %v140_v38  ;;  %v135_v41 = vadd.f32 %v208_v34, %v134_v39  ;;  %vm142_vm3 = vcmp.lt.f32.partialorder %v140_v38, 0.0 }
 0x202   :  { %v226_v42 = vpop.f32.mrf.mxu0  ;;  %v144_v16 = vsel %vm142_vm3, -1.0, %v246_v15 }
 0x203   :  { %v148_v43 = vmul.f32 0.3275911, %v146_v40  ;;  %v141_v44 = vmul.f32 0.70710677, %v135_v41  ;;  %v174_v49 = vsub.f32 0.0, %v146_v40  ;;  %v139_v26 = vmul.f32 0.5, %v135_v41 }
 0x205   :  { %v150_v45 = vadd.f32 1.0, %v148_v43  ;;  %v147_v46 = vand.u32 2147483647, %v141_v44  ;;  %v176_v50 = vmul.f32 %v174_v49, %v146_v40  ;;  %vm143_vm4 = vcmp.lt.f32.partialorder %v141_v44, 0.0 }
 0x206   :  { %v145_v22 = vsel %vm143_vm4, -1.0, %v246_v15 }
 0x207   :  { %236 = vrcp.f32 %v150_v45  ;;  %v149_v47 = vmul.f32 0.3275911, %v147_v46  ;;  %v175_v51 = vsub.f32 0.0, %v147_v46  ;;  %v178_v54 = vmul.f32 1.442695, %v176_v50 }
 0x209   :  { %v151_v48 = vadd.f32 1.0, %v149_v47  ;;  %v177_v55 = vmul.f32 %v175_v51, %v147_v46 }
 0x20b   :  { %238 = vrcp.f32 %v151_v48  ;;  %v180_v60 = vmul.f32 1.442695, %v177_v55 }
 0x20c   :  { %240 = vpow2.f32 %v178_v54 }
 0x20d   :  { %242 = vpow2.f32 %v180_v60 }
 0x214   :  { %v237_v52 = vpop.eup %236 }
 0x215   :  { %v156_v53 = vmul.f32 1.0614054, %v237_v52 }
 0x217   :  { %v158_v56 = vadd.f32 -1.4531521, %v156_v53 }
 0x218   :  { %v239_v57 = vpop.eup %238 }
 0x219   :  { %v160_v58 = vmul.f32 %v237_v52, %v158_v56  ;;  %v157_v59 = vmul.f32 1.0614054, %v239_v57  ;;  %v241_v9 = vpop.eup %240 }
 0x21a   :  { %v243_v14 = vpop.eup %242 }
 0x21b   :  { %v162_v61 = vadd.f32 1.4214138, %v160_v58  ;;  %v159_v62 = vadd.f32 -1.4531521, %v157_v59 }
 0x21d   :  { %v164_v63 = vmul.f32 %v237_v52, %v162_v61  ;;  %v161_v0 = vmul.f32 %v239_v57, %v159_v62 }
 0x21f   :  { %v166_v1 = vadd.f32 -0.28449672, %v164_v63  ;;  %v163_v2 = vadd.f32 1.4214138, %v161_v0 }
 0x221   :  { %v168_v3 = vmul.f32 %v237_v52, %v166_v1  ;;  %v165_v4 = vmul.f32 %v239_v57, %v163_v2 }
 0x223   :  { %v170_v5 = vadd.f32 0.2548296, %v168_v3  ;;  %v167_v6 = vadd.f32 -0.28449672, %v165_v4 }
 0x225   :  { %v172_v7 = vmul.f32 %v237_v52, %v170_v5  ;;  %v169_v8 = vmul.f32 %v239_v57, %v167_v6 }
 0x227   :  { %v182_v10 = vmul.f32 %v241_v9, %v172_v7  ;;  %v171_v11 = vadd.f32 0.2548296, %v169_v8 }
 0x229   :  { %v184_v12 = vsub.f32 1.0, %v182_v10  ;;  %v173_v13 = vmul.f32 %v239_v57, %v171_v11 }
 0x22b   :  { %v186_v17 = vmul.f32 %v184_v12, %v144_v16  ;;  %v183_v18 = vmul.f32 %v243_v14, %v173_v13 }
 0x22d   :  { %v188_v20 = vadd.f32 1.0, %v186_v17  ;;  %v185_v21 = vsub.f32 1.0, %v183_v18 }
 0x22f   :  { %v190_v23 = vmul.f32 %v188_v20, %v138_v19  ;;  %v187_v24 = vmul.f32 %v185_v21, %v145_v22 }
 0x231   :  { %v214_v25 = vpack.c.bf16 %v190_v23, %v190_v23  ;;  %v189_v27 = vadd.f32 1.0, %v187_v24 }
 0x233   :  { %200 = vst [vmem:[%s312_s5] sm:$0xf] %v214_v25  ;;  %v191_v28 = vmul.f32 %v189_v27, %v139_v26 }
 0x235   :  { %v215_v29 = vpack.c.bf16 %v191_v28, %v191_v28 }
 0x237   :  { %201 = vst [vmem:[%s312_s5 + $0x4] sm:$0x1] %v215_v29 }

// kernel: mae_forward.30
= control target key start
LH: loop header
LB: loop body
LE: loop exit
PB: predicated region body
PF: predicated region fallthrough
CT: control target
= control target key end

     0   :  { %vm23_vm0 = vcmask 261120   ;;  %vm27_vm1 = vcmask 254976   ;;  %v169_v14 = vmov 0.0   ;;  %vm170_vm2 = vmmov 0   ;;  %s235_s0 = inlined_call_operand.vmem [shape: f32[10,32], index: 0, kind: input, shape index: {}]   ;;  %s236_s1 = inlined_call_operand.vmem [shape: bf16[32,32], index: 1, kind: input, shape index: {}]   ;;  %s237_s3 = inlined_call_operand.vmem [shape: f32[1,32], index: 3, kind: input, shape index: {}]   ;;  %s238_s4 = inlined_call_operand.vmem [shape: f32[1,32], index: 4, kind: input, shape index: {}]   ;;  %s239_s2 = inlined_call_operand.vmem [shape: f32[1,32], index: 2, kind: input, shape index: {}]   ;;  %s240_s5 = inlined_call_operand.vmem [shape: f32[10,32], index: 5, kind: output, shape index: {}]  }
   0x1   :  { %v21_v0 = vld [vmem:[%s235_s0] sm:$0xff]  ;;  %v22_v1 = vld [vmem:[%s235_s0 + $0x8] sm:$0x3]  ;;  %153 = vmatprep.subr.bf16.mxu0 %v169_v14  ;;  %157 = vmatprep.mubr.msk.bf16.mxu0 %vm170_vm2, %v169_v14 }
   0x2   :  { %v24_v2 = vsel %vm23_vm0, %v21_v0, 0.0  ;;  %v28_v3 = vsel %vm27_vm1, %v22_v1, 0.0  ;;  %v163_v15 = vld [vmem:[%s236_s1 + $0x8] sm:$0xff]   ;;  %v164_v16 = vld [vmem:[%s236_s1] sm:$0xff]  }
   0x3   :  { %25 = vadd.xlane.f32.xlu0 %v24_v2  ;;  %154 = vmatpush3.bf16.msra.mxu0 %v163_v15  ;;  %v144_v25 = vld [vmem:[%s237_s3] ss:$0 sm:$0xff] }
   0x4   :  { %155 = vmatprep.subr.bf16.mxu0 %v169_v14  ;;  %v145_v29 = vld [vmem:[%s238_s4] ss:$0 sm:$0xff] }
   0x5   :  { %v146_v34 = vld [vmem:[%s239_s2] ss:$0 sm:$0xff] }
   0x7   :  { %29 = vadd.xlane.f32.xlu0 %v28_v3  ;;  %156 = vmatpush3.bf16.msra.mxu0 %v164_v16 }
  0x8c   :  { %v26_v4 = vpop.xlane.xlu0 %25 }
  0x8d   :  { %v32_v5 = vmul.f32 0.03125, %v26_v4 }
  0x8f   :  { %v34_v6 = vsub.f32 %v21_v0, %v32_v5 }
  0x90   :  { %v30_v7 = vpop.xlane.xlu0 %29 }
  0x91   :  { %v33_v8 = vmul.f32 0.03125, %v30_v7  ;;  %v36_v9 = vmul.f32 %v34_v6, %v34_v6 }
  0x93   :  { %v35_v10 = vsub.f32 %v22_v1, %v33_v8  ;;  %v38_v11 = vsel %vm23_vm0, %v36_v9, 0.0 }
  0x94   :  { %39 = vadd.xlane.f32.xlu1 %v38_v11 }
  0x95   :  { %v37_v12 = vmul.f32 %v35_v10, %v35_v10 }
  0x97   :  { %v41_v13 = vsel %vm27_vm1, %v37_v12, 0.0 }
  0x98   :  { %42 = vadd.xlane.f32.xlu1 %v41_v13 }
 0x11d   :  { %v40_v17 = vpop.xlane.xlu1 %39 }
 0x11e   :  { %v44_v18 = vmul.f32 0.03125, %v40_v17 }
 0x120   :  { %v46_v19 = vadd.f32 1e-06, %v44_v18 }
 0x121   :  { %v43_v20 = vpop.xlane.xlu1 %42 }
 0x122   :  { %165 = vrsqrt.f32 %v46_v19  ;;  %v45_v21 = vmul.f32 0.03125, %v43_v20 }
 0x124   :  { %v47_v22 = vadd.f32 1e-06, %v45_v21 }
 0x126   :  { %167 = vrsqrt.f32 %v47_v22 }
 0x12f   :  { %v166_v23 = vpop.eup %165 }
 0x130   :  { %v50_v24 = vmul.f32 %v166_v23, %v34_v6 }
 0x132   :  { %v59_v28 = vmul.f32 %v144_v25, %v50_v24 }
 0x133   :  { %v168_v26 = vpop.eup %167 }
 0x134   :  { %v51_v27 = vmul.f32 %v168_v26, %v35_v10  ;;  %v68_v31 = vadd.f32 %v145_v29, %v59_v28 }
 0x136   :  { %v60_v30 = vmul.f32 %v144_v25, %v51_v27 }
 0x138   :  { %v69_v32 = vadd.f32 %v145_v29, %v60_v30 }
 0x13a   :  { %v70_v33 = vpack.c.bf16 %v69_v32, %v68_v31 }
 0x13c   :  { %158 = vmatmul.mubr.msk.bf16.vlgmr.msra.gmra.mxu0 %vm23_vm0, %v70_v33 }
 0x1fc   :  { %v131_v35 = vpop.f32.mrf.mxu0 }
 0x1fd   :  { %v132_v36 = vadd.f32 %v146_v34, %v131_v35 }
 0x1fe   :  { %v159_v37 = vpop.f32.mrf.mxu0 }
 0x1ff   :  { %138 = vst.msk [vmem:[%s240_s5] sm:$0xff] %vm23_vm0, %v132_v36 }
 0x200   :  { %v134_v38 = vpop.f32.mrf.mxu0 }
 0x201   :  { %v135_v39 = vadd.f32 %v146_v34, %v134_v38 }
 0x202   :  { %v160_v40 = vpop.f32.mrf.mxu0 }
 0x203   :  { %139 = vst.msk [vmem:[%s240_s5 + $0x8] sm:$0x3] %vm27_vm1, %v135_v39 }

// kernel: mae_forward.31
= control target key start
LH: loop header
LB: loop body
LE: loop exit
PB: predicated region body
PF: predicated region fallthrough
CT: control target
= control target key end

     0   :  { %vm26_vm0 = vcmask 261120   ;;  %vm39_vm1 = vcmask 254976   ;;  %v298_v35 = vmov 0.0   ;;  %vm299_vm2 = vmmov 0   ;;  %s410_s0 = inlined_call_operand.vmem [shape: f32[34,32], index: 0, kind: input, shape index: {}]   ;;  %s411_s1 = inlined_call_operand.vmem [shape: bf16[32,96], index: 1, kind: input, shape index: {}]   ;;  %s412_s3 = inlined_call_operand.vmem [shape: f32[1,32], index: 3, kind: input, shape index: {}]   ;;  %s413_s4 = inlined_call_operand.vmem [shape: f32[1,32], index: 4, kind: input, shape index: {}]   ;;  %s414_s2 = inlined_call_operand.vmem [shape: f32[1,96], index: 2, kind: input, shape index: {}]   ;;  %s415_s5 = inlined_call_operand.vmem [shape: bf16[34,96], index: 5, kind: output, shape index: {}]  }
   0x1   :  { %v23_v0 = vld [vmem:[%s410_s0 + $0x10] sm:$0xff]  ;;  %v24_v1 = vld [vmem:[%s410_s0 + $0x18] sm:$0xff]  ;;  %v21_v2 = vld [vmem:[%s410_s0] sm:$0xff]  ;;  %280 = vmatprep.subr.bf16.mxu1 %v298_v35  ;;  %264 = vmatprep.subr.bf16.mxu0 %v298_v35  ;;  %vm230_vm3 = vcmask 781312   ;;  %vm235_vm4 = vcmask 778240  }
   0x2   :  { %v33_v3 = vsel %vm26_vm0, %v23_v0, 0.0  ;;  %v27_v4 = vsel %vm26_vm0, %v21_v2, 0.0  ;;  %v22_v5 = vld [vmem:[%s410_s0 + $0x8] sm:$0xff]  ;;  %v36_v6 = vsel %vm26_vm0, %v24_v1, 0.0  ;;  %v25_v8 = vld [vmem:[%s410_s0 + $0x20] sm:$0x3]  ;;  %272 = vmatprep.mubr.msk.bf16.mxu1 %vm299_vm2, %v298_v35  ;;  %268 = vmatprep.mubr.msk.bf16.mxu0 %vm299_vm2, %v298_v35 }
   0x3   :  { %34 = vadd.xlane.f32.xlu0 %v33_v3  ;;  %28 = vadd.xlane.f32.xlu1 %v27_v4  ;;  %v30_v7 = vsel %vm26_vm0, %v22_v5, 0.0  ;;  %v40_v9 = vsel %vm39_vm1, %v25_v8, 0.0  ;;  %v286_v36 = vld [vmem:[%s411_s1 + $0x8] sm:$0xff]   ;;  %v287_v37 = vld [vmem:[%s411_s1] sm:$0xff]  }
   0x4   :  { %282 = vmatpush3.bf16.msra.mxu1 %v286_v36  ;;  %265 = vmatpush3.bf16.msra.mxu0 %v286_v36  ;;  %v241_v55 = vld [vmem:[%s412_s3] ss:$0 sm:$0xff] }
   0x5   :  { %281 = vmatprep.subr.bf16.mxu1 %v298_v35  ;;  %266 = vmatprep.subr.bf16.mxu0 %v298_v35  ;;  %v242_v60 = vld [vmem:[%s413_s4] ss:$0 sm:$0xff] }
   0x7   :  { %37 = vadd.xlane.f32.xlu0 %v36_v6  ;;  %31 = vadd.xlane.f32.xlu1 %v30_v7 }
   0x8   :  { %283 = vmatpush3.bf16.msra.mxu1 %v287_v37  ;;  %267 = vmatpush3.bf16.msra.mxu0 %v287_v37 }
   0xb   :  { %41 = vadd.xlane.f32.xlu0 %v40_v9 }
  0x8c   :  { %v35_v10 = vpop.xlane.xlu0 %34  ;;  %v29_v11 = vpop.xlane.xlu1 %28 }
  0x8d   :  { %v46_v12 = vmul.f32 0.03125, %v35_v10  ;;  %v44_v13 = vmul.f32 0.03125, %v29_v11 }
  0x8f   :  { %v350_v14 = vsub.f32 %v23_v0, %v46_v12  ;;  %v352_v15 = vsub.f32 %v21_v2, %v44_v13 }
  0x90   :  { %v38_v16 = vpop.xlane.xlu0 %37  ;;  %v32_v17 = vpop.xlane.xlu1 %31 }
  0x91   :  { %v47_v18 = vmul.f32 0.03125, %v38_v16  ;;  %v56_v19 = vmul.f32 %v350_v14, %v350_v14  ;;  %v45_v20 = vmul.f32 0.03125, %v32_v17  ;;  %v54_v21 = vmul.f32 %v352_v15, %v352_v15 }
  0x93   :  { %v52_v22 = vsub.f32 %v24_v1, %v47_v18  ;;  %v65_v23 = vsel %vm26_vm0, %v56_v19, 0.0  ;;  %v359_v24 = vsub.f32 %v22_v5, %v45_v20  ;;  %v59_v28 = vsel %vm26_vm0, %v54_v21, 0.0 }
  0x94   :  { %v42_v25 = vpop.xlane.xlu0 %41  ;;  %66 = vadd.xlane.f32.xlu1 %v65_v23 }
  0x95   :  { %v48_v26 = vmul.f32 0.03125, %v42_v25  ;;  %v57_v27 = vmul.f32 %v52_v22, %v52_v22  ;;  %v55_v29 = vmul.f32 %v359_v24, %v359_v24 }
  0x97   :  { %v53_v30 = vsub.f32 %v25_v8, %v48_v26  ;;  %v68_v31 = vsel %vm26_vm0, %v57_v27, 0.0  ;;  %v62_v33 = vsel %vm26_vm0, %v55_v29, 0.0 }
  0x98   :  { %69 = vadd.xlane.f32.xlu0 %v68_v31  ;;  %60 = vadd.xlane.f32.xlu1 %v59_v28 }
  0x99   :  { %v58_v32 = vmul.f32 %v53_v30, %v53_v30 }
  0x9b   :  { %v71_v34 = vsel %vm39_vm1, %v58_v32, 0.0 }
  0x9c   :  { %72 = vadd.xlane.f32.xlu1 %v71_v34  ;;  %63 = vadd.xlane.f32.xlu0 %v62_v33 }
 0x11d   :  { %v67_v38 = vpop.xlane.xlu1 %66 }
 0x11e   :  { %v76_v39 = vmul.f32 0.03125, %v67_v38 }
 0x120   :  { %v81_v40 = vadd.f32 1e-06, %v76_v39 }
 0x121   :  { %v70_v41 = vpop.xlane.xlu0 %69  ;;  %v61_v42 = vpop.xlane.xlu1 %60 }
 0x122   :  { %288 = vrsqrt.f32 %v81_v40  ;;  %v77_v43 = vmul.f32 0.03125, %v70_v41  ;;  %v74_v44 = vmul.f32 0.03125, %v61_v42 }
 0x124   :  { %v82_v45 = vadd.f32 1e-06, %v77_v43  ;;  %v79_v46 = vadd.f32 1e-06, %v74_v44 }
 0x125   :  { %v64_v47 = vpop.xlane.xlu0 %63  ;;  %v73_v48 = vpop.xlane.xlu1 %72 }
 0x126   :  { %290 = vrsqrt.f32 %v82_v45  ;;  %v75_v49 = vmul.f32 0.03125, %v64_v47  ;;  %v78_v50 = vmul.f32 0.03125, %v73_v48 }
 0x127   :  { %292 = vrsqrt.f32 %v79_v46 }
 0x128   :  { %v80_v51 = vadd.f32 1e-06, %v75_v49  ;;  %v83_v52 = vadd.f32 1e-06, %v78_v50 }
 0x12a   :  { %294 = vrsqrt.f32 %v80_v51 }
 0x12b   :  { %296 = vrsqrt.f32 %v83_v52 }
 0x12f   :  { %v289_v53 = vpop.eup %288 }
 0x130   :  { %v91_v54 = vmul.f32 %v289_v53, %v350_v14  ;;  %v243_v14 = vld [vmem:[%s414_s2] ss:$0 sm:$0xff] }
 0x132   :  { %v103_v59 = vmul.f32 %v241_v55, %v91_v54 }
 0x133   :  { %v291_v56 = vpop.eup %290 }
 0x134   :  { %v293_v57 = vpop.eup %292  ;;  %v92_v58 = vmul.f32 %v291_v56, %v52_v22  ;;  %v115_v1 = vadd.f32 %v242_v60, %v103_v59 }
 0x135   :  { %v89_v61 = vmul.f32 %v293_v57, %v352_v15 }
 0x136   :  { %v104_v62 = vmul.f32 %v241_v55, %v92_v58 }
 0x137   :  { %v295_v63 = vpop.eup %294  ;;  %v101_v4 = vmul.f32 %v241_v55, %v89_v61 }
 0x138   :  { %v297_v0 = vpop.eup %296  ;;  %v116_v2 = vadd.f32 %v242_v60, %v104_v62  ;;  %v90_v3 = vmul.f32 %v295_v63, %v359_v24 }
 0x139   :  { %v93_v5 = vmul.f32 %v297_v0, %v53_v30  ;;  %v113_v9 = vadd.f32 %v242_v60, %v101_v4 }
 0x13a   :  { %v119_v6 = vpack.c.bf16 %v116_v2, %v115_v1  ;;  %v102_v7 = vmul.f32 %v241_v55, %v90_v3 }
 0x13b   :  { %v105_v8 = vmul.f32 %v241_v55, %v93_v5 }
 0x13c   :  { %273 = vmatmul.mubr.msk.bf16.vlgmr.msra.gmra.mxu1 %vm26_vm0, %v119_v6  ;;  %v114_v10 = vadd.f32 %v242_v60, %v102_v7 }
 0x13d   :  { %276 = vmatprep.mubr.msk.bf16.mxu1 %vm299_vm2, %v298_v35  ;;  %v117_v12 = vadd.f32 %v242_v60, %v105_v8 }
 0x13e   :  { %v118_v11 = vpack.c.bf16 %v114_v10, %v113_v9 }
 0x13f   :  { %v120_v13 = vpack.c.bf16 %v117_v12, %v117_v12 }
 0x140   :  { %269 = vmatmul.mubr.msk.bf16.vlgmr.msra.gmra.mxu0 %vm26_vm0, %v118_v11 }
 0x144   :  { %277 = vmatmul.mubr.msk.bf16.gmra.mxu1 %vm26_vm0, %v120_v13 }
 0x1fc   :  { %v195_v15 = vpop.f32.mrf.mxu1 }
 0x1fd   :  { %v196_v16 = vadd.f32 %v243_v14, %v195_v15 }
 0x1fe   :  { %v274_v17 = vpop.f32.mrf.mxu1 }
 0x1ff   :  { %v256_v18 = vpack.c.bf16 %v196_v16, %v196_v16 }
 0x200   :  { %v187_v19 = vpop.f32.mrf.mxu0  ;;  %v198_v20 = vpop.f32.mrf.mxu1 }
 0x201   :  { %233 = vst.msk [vmem:[%s415_s5 + $0x8] sm:$0xf] %vm230_vm3, %v256_v18  ;;  %v188_v21 = vadd.f32 %v243_v14, %v187_v19  ;;  %v199_v22 = vadd.f32 %v243_v14, %v198_v20 }
 0x202   :  { %v270_v23 = vpop.f32.mrf.mxu0  ;;  %v275_v24 = vpop.f32.mrf.mxu1 }
 0x203   :  { %v254_v25 = vpack.c.bf16 %v188_v21, %v188_v21  ;;  %v257_v26 = vpack.c.bf16 %v199_v22, %v199_v22 }
 0x204   :  { %v190_v27 = vpop.f32.mrf.mxu0  ;;  %v203_v28 = vpop.f32.mrf.mxu1 }
 0x205   :  { %231 = vst.msk [vmem:[%s415_s5] sm:$0xf] %vm230_vm3, %v254_v25  ;;  %234 = vst.msk [vmem:[%s415_s5 + $0xc] sm:$0xf] %vm230_vm3, %v257_v26  ;;  %v191_v29 = vadd.f32 %v243_v14, %v190_v27  ;;  %v204_v30 = vadd.f32 %v243_v14, %v203_v28 }
 0x206   :  { %v271_v31 = vpop.f32.mrf.mxu0  ;;  %v278_v32 = vpop.f32.mrf.mxu1 }
 0x207   :  { %v255_v33 = vpack.c.bf16 %v191_v29, %v191_v29  ;;  %v258_v34 = vpack.c.bf16 %v204_v30, %v204_v30 }
 0x208   :  { %v206_v35 = vpop.f32.mrf.mxu1 }
 0x209   :  { %232 = vst.msk [vmem:[%s415_s5 + $0x4] sm:$0xf] %vm230_vm3, %v255_v33 }
 0x20a   :  { %236 = vst.msk [vmem:[%s415_s5 + $0x10] sm:$0x1] %vm235_vm4, %v258_v34  ;;  %v279_v36 = vpop.f32.mrf.mxu1 }

// kernel: mae_forward.33
= control target key start
LH: loop header
LB: loop body
LE: loop exit
PB: predicated region body
PF: predicated region fallthrough
CT: control target
= control target key end

     0   :  { %v186_v0 = vmov 0.0   ;;  %vm187_vm0 = vmmov 0   ;;  %vm59_vm1 = vcmask 261120   ;;  %vm139_vm2 = vcmask 254976   ;;  %s271_s1 = inlined_call_operand.vmem [shape: bf16[32,32], index: 1, kind: input, shape index: {}]   ;;  %s272_s0 = inlined_call_operand.vmem [shape: bf16[34,32], index: 0, kind: input, shape index: {}]   ;;  %s273_s2 = inlined_call_operand.vmem [shape: f32[1,32], index: 2, kind: input, shape index: {}]   ;;  %s274_s3 = inlined_call_operand.vmem [shape: f32[34,32], index: 3, kind: input, shape index: {}]   ;;  %s275_s4 = inlined_call_operand.vmem [shape: f32[34,32], index: 4, kind: output, shape index: {}]  }
   0x1   :  { %159 = vmatprep.subr.bf16.mxu0 %v186_v0  ;;  %175 = vmatprep.subr.bf16.mxu1 %v186_v0  ;;  %v181_v1 = vld [vmem:[%s271_s1 + $0x8] sm:$0xff]   ;;  %v182_v2 = vld [vmem:[%s271_s1] sm:$0xff]   ;;  %v185_v5 = vld [vmem:[%s272_s0 + $0x10] ss:$0 sps:$4 sm:$0x11]  }
   0x2   :  { %163 = vmatprep.mubr.msk.bf16.mxu0 %vm187_vm0, %v186_v0  ;;  %167 = vmatprep.mubr.msk.bf16.mxu1 %vm187_vm0, %v186_v0  ;;  %v183_v3 = vld [vmem:[%s272_s0] sm:$0xff]   ;;  %v184_v4 = vld [vmem:[%s272_s0 + $0x8] sm:$0xff]   ;;  %v127_v10 = vld [vmem:[%s274_s3 + $0x10] sm:$0xff] }
   0x3   :  { %160 = vmatpush3.bf16.msra.mxu0 %v181_v1  ;;  %177 = vmatpush3.bf16.msra.mxu1 %v181_v1  ;;  %v145_v6 = vld [vmem:[%s273_s2] ss:$0 sm:$0xff]  ;;  %v126_v18 = vld [vmem:[%s274_s3 + $0x8] sm:$0xff]  ;;  %v128_v20 = vld [vmem:[%s274_s3 + $0x18] sm:$0xff] }
   0x4   :  { %161 = vmatprep.subr.bf16.mxu0 %v186_v0  ;;  %176 = vmatprep.subr.bf16.mxu1 %v186_v0  ;;  %v125_v8 = vld [vmem:[%s274_s3] sm:$0xff] }
   0x5   :  { %v129_v28 = vld [vmem:[%s274_s3 + $0x20] sm:$0x3] }
   0x7   :  { %162 = vmatpush3.bf16.msra.mxu0 %v182_v2  ;;  %178 = vmatpush3.bf16.msra.mxu1 %v182_v2 }
   0xa   :  { %164 = vmatmul.mubr.msk.bf16.vlgmr.msra.gmra.mxu0 %vm59_vm1, %v183_v3  ;;  %168 = vmatmul.mubr.msk.bf16.vlgmr.msra.gmra.mxu1 %vm59_vm1, %v184_v4 }
   0xb   :  { %171 = vmatprep.mubr.msk.bf16.mxu1 %vm187_vm0, %v186_v0 }
  0x12   :  { %172 = vmatmul.mubr.msk.bf16.gmra.mxu1 %vm59_vm1, %v185_v5 }
  0xca   :  { %v103_v7 = vpop.f32.mrf.mxu0  ;;  %v111_v9 = vpop.f32.mrf.mxu1 }
  0xcb   :  { %v104_v11 = vadd.f32 %v145_v6, %v103_v7  ;;  %v112_v12 = vadd.f32 %v145_v6, %v111_v9 }
  0xcc   :  { %v165_v13 = vpop.f32.mrf.mxu0  ;;  %v169_v14 = vpop.f32.mrf.mxu1 }
  0xcd   :  { %v130_v15 = vadd.f32 %v125_v8, %v104_v11  ;;  %v132_v16 = vadd.f32 %v127_v10, %v112_v12 }
  0xce   :  { %v106_v17 = vpop.f32.mrf.mxu0  ;;  %v114_v19 = vpop.f32.mrf.mxu1 }
  0xcf   :  { %135 = vst.msk [vmem:[%s275_s4] sm:$0xff] %vm59_vm1, %v130_v15  ;;  %137 = vst.msk [vmem:[%s275_s4 + $0x10] sm:$0xff] %vm59_vm1, %v132_v16  ;;  %v107_v21 = vadd.f32 %v145_v6, %v106_v17  ;;  %v115_v22 = vadd.f32 %v145_v6, %v114_v19 }
  0xd0   :  { %v166_v23 = vpop.f32.mrf.mxu0  ;;  %v170_v24 = vpop.f32.mrf.mxu1 }
  0xd1   :  { %v131_v25 = vadd.f32 %v126_v18, %v107_v21  ;;  %v133_v26 = vadd.f32 %v128_v20, %v115_v22 }
  0xd2   :  { %v119_v27 = vpop.f32.mrf.mxu1 }
  0xd3   :  { %136 = vst.msk [vmem:[%s275_s4 + $0x8] sm:$0xff] %vm59_vm1, %v131_v25  ;;  %138 = vst.msk [vmem:[%s275_s4 + $0x18] sm:$0xff] %vm59_vm1, %v133_v26  ;;  %v120_v29 = vadd.f32 %v145_v6, %v119_v27 }
  0xd4   :  { %v173_v30 = vpop.f32.mrf.mxu1 }
  0xd5   :  { %v134_v31 = vadd.f32 %v129_v28, %v120_v29 }
  0xd6   :  { %v122_v32 = vpop.f32.mrf.mxu1 }
  0xd7   :  { %140 = vst.msk [vmem:[%s275_s4 + $0x20] sm:$0x3] %vm139_vm2, %v134_v31 }
  0xd8   :  { %v174_v33 = vpop.f32.mrf.mxu1 }

// kernel: mae_forward.32
= control target key start
LH: loop header
LB: loop body
LE: loop exit
PB: predicated region body
PF: predicated region fallthrough
CT: control target
= control target key end

     0   :  { %s1222_s6 = smov 0   ;;  %s1388_s0 = inlined_call_operand.vmem [shape: bf16[2,17,96], index: 0, kind: input, shape index: {}]   ;;  %s1389_s1 = inlined_call_operand.vmem [shape: bf16[2,17,32], index: 1, kind: output, shape index: {}]  }
   0x1 LB: > { %s959_s7 = sadd.s32 4294967295, %s1195_s6   ;;  %p963_p0 = scmp.ge.s32.totalorder %s1195_s6, 1  ;;  %s1195_s6 = sphi %s1222_s6, %s11_s6  }
   0x2   : > { %p87_p1 = scmp.lt.s32.totalorder %s1195_s6, 3 }
   0x4   : > { %p88_p2 = pnand %p963_p0, %p87_p1 }
   0x5   : > { %p107_p3 = scmp.lt.s32.totalorder (!%p88_p2), %s959_s7, 1  ;;  %s1197_s12 = smov (!%p88_p2), 96  }
   0x6   : > { %91 = sbr.rel (%p88_p2) target bundleno = 2584 (0xa18), region = 24  ;;  %s1198_s13 = smov (!%p88_p2), 64  }
   0x7   : > { %s1199_s14 = smov (!%p88_p2), 88   ;;  %s1201_s15 = smov (!%p88_p2), 120  }
   0x8   : > { %s1202_s19 = smov (!%p88_p2), 56   ;;  %s1203_s20 = smov (!%p88_p2), 80  }
   0x9   : > { %s1204_s21 = smov (!%p88_p2), 112   ;;  %s1205_s22 = smov (!%p88_p2), 48  }
   0xa   : > { %s1206_s23 = smov (!%p88_p2), 72   ;;  %s1207_s24 = smov (!%p88_p2), 104  }
   0xb   : > { %s1391_s7 = smov (!%p107_p3, %s959_s7), 1  ;;  %vm141_vm0 = vcmask 64512   ;;  %vm209_vm1 = vcmask 131072   ;;  %vm202_vm2 = vcmask 138240   ;;  %vm250_vm3 = vcmask 1040384   ;;  %s1208_s25 = smov 40  }
   0xc   : > { %s1114_s8 = smul.u32 12, %s1391_s7  ;;  %v1200_v30 = vmov 0   ;;  %vm320_vm4 = vcmask 57344   ;;  %vm321_vm5 = vsmask.f32 256  ;;  %vm317_vm7 = vcmask 60416  }
   0xd   : > { %v1265_v31 = vsel %vm250_vm3, 65535, %v1200_v30  ;;  %vm322_vm6 = vmand %vm320_vm4, %vm321_vm5  ;;  %s1209_s26 = smov 8   ;;  %s1210_s27 = smov 16   ;;  %vm515_vm8 = vcmask 122944   ;;  %vm512_vm10 = vcmask 126016   ;;  %vm707_vm11 = vcmask 188544  }
   0xe   : > { %s111_s11 = scalar_lea.vmem %s1388_s0, %s1114_s8  ;;  %s1290_s18 = scalar_lea.vmem %s1389_s1, %s1114_s8  ;;  %vm516_vm9 = vmand %vm515_vm8, %vm321_vm5  ;;  %vm704_vm12 = vcmask 191616   ;;  %vm899_vm14 = vcmask 254144  }
   0xf   : > { %v120_v0 = vld [vmem:[%s111_s11 + $0x8] sm:$0x1]  ;;  %v1238_v1 = vld [vmem:[%s111_s11] sm:$0xff]   ;;  %vm708_vm13 = vmand %vm707_vm11, %vm321_vm5  ;;  %s1211_s28 = smov 24  }
  0x10   : > { %v1240_v2 = vcombine.low %v120_v0, %v120_v0  ;;  %v121_v3 = vunpack.c.l.bf16 %v1238_v1  ;;  %v122_v4 = vunpack.c.h.bf16 %v1238_v1  ;;  %v123_v11 = vunpack.c.l.bf16 %v120_v0  ;;  %v323_v60 = vld [vmem:[%s1290_s18 + $0x8] sm:$0x1]  ;;  %vm900_vm15 = vmand %vm899_vm14, %vm321_vm5 }
  0x12   : > { %139 = vrot.lane.b32.xlu0 %v1240_v2, %s1197_s12  ;;  %v124_v5 = vmul.f32 0.35355338, %v121_v3  ;;  %v125_v6 = vmul.f32 0.35355338, %v122_v4  ;;  %v126_v13 = vmul.f32 0.35355338, %v123_v11 }
  0x14   : > { %v1245_v7 = vpack.c.bf16 %v125_v6, %v124_v5  ;;  %v1254_v14 = vpack.c.bf16 %v126_v13, %v126_v13 }
  0x16   : > { %137 = vrot.lane.b32.xlu0 %v1238_v1, %s1197_s12  ;;  %1046 = vmatprep.mubr.msk.bf16.mxu0 %vm141_vm0, %v1245_v7 }
  0x84   : > { %v140_v8 = vpop.permute.xlu0 %139 }
  0x85   : > { %1106 = vmatprep.subr.msk.bf16.mxu0 %vm141_vm0, %v140_v8  ;;  %v152_v9 = vsel %vm141_vm0, %v140_v8, 0 }
  0x86   : > { %1043 = vmatpush3.bf16.xpose.msra.mxu0 %v152_v9 }
  0x88   : > { %v138_v10 = vpop.permute.xlu0 %137 }
  0x89   : > { %1107 = vmatprep.subr.msk.bf16.mxu0 %vm141_vm0, %v138_v10  ;;  %v149_v12 = vsel %vm141_vm0, %v138_v10, 0 }
  0x8e   : > { %1045 = vmatpush3.bf16.xpose.msra.mxu0 %v149_v12 }
  0x95   : > { %1047 = vmatmul.mubr.msk.bf16.vlgmr.msra.gmra.mxu0 %vm141_vm0, %v1254_v14 }
 0x155   : > { %v1048_v15 = vpop.f32.mrf.mxu0 }
 0x156   : > { %v210_v16 = vsel %vm209_vm1, %v1048_v15, -inf }
 0x157   : > { %211 = vmax.xlane.f32.xlu0 %v210_v16  ;;  %v188_v17 = vpop.f32.mrf.mxu0 }
 0x158   : > { %v203_v18 = vsel %vm202_vm2, %v188_v17, -inf }
 0x159   : > { %204 = vmax.xlane.f32.xlu1 %v203_v18  ;;  %v1049_v19 = vpop.f32.mrf.mxu0 }
 0x15b   : > { %v191_v20 = vpop.f32.mrf.mxu0 }
 0x15c   : > { %v206_v21 = vsel %vm202_vm2, %v191_v20, -inf }
 0x15d   : > { %207 = vmax.xlane.f32.xlu1 %v206_v21 }
 0x16d   : > { %334 = vrot.lane.b32.xlu0 %v1240_v2, %s1199_s14 }
 0x16e   : > { %241 = vrot.lane.b32.xlu1 %v1240_v2, %s1198_s13 }
 0x1e0   : > { %v212_v22 = vpop.xlane.xlu0 %211 }
 0x1e1   : > { %v215_v23 = vsub.f32 %v1048_v15, %v212_v22 }
 0x1e2   : > { %v205_v24 = vpop.xlane.xlu1 %204 }
 0x1e3   : > { %v220_v25 = vmul.f32 1.442695, %v215_v23  ;;  %v213_v26 = vsub.f32 %v188_v17, %v205_v24 }
 0x1e4   : > { %v335_v45 = vpop.permute.xlu0 %334 }
 0x1e5   : > { %1141 = vpow2.f32 %v220_v25  ;;  %v216_v27 = vmul.f32 1.442695, %v213_v26  ;;  %v346_v54 = vsel %vm141_vm0, %v335_v45, 0 }
 0x1e6   : > { %v208_v28 = vpop.xlane.xlu1 %207 }
 0x1e7   : > { %1143 = vpow2.f32 %v216_v27  ;;  %v214_v29 = vsub.f32 %v191_v20, %v208_v28 }
 0x1e9   : > { %v218_v32 = vmul.f32 1.442695, %v214_v29 }
 0x1ea   : > { %v242_v33 = vpop.permute.xlu1 %241 }
 0x1eb   : > { %1145 = vpow2.f32 %v218_v32  ;;  %v254_v34 = vand.u32 %v1265_v31, %v242_v33 }
 0x1ed   : > { %1050 = vmatprep.subr.bf16.mxu1 %v254_v34 }
 0x1ee   : > { %1051 = vmatpush3.bf16.msra.mxu1 %v254_v34 }
 0x1f2   : > { %v1142_v35 = vpop.eup %1141 }
 0x1f3   : > { %v228_v36 = vsel %vm209_vm1, %v1142_v35, 0.0 }
 0x1f4   : > { %v1144_v37 = vpop.eup %1143  ;;  %229 = vadd.xlane.f32.xlu1 %v228_v36 }
 0x1f5   : > { %v222_v38 = vsel %vm202_vm2, %v1144_v37, 0.0 }
 0x1f8   : > { %v1146_v39 = vpop.eup %1145  ;;  %223 = vadd.xlane.f32.xlu1 %v222_v38 }
 0x1f9   : > { %v225_v40 = vsel %vm202_vm2, %v1146_v39, 0.0 }
 0x1fc   : > { %226 = vadd.xlane.f32.xlu1 %v225_v40 }
 0x20d   : > { %239 = vrot.lane.b32.xlu1 %v1238_v1, %s1198_s13 }
 0x211   : > { %332 = vrot.lane.b32.xlu1 %v1238_v1, %s1199_s14 }
 0x215   : > { %328 = vrot.lane.b32.xlu1 %v1245_v7, %s1201_s15 }
 0x219   : > { %330 = vrot.lane.b32.xlu1 %v1254_v14, %s1201_s15 }
 0x27d   : > { %v230_v41 = vpop.xlane.xlu1 %229 }
 0x27e   : > { %1147 = vrcp.f32 %v230_v41 }
 0x281   : > { %v224_v42 = vpop.xlane.xlu1 %223 }
 0x282   : > { %1149 = vrcp.f32 %v224_v42 }
 0x285   : > { %v227_v43 = vpop.xlane.xlu1 %226 }
 0x286   : > { %1151 = vrcp.f32 %v227_v43 }
 0x289   : > { %v240_v44 = vpop.permute.xlu1 %239 }
 0x28a   : > { %1052 = vmatprep.subr.bf16.mxu1 %v240_v44 }
 0x28b   : > { %1053 = vmatpush3.bf16.msra.mxu1 %v240_v44  ;;  %v1148_v46 = vpop.eup %1147 }
 0x28c   : > { %1108 = vmatprep.subr.msk.bf16.mxu1 %vm141_vm0, %v335_v45  ;;  %v236_v50 = vmul.f32 %v1148_v46, %v1142_v35 }
 0x28d   : > { %v333_v48 = vpop.permute.xlu1 %332 }
 0x28e   : > { %v238_v55 = vpack.c.bf16 %v236_v50, %v236_v50  ;;  %v343_v57 = vsel %vm141_vm0, %v333_v48, 0 }
 0x28f   : > { %v1150_v47 = vpop.eup %1149 }
 0x290   : > { %v234_v51 = vmul.f32 %v1150_v47, %v1144_v37 }
 0x291   : > { %v329_v56 = vpop.permute.xlu1 %328 }
 0x293   : > { %v1152_v49 = vpop.eup %1151 }
 0x294   : > { %v235_v52 = vmul.f32 %v1152_v49, %v1146_v39 }
 0x295   : > { %v331_v58 = vpop.permute.xlu1 %330 }
 0x296   : > { %v237_v53 = vpack.c.bf16 %v235_v52, %v234_v51 }
 0x298   : > { %1054 = vmatprep.mubr.msk.bf16.mxu1 %vm202_vm2, %v237_v53 }
 0x299   : > { %1055 = vmatmul.mubr.msk.bf16.vlgmr.msra.gmra.mxu1 %vm202_vm2, %v238_v55 }
 0x29a   : > { %1059 = vmatpush3.bf16.xpose.msra.mxu1 %v346_v54  ;;  %1062 = vmatprep.mubr.msk.bf16.mxu1 %vm141_vm0, %v329_v56 }
 0x29b   : > { %1109 = vmatprep.subr.msk.bf16.mxu1 %vm141_vm0, %v333_v48 }
 0x2a2   : > { %1061 = vmatpush3.bf16.xpose.msra.mxu1 %v343_v57 }
 0x2a9   : > { %1063 = vmatmul.mubr.msk.bf16.vlgmr.msra.gmra.mxu1 %vm141_vm0, %v331_v58 }
 0x359   : > { %v1056_v59 = vpop.f32.mrf.mxu1 }
 0x35a   : > { %v1000_v61 = vpack.c.bf16 %v1056_v59, %v1056_v59 }
 0x35b   : > { %v290_v62 = vpop.f32.mrf.mxu1 }
 0x35c   : > { %v324_v63 = vsel %vm322_vm6, %v1000_v61, %v323_v60  ;;  %v998_v0 = vpack.c.bf16 %v290_v62, %v290_v62 }
 0x35d   : > { %325 = vst [vmem:[%s1290_s18 + $0x8] sm:$0x1] %v324_v63  ;;  %v1057_v3 = vpop.f32.mrf.mxu1 }
 0x35e   : > { %318 = vst.msk [vmem:[%s1290_s18] sm:$0xf] %vm317_vm7, %v998_v0 }
 0x35f   : > { %v293_v4 = vpop.f32.mrf.mxu1 }
 0x360   : > { %v999_v5 = vpack.c.bf16 %v293_v4, %v293_v4 }
 0x362   : > { %319 = vst.msk [vmem:[%s1290_s18 + $0x4] sm:$0xf] %vm317_vm7, %v999_v5 }
 0x369   : > { %v1064_v6 = vpop.f32.mrf.mxu1 }
 0x36a   : > { %v402_v12 = vsel %vm209_vm1, %v1064_v6, -inf }
 0x36b   : > { %v382_v8 = vpop.f32.mrf.mxu1 }
 0x36c   : > { %v396_v9 = vsel %vm202_vm2, %v382_v8, -inf }
 0x36d   : > { %397 = vmax.xlane.f32.xlu1 %v396_v9  ;;  %v1065_v10 = vpop.f32.mrf.mxu1 }
 0x36f   : > { %v385_v11 = vpop.f32.mrf.mxu1 }
 0x370   : > { %v399_v13 = vsel %vm202_vm2, %v385_v11, -inf }
 0x371   : > { %403 = vmax.xlane.f32.xlu1 %v402_v12  ;;  %400 = vmax.xlane.f32.xlu0 %v399_v13 }
 0x382   : > { %433 = vrot.lane.b32.xlu1 %v1240_v2, %s1202_s19 }
 0x3f6   : > { %v398_v15 = vpop.xlane.xlu1 %397 }
 0x3f7   : > { %v405_v16 = vsub.f32 %v382_v8, %v398_v15 }
 0x3f9   : > { %v408_v21 = vmul.f32 1.442695, %v405_v16 }
 0x3fa   : > { %v404_v17 = vpop.xlane.xlu1 %403  ;;  %v401_v18 = vpop.xlane.xlu0 %400 }
 0x3fb   : > { %v407_v19 = vsub.f32 %v1064_v6, %v404_v17  ;;  %v406_v20 = vsub.f32 %v385_v11, %v401_v18 }
 0x3fd   : > { %v412_v22 = vmul.f32 1.442695, %v407_v19  ;;  %v410_v23 = vmul.f32 1.442695, %v406_v20 }
 0x3fe   : > { %v434_v24 = vpop.permute.xlu1 %433 }
 0x3ff   : > { %1153 = vpow2.f32 %v412_v22  ;;  %v443_v25 = vand.u32 %v434_v24, %v1265_v31 }
 0x400   : > { %1155 = vpow2.f32 %v410_v23 }
 0x401   : > { %1157 = vpow2.f32 %v408_v21  ;;  %1066 = vmatprep.subr.bf16.mxu0 %v443_v25 }
 0x402   : > { %1067 = vmatpush3.bf16.msra.mxu0 %v443_v25 }
 0x40c   : > { %v1154_v26 = vpop.eup %1153 }
 0x40d   : > { %v1156_v27 = vpop.eup %1155  ;;  %v420_v28 = vsel %vm209_vm1, %v1154_v26, 0.0 }
 0x40e   : > { %v1158_v29 = vpop.eup %1157  ;;  %421 = vadd.xlane.f32.xlu0 %v420_v28  ;;  %v417_v30 = vsel %vm202_vm2, %v1156_v27, 0.0 }
 0x40f   : > { %418 = vadd.xlane.f32.xlu1 %v417_v30  ;;  %v414_v32 = vsel %vm202_vm2, %v1158_v29, 0.0 }
 0x412   : > { %415 = vadd.xlane.f32.xlu0 %v414_v32 }
 0x420   : > { %526 = vrot.lane.b32.xlu1 %v1240_v2, %s1203_s20 }
 0x424   : > { %524 = vrot.lane.b32.xlu1 %v1238_v1, %s1203_s20 }
 0x428   : > { %431 = vrot.lane.b32.xlu0 %v1238_v1, %s1202_s19  ;;  %522 = vrot.lane.b32.xlu1 %v1254_v14, %s1204_s21 }
 0x42c   : > { %520 = vrot.lane.b32.xlu0 %v1245_v7, %s1204_s21 }
 0x497   : > { %v422_v33 = vpop.xlane.xlu0 %421 }
 0x498   : > { %v419_v34 = vpop.xlane.xlu1 %418  ;;  %1159 = vrcp.f32 %v422_v33 }
 0x499   : > { %1161 = vrcp.f32 %v419_v34 }
 0x49b   : > { %v416_v35 = vpop.xlane.xlu0 %415 }
 0x49c   : > { %1163 = vrcp.f32 %v416_v35  ;;  %v527_v37 = vpop.permute.xlu1 %526 }
 0x49d   : > { %v538_v45 = vsel %vm141_vm0, %v527_v37, 0 }
 0x49f   : > { %v432_v36 = vpop.permute.xlu0 %431 }
 0x4a0   : > { %1068 = vmatprep.subr.bf16.mxu0 %v432_v36  ;;  %v525_v48 = vpop.permute.xlu1 %524 }
 0x4a1   : > { %1069 = vmatpush3.bf16.msra.mxu0 %v432_v36  ;;  %v535_v49 = vsel %vm141_vm0, %v525_v48, 0 }
 0x4a2   : > { %1110 = vmatprep.subr.msk.bf16.mxu0 %vm141_vm0, %v527_v37 }
 0x4a3   : > { %v521_v47 = vpop.permute.xlu0 %520 }
 0x4a4   : > { %v523_v50 = vpop.permute.xlu1 %522 }
 0x4a5   : > { %v1160_v38 = vpop.eup %1159 }
 0x4a6   : > { %v1162_v39 = vpop.eup %1161  ;;  %v428_v41 = vmul.f32 %v1160_v38, %v1154_v26 }
 0x4a7   : > { %v427_v43 = vmul.f32 %v1162_v39, %v1156_v27 }
 0x4a8   : > { %v430_v46 = vpack.c.bf16 %v428_v41, %v428_v41 }
 0x4a9   : > { %v1164_v40 = vpop.eup %1163 }
 0x4aa   : > { %v426_v42 = vmul.f32 %v1164_v40, %v1158_v29 }
 0x4ac   : > { %v429_v44 = vpack.c.bf16 %v427_v43, %v426_v42 }
 0x4ae   : > { %1070 = vmatprep.mubr.msk.bf16.mxu0 %vm202_vm2, %v429_v44 }
 0x4af   : > { %1071 = vmatmul.mubr.msk.bf16.vlgmr.msra.gmra.mxu0 %vm202_vm2, %v430_v46 }
 0x4b0   : > { %1075 = vmatpush3.bf16.xpose.msra.mxu0 %v538_v45  ;;  %1078 = vmatprep.mubr.msk.bf16.mxu0 %vm141_vm0, %v521_v47 }
 0x4b1   : > { %1111 = vmatprep.subr.msk.bf16.mxu0 %vm141_vm0, %v525_v48 }
 0x4b8   : > { %1077 = vmatpush3.bf16.xpose.msra.mxu0 %v535_v49 }
 0x4bf   : > { %1079 = vmatmul.mubr.msk.bf16.vlgmr.msra.gmra.mxu0 %vm141_vm0, %v523_v50 }
 0x56f   : > { %v1320_v51 = vpop.f32.mrf.mxu0 }
 0x571   : > { %v1322_v52 = vpop.f32.mrf.mxu0 }
 0x573   : > { %v1073_v53 = vpop.f32.mrf.mxu0 }
 0x575   : > { %v1324_v54 = vpop.f32.mrf.mxu0 }
 0x57f   : > { %v1080_v55 = vpop.f32.mrf.mxu0 }
 0x580   : > { %v594_v60 = vsel %vm209_vm1, %v1080_v55, -inf }
 0x581   : > { %v574_v56 = vpop.f32.mrf.mxu0 }
 0x582   : > { %v588_v57 = vsel %vm202_vm2, %v574_v56, -inf }
 0x583   : > { %589 = vmax.xlane.f32.xlu0 %v588_v57  ;;  %v1081_v58 = vpop.f32.mrf.mxu0 }
 0x585   : > { %v577_v59 = vpop.f32.mrf.mxu0 }
 0x586   : > { %v591_v61 = vsel %vm202_vm2, %v577_v59, -inf }
 0x587   : > { %595 = vmax.xlane.f32.xlu0 %v594_v60  ;;  %592 = vmax.xlane.f32.xlu1 %v591_v61 }
 0x598   : > { %625 = vrot.lane.b32.xlu1 %v1240_v2, %s1205_s22 }
 0x60c   : > { %v590_v62 = vpop.xlane.xlu0 %589 }
 0x60d   : > { %v597_v63 = vsub.f32 %v574_v56, %v590_v62 }
 0x60f   : > { %v600_v6 = vmul.f32 1.442695, %v597_v63 }
 0x610   : > { %v596_v0 = vpop.xlane.xlu0 %595  ;;  %v593_v3 = vpop.xlane.xlu1 %592 }
 0x611   : > { %v599_v4 = vsub.f32 %v1080_v55, %v596_v0  ;;  %v598_v5 = vsub.f32 %v577_v59, %v593_v3  ;;  %v1003_v3 = vpack.c.bf16 %v1320_v51, %v1320_v51 }
 0x613   : > { %v604_v8 = vmul.f32 1.442695, %v599_v4  ;;  %v602_v9 = vmul.f32 1.442695, %v598_v5  ;;  %v1001_v5 = vpack.c.bf16 %v1322_v52, %v1322_v52 }
 0x614   : > { %v626_v10 = vpop.permute.xlu1 %625 }
 0x615   : > { %1165 = vpow2.f32 %v604_v8  ;;  %v635_v11 = vand.u32 %v626_v10, %v1265_v31 }
 0x616   : > { %1167 = vpow2.f32 %v602_v9 }
 0x617   : > { %1169 = vpow2.f32 %v600_v6  ;;  %1082 = vmatprep.subr.bf16.mxu1 %v635_v11  ;;  %v1002_v6 = vpack.c.bf16 %v1324_v54, %v1324_v54 }
 0x618   : > { %1083 = vmatpush3.bf16.msra.mxu1 %v635_v11  ;;  %v517_v11 = vld [vmem:[%s1290_s18 + $0x8] sm:$0x1] }
 0x622   : > { %v1166_v12 = vpop.eup %1165 }
 0x623   : > { %v1168_v13 = vpop.eup %1167  ;;  %v612_v15 = vsel %vm209_vm1, %v1166_v12, 0.0 }
 0x624   : > { %v1170_v16 = vpop.eup %1169  ;;  %613 = vadd.xlane.f32.xlu0 %v612_v15  ;;  %v609_v17 = vsel %vm202_vm2, %v1168_v13, 0.0 }
 0x625   : > { %610 = vadd.xlane.f32.xlu1 %v609_v17  ;;  %v606_v18 = vsel %vm202_vm2, %v1170_v16, 0.0 }
 0x628   : > { %607 = vadd.xlane.f32.xlu0 %v606_v18 }
 0x636   : > { %718 = vrot.lane.b32.xlu1 %v1240_v2, %s1206_s23 }
 0x63a   : > { %716 = vrot.lane.b32.xlu1 %v1238_v1, %s1206_s23 }
 0x63e   : > { %623 = vrot.lane.b32.xlu0 %v1238_v1, %s1205_s22  ;;  %714 = vrot.lane.b32.xlu1 %v1254_v14, %s1207_s24 }
 0x642   : > { %712 = vrot.lane.b32.xlu0 %v1245_v7, %s1207_s24 }
 0x6ad   : > { %v614_v19 = vpop.xlane.xlu0 %613 }
 0x6ae   : > { %v611_v20 = vpop.xlane.xlu1 %610  ;;  %1171 = vrcp.f32 %v614_v19 }
 0x6af   : > { %1173 = vrcp.f32 %v611_v20 }
 0x6b1   : > { %v608_v21 = vpop.xlane.xlu0 %607 }
 0x6b2   : > { %1175 = vrcp.f32 %v608_v21  ;;  %v719_v23 = vpop.permute.xlu1 %718 }
 0x6b3   : > { %v730_v7 = vsel %vm141_vm0, %v719_v23, 0 }
 0x6b5   : > { %v624_v22 = vpop.permute.xlu0 %623 }
 0x6b6   : > { %1084 = vmatprep.subr.bf16.mxu1 %v624_v22  ;;  %v717_v33 = vpop.permute.xlu1 %716 }
 0x6b7   : > { %1085 = vmatpush3.bf16.msra.mxu1 %v624_v22  ;;  %v727_v34 = vsel %vm141_vm0, %v717_v33, 0 }
 0x6b8   : > { %1112 = vmatprep.subr.msk.bf16.mxu1 %vm141_vm0, %v719_v23 }
 0x6b9   : > { %v713_v32 = vpop.permute.xlu0 %712 }
 0x6ba   : > { %v715_v35 = vpop.permute.xlu1 %714 }
 0x6bb   : > { %v1172_v24 = vpop.eup %1171 }
 0x6bc   : > { %v1174_v25 = vpop.eup %1173  ;;  %v620_v27 = vmul.f32 %v1172_v24, %v1166_v12 }
 0x6bd   : > { %v619_v14 = vmul.f32 %v1174_v25, %v1168_v13 }
 0x6be   : > { %v622_v30 = vpack.c.bf16 %v620_v27, %v620_v27 }
 0x6bf   : > { %v1176_v26 = vpop.eup %1175 }
 0x6c0   : > { %v618_v28 = vmul.f32 %v1176_v26, %v1170_v16 }
 0x6c2   : > { %v621_v29 = vpack.c.bf16 %v619_v14, %v618_v28 }
 0x6c4   : > { %1086 = vmatprep.mubr.msk.bf16.mxu1 %vm202_vm2, %v621_v29 }
 0x6c5   : > { %1087 = vmatmul.mubr.msk.bf16.vlgmr.msra.gmra.mxu1 %vm202_vm2, %v622_v30 }
 0x6c6   : > { %1091 = vmatpush3.bf16.xpose.msra.mxu1 %v730_v7  ;;  %1094 = vmatprep.mubr.msk.bf16.mxu1 %vm141_vm0, %v713_v32 }
 0x6c7   : > { %1113 = vmatprep.subr.msk.bf16.mxu1 %vm141_vm0, %v717_v33 }
 0x6ce   : > { %1093 = vmatpush3.bf16.xpose.msra.mxu1 %v727_v34 }
 0x6d5   : > { %1095 = vmatmul.mubr.msk.bf16.vlgmr.msra.gmra.mxu1 %vm141_vm0, %v715_v35  ;;  %vm896_vm0 = vcmask 257216  }
 0x785   : > { %v1088_v36 = vpop.f32.mrf.mxu1 }
 0x786   : > { %v1006_v4 = vpack.c.bf16 %v1088_v36, %v1088_v36 }
 0x787   : > { %v671_v37 = vpop.f32.mrf.mxu1 }
 0x788   : > { %v1004_v8 = vpack.c.bf16 %v671_v37, %v671_v37 }
 0x789   : > { %v1089_v38 = vpop.f32.mrf.mxu1 }
 0x78b   : > { %v674_v39 = vpop.f32.mrf.mxu1 }
 0x795   : > { %v1096_v40 = vpop.f32.mrf.mxu1 }
 0x796   : > { %v786_v45 = vsel %vm209_vm1, %v1096_v40, -inf }
 0x797   : > { %v766_v41 = vpop.f32.mrf.mxu1 }
 0x798   : > { %v780_v42 = vsel %vm202_vm2, %v766_v41, -inf }
 0x799   : > { %781 = vmax.xlane.f32.xlu0 %v780_v42  ;;  %v1097_v43 = vpop.f32.mrf.mxu1 }
 0x79b   : > { %v769_v44 = vpop.f32.mrf.mxu1 }
 0x79c   : > { %v783_v46 = vsel %vm202_vm2, %v769_v44, -inf }
 0x79d   : > { %787 = vmax.xlane.f32.xlu0 %v786_v45  ;;  %784 = vmax.xlane.f32.xlu1 %v783_v46 }
 0x822   : > { %v782_v47 = vpop.xlane.xlu0 %781 }
 0x823   : > { %v789_v48 = vsub.f32 %v766_v41, %v782_v47 }
 0x825   : > { %v792_v56 = vmul.f32 1.442695, %v789_v48 }
 0x826   : > { %v788_v49 = vpop.xlane.xlu0 %787  ;;  %v785_v50 = vpop.xlane.xlu1 %784 }
 0x827   : > { %v791_v53 = vsub.f32 %v1096_v40, %v788_v49  ;;  %v790_v55 = vsub.f32 %v769_v44, %v785_v50 }
 0x829   : > { %v796_v57 = vmul.f32 1.442695, %v791_v53  ;;  %v794_v58 = vmul.f32 1.442695, %v790_v55 }
 0x82b   : > { %1177 = vpow2.f32 %v796_v57 }
 0x82c   : > { %1179 = vpow2.f32 %v794_v58 }
 0x82d   : > { %1181 = vpow2.f32 %v792_v56 }
 0x838   : > { %v1178_v59 = vpop.eup %1177 }
 0x839   : > { %v1180_v60 = vpop.eup %1179  ;;  %v804_v61 = vsel %vm209_vm1, %v1178_v59, 0.0 }
 0x83a   : > { %v1182_v62 = vpop.eup %1181  ;;  %805 = vadd.xlane.f32.xlu0 %v804_v61  ;;  %v801_v63 = vsel %vm202_vm2, %v1180_v60, 0.0 }
 0x83b   : > { %802 = vadd.xlane.f32.xlu1 %v801_v63  ;;  %v798_v0 = vsel %vm202_vm2, %v1182_v62, 0.0 }
 0x83e   : > { %799 = vadd.xlane.f32.xlu0 %v798_v0 }
 0x84c   : > { %817 = vrot.lane.b32.xlu1 %v1240_v2, %s1208_s25  ;;  %v1005_v2 = vpack.c.bf16 %v674_v39, %v674_v39 }
 0x850   : > { %507 = vrot.lane.b32.xlu1 %v1003_v3, %s1209_s26 }
 0x854   : > { %699 = vrot.lane.b32.xlu1 %v1006_v4, %s1210_s27  ;;  %815 = vrot.lane.b32.xlu0 %v1238_v1, %s1208_s25 }
 0x858   : > { %505 = vrot.lane.b32.xlu1 %v1002_v6, %s1209_s26  ;;  %503 = vrot.lane.b32.xlu0 %v1001_v5, %s1209_s26 }
 0x85c   : > { %697 = vrot.lane.b32.xlu1 %v1005_v2, %s1210_s27  ;;  %695 = vrot.lane.b32.xlu0 %v1004_v8, %s1210_s27 }
 0x8c3   : > { %v806_v51 = vpop.xlane.xlu0 %805 }
 0x8c4   : > { %v803_v9 = vpop.xlane.xlu1 %802  ;;  %1183 = vrcp.f32 %v806_v51 }
 0x8c5   : > { %1185 = vrcp.f32 %v803_v9 }
 0x8c7   : > { %v800_v10 = vpop.xlane.xlu0 %799 }
 0x8c8   : > { %1187 = vrcp.f32 %v800_v10  ;;  %v818_v1 = vpop.permute.xlu1 %817 }
 0x8c9   : > { %v827_v52 = vand.u32 %v818_v1, %v1265_v31 }
 0x8cb   : > { %v816_v54 = vpop.permute.xlu0 %815  ;;  %1098 = vmatprep.subr.bf16.mxu0 %v827_v52 }
 0x8cc   : > { %v508_v12 = vpop.permute.xlu1 %507  ;;  %1099 = vmatpush3.bf16.msra.mxu0 %v827_v52 }
 0x8cd   : > { %v518_v13 = vsel %vm516_vm9, %v508_v12, %v517_v11  ;;  %1100 = vmatprep.subr.bf16.mxu0 %v816_v54 }
 0x8ce   : > { %519 = vst [vmem:[%s1290_s18 + $0x8] sm:$0x1] %v518_v13 }
 0x8cf   : > { %v504_v15 = vpop.permute.xlu0 %503 }
 0x8d0   : > { %513 = vst.msk [vmem:[%s1290_s18] sm:$0xf] %vm512_vm10, %v504_v15  ;;  %v700_v16 = vpop.permute.xlu1 %699  ;;  %1101 = vmatpush3.bf16.msra.mxu0 %v816_v54 }
 0x8d1   : > { %v1184_v31 = vpop.eup %1183 }
 0x8d2   : > { %v1186_v17 = vpop.eup %1185  ;;  %v812_v22 = vmul.f32 %v1184_v31, %v1178_v59 }
 0x8d3   : > { %v696_v18 = vpop.permute.xlu0 %695  ;;  %v811_v25 = vmul.f32 %v1186_v17, %v1180_v60 }
 0x8d4   : > { %705 = vst.msk [vmem:[%s1290_s18] sm:$0xf] %vm704_vm12, %v696_v18  ;;  %v506_v19 = vpop.permute.xlu1 %505  ;;  %v814_v28 = vpack.c.bf16 %v812_v22, %v812_v22 }
 0x8d5   : > { %v1188_v20 = vpop.eup %1187  ;;  %v709_v21 = vld [vmem:[%s1290_s18 + $0x8] sm:$0x1]  ;;  %514 = vst.msk [vmem:[%s1290_s18 + $0x4] sm:$0xf] %vm512_vm10, %v506_v19 }
 0x8d6   : > { %v710_v23 = vsel %vm708_vm13, %v700_v16, %v709_v21  ;;  %v810_v24 = vmul.f32 %v1188_v20, %v1182_v62 }
 0x8d7   : > { %711 = vst [vmem:[%s1290_s18 + $0x8] sm:$0x1] %v710_v23 }
 0x8d8   : > { %v698_v26 = vpop.permute.xlu1 %697  ;;  %v813_v27 = vpack.c.bf16 %v811_v25, %v810_v24 }
 0x8d9   : > { %706 = vst.msk [vmem:[%s1290_s18 + $0x4] sm:$0xf] %vm704_vm12, %v698_v26 }
 0x8da   : > { %1102 = vmatprep.mubr.msk.bf16.mxu0 %vm202_vm2, %v813_v27 }
 0x8db   : > { %1103 = vmatmul.mubr.msk.bf16.vlgmr.msra.gmra.mxu0 %vm202_vm2, %v814_v28 }
 0x8de   : > { %v901_v36 = vld [vmem:[%s1290_s18 + $0x8] sm:$0x1] }
 0x99b   : > { %v1104_v14 = vpop.f32.mrf.mxu0 }
 0x99c   : > { %v1009_v29 = vpack.c.bf16 %v1104_v14, %v1104_v14 }
 0x99d   : > { %v863_v7 = vpop.f32.mrf.mxu0 }
 0x99e   : > { %v1007_v30 = vpack.c.bf16 %v863_v7, %v863_v7  ;;  %891 = vrot.lane.b32.xlu0 %v1009_v29, %s1211_s28 }
 0x99f   : > { %v1105_v32 = vpop.f32.mrf.mxu0 }
 0x9a0   : > { %887 = vrot.lane.b32.xlu1 %v1007_v30, %s1211_s28 }
 0x9a1   : > { %v866_v33 = vpop.f32.mrf.mxu0 }
 0x9a2   : > { %v1008_v34 = vpack.c.bf16 %v866_v33, %v866_v33 }
 0x9a4   : > { %889 = vrot.lane.b32.xlu0 %v1008_v34, %s1211_s28 }
 0xa10   : > { %v892_v35 = vpop.permute.xlu0 %891 }
 0xa11   : > { %v902_v37 = vsel %vm900_vm15, %v892_v35, %v901_v36 }
 0xa12   : > { %903 = vst [vmem:[%s1290_s18 + $0x8] sm:$0x1] %v902_v37  ;;  %v888_v38 = vpop.permute.xlu1 %887 }
 0xa13   : > { %897 = vst.msk [vmem:[%s1290_s18] sm:$0xf] %vm896_vm0, %v888_v38 }
 0xa16   : > { %v890_v39 = vpop.permute.xlu0 %889 }
 0xa17   : > { %898 = vst.msk [vmem:[%s1290_s18 + $0x4] sm:$0xf] %vm896_vm0, %v890_v39 }
 0xa18 PF: > { %s11_s6 = sadd.s32 1, %s1195_s6  }
 0xa19   : > { %p8_p4 = scmp.ge.s32.totalorder %s11_s6, 4  }
 0xa1b   :  { %10 = sbr.rel (!%p8_p4) target bundleno = 1 (0x1), region = 54 }

// kernel: mae_forward.35
= control target key start
LH: loop header
LB: loop body
LE: loop exit
PB: predicated region body
PF: predicated region fallthrough
CT: control target
= control target key end

     0   :  { %v267_v0 = vmov 0.0   ;;  %vm268_vm0 = vmmov 0   ;;  %vm176_vm1 = vcmask 261120   ;;  %vm181_vm2 = vcmask 254976   ;;  %s367_s1 = inlined_call_operand.vmem [shape: bf16[128,32], index: 1, kind: input, shape index: {}]   ;;  %s368_s0 = inlined_call_operand.vmem [shape: bf16[34,128], index: 0, kind: input, shape index: {}]   ;;  %s369_s2 = inlined_call_operand.vmem [shape: f32[1,32], index: 2, kind: input, shape index: {}]   ;;  %s370_s3 = inlined_call_operand.vmem [shape: f32[34,32], index: 3, kind: input, shape index: {}]   ;;  %s371_s4 = inlined_call_operand.vmem [shape: f32[34,32], index: 4, kind: output, shape index: {}]  }
   0x1   :  { %210 = vmatprep.subr.bf16.mxu0 %v267_v0  ;;  %238 = vmatprep.subr.bf16.mxu1 %v267_v0  ;;  %v256_v1 = vld [vmem:[%s367_s1 + $0x38] sm:$0xff]   ;;  %v257_v2 = vld [vmem:[%s367_s1 + $0x30] sm:$0xff]   ;;  %v258_v3 = vld [vmem:[%s367_s1 + $0x28] sm:$0xff]  }
   0x2   :  { %226 = vmatprep.mubr.msk.bf16.mxu0 %vm268_vm0, %v267_v0  ;;  %230 = vmatprep.mubr.msk.bf16.mxu1 %vm268_vm0, %v267_v0  ;;  %v259_v4 = vld [vmem:[%s367_s1 + $0x20] sm:$0xff]   ;;  %v260_v5 = vld [vmem:[%s367_s1 + $0x18] sm:$0xff]   ;;  %v261_v6 = vld [vmem:[%s367_s1 + $0x10] sm:$0xff]  }
   0x3   :  { %211 = vmatpush3.bf16.msra.mxu0 %v256_v1  ;;  %246 = vmatpush3.bf16.msra.mxu1 %v256_v1  ;;  %v262_v7 = vld [vmem:[%s367_s1 + $0x8] sm:$0xff]   ;;  %v263_v8 = vld [vmem:[%s367_s1] sm:$0xff]   ;;  %v266_v11 = vld [vmem:[%s368_s0 + $0x10] ss:$0 sps:$4 sm:$0x11]  }
   0x4   :  { %212 = vmatprep.subr.bf16.mxu0 %v267_v0  ;;  %239 = vmatprep.subr.bf16.mxu1 %v267_v0  ;;  %v264_v9 = vld [vmem:[%s368_s0] sm:$0xff]   ;;  %v265_v10 = vld [vmem:[%s368_s0 + $0x8] sm:$0xff]   ;;  %v168_v16 = vld [vmem:[%s370_s3 + $0x10] sm:$0xff] }
   0x5   :  { %v187_v12 = vld [vmem:[%s369_s2] ss:$0 sm:$0xff]  ;;  %v167_v24 = vld [vmem:[%s370_s3 + $0x8] sm:$0xff]  ;;  %v169_v26 = vld [vmem:[%s370_s3 + $0x18] sm:$0xff] }
   0x6   :  { %v166_v14 = vld [vmem:[%s370_s3] sm:$0xff] }
   0x7   :  { %213 = vmatpush3.bf16.msra.mxu0 %v257_v2  ;;  %247 = vmatpush3.bf16.msra.mxu1 %v257_v2  ;;  %v170_v34 = vld [vmem:[%s370_s3 + $0x20] sm:$0x3] }
   0x8   :  { %214 = vmatprep.subr.bf16.mxu0 %v267_v0  ;;  %240 = vmatprep.subr.bf16.mxu1 %v267_v0 }
   0xb   :  { %215 = vmatpush3.bf16.msra.mxu0 %v258_v3  ;;  %248 = vmatpush3.bf16.msra.mxu1 %v258_v3 }
   0xc   :  { %216 = vmatprep.subr.bf16.mxu0 %v267_v0  ;;  %241 = vmatprep.subr.bf16.mxu1 %v267_v0 }
   0xf   :  { %217 = vmatpush3.bf16.msra.mxu0 %v259_v4  ;;  %249 = vmatpush3.bf16.msra.mxu1 %v259_v4 }
  0x10   :  { %218 = vmatprep.subr.bf16.mxu0 %v267_v0  ;;  %242 = vmatprep.subr.bf16.mxu1 %v267_v0 }
  0x13   :  { %219 = vmatpush3.bf16.msra.mxu0 %v260_v5  ;;  %250 = vmatpush3.bf16.msra.mxu1 %v260_v5 }
  0x14   :  { %220 = vmatprep.subr.bf16.mxu0 %v267_v0  ;;  %243 = vmatprep.subr.bf16.mxu1 %v267_v0 }
  0x17   :  { %221 = vmatpush3.bf16.msra.mxu0 %v261_v6  ;;  %251 = vmatpush3.bf16.msra.mxu1 %v261_v6 }
  0x18   :  { %222 = vmatprep.subr.bf16.mxu0 %v267_v0  ;;  %244 = vmatprep.subr.bf16.mxu1 %v267_v0 }
  0x1b   :  { %223 = vmatpush3.bf16.msra.mxu0 %v262_v7  ;;  %252 = vmatpush3.bf16.msra.mxu1 %v262_v7 }
  0x1c   :  { %224 = vmatprep.subr.bf16.mxu0 %v267_v0  ;;  %245 = vmatprep.subr.bf16.mxu1 %v267_v0 }
  0x1f   :  { %225 = vmatpush3.bf16.msra.mxu0 %v263_v8  ;;  %253 = vmatpush3.bf16.msra.mxu1 %v263_v8 }
  0x22   :  { %227 = vmatmul.mubr.bf16.vlgmr.msra.gmra.mxu0 %v264_v9  ;;  %231 = vmatmul.mubr.bf16.vlgmr.msra.gmra.mxu1 %v265_v10 }
  0x23   :  { %234 = vmatprep.mubr.msk.bf16.mxu1 %vm268_vm0, %v267_v0 }
  0x2a   :  { %235 = vmatmul.mubr.bf16.gmra.mxu1 %v266_v11 }
  0xe2   :  { %v144_v13 = vpop.f32.mrf.mxu0  ;;  %v152_v15 = vpop.f32.mrf.mxu1 }
  0xe3   :  { %v145_v17 = vadd.f32 %v187_v12, %v144_v13  ;;  %v153_v18 = vadd.f32 %v187_v12, %v152_v15 }
  0xe4   :  { %v228_v19 = vpop.f32.mrf.mxu0  ;;  %v232_v20 = vpop.f32.mrf.mxu1 }
  0xe5   :  { %v171_v21 = vadd.f32 %v166_v14, %v145_v17  ;;  %v173_v22 = vadd.f32 %v168_v16, %v153_v18 }
  0xe6   :  { %v147_v23 = vpop.f32.mrf.mxu0  ;;  %v155_v25 = vpop.f32.mrf.mxu1 }
  0xe7   :  { %177 = vst.msk [vmem:[%s371_s4] sm:$0xff] %vm176_vm1, %v171_v21  ;;  %179 = vst.msk [vmem:[%s371_s4 + $0x10] sm:$0xff] %vm176_vm1, %v173_v22  ;;  %v148_v27 = vadd.f32 %v187_v12, %v147_v23  ;;  %v156_v28 = vadd.f32 %v187_v12, %v155_v25 }
  0xe8   :  { %v229_v29 = vpop.f32.mrf.mxu0  ;;  %v233_v30 = vpop.f32.mrf.mxu1 }
  0xe9   :  { %v172_v31 = vadd.f32 %v167_v24, %v148_v27  ;;  %v174_v32 = vadd.f32 %v169_v26, %v156_v28 }
  0xea   :  { %v160_v33 = vpop.f32.mrf.mxu1 }
  0xeb   :  { %178 = vst.msk [vmem:[%s371_s4 + $0x8] sm:$0xff] %vm176_vm1, %v172_v31  ;;  %180 = vst.msk [vmem:[%s371_s4 + $0x18] sm:$0xff] %vm176_vm1, %v174_v32  ;;  %v161_v35 = vadd.f32 %v187_v12, %v160_v33 }
  0xec   :  { %v236_v36 = vpop.f32.mrf.mxu1 }
  0xed   :  { %v175_v37 = vadd.f32 %v170_v34, %v161_v35 }
  0xee   :  { %v163_v38 = vpop.f32.mrf.mxu1 }
  0xef   :  { %182 = vst.msk [vmem:[%s371_s4 + $0x20] sm:$0x3] %vm181_vm2, %v175_v37 }
  0xf0   :  { %v237_v39 = vpop.f32.mrf.mxu1 }

// kernel: mae_forward.34
= control target key start
LH: loop header
LB: loop body
LE: loop exit
PB: predicated region body
PF: predicated region fallthrough
CT: control target
= control target key end

     0   :  { %vm26_vm0 = vcmask 261120   ;;  %vm39_vm1 = vcmask 254976   ;;  %v463_v35 = vmov 0.0   ;;  %vm464_vm2 = vmmov 0   ;;  %s606_s0 = inlined_call_operand.vmem [shape: f32[34,32], index: 0, kind: input, shape index: {}]   ;;  %s607_s1 = inlined_call_operand.vmem [shape: bf16[32,128], index: 1, kind: input, shape index: {}]   ;;  %s608_s3 = inlined_call_operand.vmem [shape: f32[1,32], index: 3, kind: input, shape index: {}]   ;;  %s609_s4 = inlined_call_operand.vmem [shape: f32[1,32], index: 4, kind: input, shape index: {}]   ;;  %s610_s2 = inlined_call_operand.vmem [shape: f32[1,128], index: 2, kind: input, shape index: {}]   ;;  %s611_s5 = inlined_call_operand.vmem [shape: bf16[34,128], index: 5, kind: output, shape index: {}]  }
   0x1   :  { %v23_v0 = vld [vmem:[%s606_s0 + $0x10] sm:$0xff]  ;;  %v24_v1 = vld [vmem:[%s606_s0 + $0x18] sm:$0xff]  ;;  %v21_v2 = vld [vmem:[%s606_s0] sm:$0xff]  ;;  %424 = vmatprep.subr.bf16.mxu1 %v463_v35  ;;  %408 = vmatprep.subr.bf16.mxu0 %v463_v35 }
   0x2   :  { %v33_v3 = vsel %vm26_vm0, %v23_v0, 0.0  ;;  %v27_v4 = vsel %vm26_vm0, %v21_v2, 0.0  ;;  %v22_v5 = vld [vmem:[%s606_s0 + $0x8] sm:$0xff]  ;;  %v36_v6 = vsel %vm26_vm0, %v24_v1, 0.0  ;;  %v25_v8 = vld [vmem:[%s606_s0 + $0x20] sm:$0x3]  ;;  %416 = vmatprep.mubr.msk.bf16.mxu1 %vm464_vm2, %v463_v35  ;;  %412 = vmatprep.mubr.msk.bf16.mxu0 %vm464_vm2, %v463_v35 }
   0x3   :  { %34 = vadd.xlane.f32.xlu0 %v33_v3  ;;  %28 = vadd.xlane.f32.xlu1 %v27_v4  ;;  %v30_v7 = vsel %vm26_vm0, %v22_v5, 0.0  ;;  %v40_v9 = vsel %vm39_vm1, %v25_v8, 0.0  ;;  %v431_v36 = vld [vmem:[%s607_s1 + $0x8] sm:$0xff]   ;;  %v432_v37 = vld [vmem:[%s607_s1] sm:$0xff]  }
   0x4   :  { %426 = vmatpush3.bf16.msra.mxu1 %v431_v36  ;;  %409 = vmatpush3.bf16.msra.mxu0 %v431_v36  ;;  %v374_v55 = vld [vmem:[%s608_s3] ss:$0 sm:$0xff] }
   0x5   :  { %425 = vmatprep.subr.bf16.mxu1 %v463_v35  ;;  %410 = vmatprep.subr.bf16.mxu0 %v463_v35  ;;  %v375_v60 = vld [vmem:[%s609_s4] ss:$0 sm:$0xff] }
   0x7   :  { %37 = vadd.xlane.f32.xlu0 %v36_v6  ;;  %31 = vadd.xlane.f32.xlu1 %v30_v7 }
   0x8   :  { %427 = vmatpush3.bf16.msra.mxu1 %v432_v37  ;;  %411 = vmatpush3.bf16.msra.mxu0 %v432_v37 }
   0xb   :  { %41 = vadd.xlane.f32.xlu0 %v40_v9 }
  0x8c   :  { %v35_v10 = vpop.xlane.xlu0 %34  ;;  %v29_v11 = vpop.xlane.xlu1 %28 }
  0x8d   :  { %v46_v12 = vmul.f32 0.03125, %v35_v10  ;;  %v44_v13 = vmul.f32 0.03125, %v29_v11 }
  0x8f   :  { %v516_v14 = vsub.f32 %v23_v0, %v46_v12  ;;  %v518_v15 = vsub.f32 %v21_v2, %v44_v13 }
  0x90   :  { %v38_v16 = vpop.xlane.xlu0 %37  ;;  %v32_v17 = vpop.xlane.xlu1 %31 }
  0x91   :  { %v47_v18 = vmul.f32 0.03125, %v38_v16  ;;  %v56_v19 = vmul.f32 %v516_v14, %v516_v14  ;;  %v45_v20 = vmul.f32 0.03125, %v32_v17  ;;  %v54_v21 = vmul.f32 %v518_v15, %v518_v15 }
  0x93   :  { %v52_v22 = vsub.f32 %v24_v1, %v47_v18  ;;  %v65_v23 = vsel %vm26_vm0, %v56_v19, 0.0  ;;  %v525_v24 = vsub.f32 %v22_v5, %v45_v20  ;;  %v59_v28 = vsel %vm26_vm0, %v54_v21, 0.0 }
  0x94   :  { %v42_v25 = vpop.xlane.xlu0 %41  ;;  %66 = vadd.xlane.f32.xlu1 %v65_v23 }
  0x95   :  { %v48_v26 = vmul.f32 0.03125, %v42_v25  ;;  %v57_v27 = vmul.f32 %v52_v22, %v52_v22  ;;  %v55_v29 = vmul.f32 %v525_v24, %v525_v24 }
  0x97   :  { %v53_v30 = vsub.f32 %v25_v8, %v48_v26  ;;  %v68_v31 = vsel %vm26_vm0, %v57_v27, 0.0  ;;  %v62_v33 = vsel %vm26_vm0, %v55_v29, 0.0 }
  0x98   :  { %69 = vadd.xlane.f32.xlu0 %v68_v31  ;;  %60 = vadd.xlane.f32.xlu1 %v59_v28 }
  0x99   :  { %v58_v32 = vmul.f32 %v53_v30, %v53_v30 }
  0x9b   :  { %v71_v34 = vsel %vm39_vm1, %v58_v32, 0.0 }
  0x9c   :  { %72 = vadd.xlane.f32.xlu1 %v71_v34  ;;  %63 = vadd.xlane.f32.xlu0 %v62_v33 }
 0x11d   :  { %v67_v38 = vpop.xlane.xlu1 %66 }
 0x11e   :  { %v76_v39 = vmul.f32 0.03125, %v67_v38 }
 0x120   :  { %v81_v40 = vadd.f32 1e-06, %v76_v39 }
 0x121   :  { %v70_v41 = vpop.xlane.xlu0 %69  ;;  %v61_v42 = vpop.xlane.xlu1 %60 }
 0x122   :  { %433 = vrsqrt.f32 %v81_v40  ;;  %v77_v43 = vmul.f32 0.03125, %v70_v41  ;;  %v74_v44 = vmul.f32 0.03125, %v61_v42 }
 0x124   :  { %v82_v45 = vadd.f32 1e-06, %v77_v43  ;;  %v79_v46 = vadd.f32 1e-06, %v74_v44 }
 0x125   :  { %v64_v47 = vpop.xlane.xlu0 %63  ;;  %v73_v48 = vpop.xlane.xlu1 %72 }
 0x126   :  { %435 = vrsqrt.f32 %v82_v45  ;;  %v75_v49 = vmul.f32 0.03125, %v64_v47  ;;  %v78_v50 = vmul.f32 0.03125, %v73_v48 }
 0x127   :  { %437 = vrsqrt.f32 %v79_v46 }
 0x128   :  { %v80_v51 = vadd.f32 1e-06, %v75_v49  ;;  %v83_v52 = vadd.f32 1e-06, %v78_v50 }
 0x12a   :  { %439 = vrsqrt.f32 %v80_v51 }
 0x12b   :  { %441 = vrsqrt.f32 %v83_v52 }
 0x12f   :  { %v434_v53 = vpop.eup %433 }
 0x130   :  { %v91_v54 = vmul.f32 %v434_v53, %v516_v14  ;;  %v376_v14 = vld [vmem:[%s610_s2] ss:$0 sm:$0xff] }
 0x132   :  { %v103_v59 = vmul.f32 %v374_v55, %v91_v54 }
 0x133   :  { %v436_v56 = vpop.eup %435 }
 0x134   :  { %v438_v57 = vpop.eup %437  ;;  %v92_v58 = vmul.f32 %v436_v56, %v52_v22  ;;  %v115_v1 = vadd.f32 %v375_v60, %v103_v59 }
 0x135   :  { %v89_v61 = vmul.f32 %v438_v57, %v518_v15 }
 0x136   :  { %v104_v62 = vmul.f32 %v374_v55, %v92_v58 }
 0x137   :  { %v440_v63 = vpop.eup %439  ;;  %v101_v4 = vmul.f32 %v374_v55, %v89_v61 }
 0x138   :  { %v442_v0 = vpop.eup %441  ;;  %v116_v2 = vadd.f32 %v375_v60, %v104_v62  ;;  %v90_v3 = vmul.f32 %v440_v63, %v525_v24 }
 0x139   :  { %v93_v5 = vmul.f32 %v442_v0, %v53_v30  ;;  %v113_v9 = vadd.f32 %v375_v60, %v101_v4 }
 0x13a   :  { %v119_v6 = vpack.c.bf16 %v116_v2, %v115_v1  ;;  %v102_v7 = vmul.f32 %v374_v55, %v90_v3 }
 0x13b   :  { %v105_v8 = vmul.f32 %v374_v55, %v93_v5 }
 0x13c   :  { %417 = vmatmul.mubr.msk.bf16.vlgmr.msra.gmra.mxu1 %vm26_vm0, %v119_v6  ;;  %v114_v10 = vadd.f32 %v375_v60, %v102_v7 }
 0x13d   :  { %420 = vmatprep.mubr.msk.bf16.mxu1 %vm464_vm2, %v463_v35  ;;  %v117_v12 = vadd.f32 %v375_v60, %v105_v8 }
 0x13e   :  { %v118_v11 = vpack.c.bf16 %v114_v10, %v113_v9 }
 0x13f   :  { %v120_v13 = vpack.c.bf16 %v117_v12, %v117_v12 }
 0x140   :  { %413 = vmatmul.mubr.msk.bf16.vlgmr.msra.gmra.mxu0 %vm26_vm0, %v118_v11 }
 0x144   :  { %421 = vmatmul.mubr.msk.bf16.gmra.mxu1 %vm26_vm0, %v120_v13 }
 0x1fc   :  { %v195_v15 = vpop.f32.mrf.mxu1 }
 0x1fd   :  { %v557_v16 = vadd.f32 %v376_v14, %v195_v15 }
 0x1fe   :  { %v418_v17 = vpop.f32.mrf.mxu1 }
 0x1ff   :  { %v560_v18 = vmul.f32 0.70710677, %v557_v16 }
 0x200   :  { %v187_v19 = vpop.f32.mrf.mxu0  ;;  %v198_v20 = vpop.f32.mrf.mxu1 }
 0x201   :  { %v231_v21 = vand.u32 2147483647, %v560_v18  ;;  %v563_v22 = vadd.f32 %v376_v14, %v187_v19  ;;  %v565_v23 = vadd.f32 %v376_v14, %v198_v20  ;;  %vm221_vm3 = vcmp.lt.f32.partialorder %v560_v18, 0.0 }
 0x202   :  { %v414_v24 = vpop.f32.mrf.mxu0  ;;  %v419_v25 = vpop.f32.mrf.mxu1 }
 0x203   :  { %v236_v26 = vmul.f32 0.3275911, %v231_v21  ;;  %v568_v27 = vmul.f32 0.70710677, %v563_v22  ;;  %v571_v28 = vmul.f32 0.70710677, %v565_v23 }
 0x204   :  { %v190_v29 = vpop.f32.mrf.mxu0  ;;  %v203_v30 = vpop.f32.mrf.mxu1  ;;  %v301_v46 = vsub.f32 0.0, %v231_v21 }
 0x205   :  { %v241_v31 = vadd.f32 1.0, %v236_v26  ;;  %v229_v32 = vand.u32 2147483647, %v568_v27  ;;  %v232_v33 = vand.u32 2147483647, %v571_v28  ;;  %v575_v34 = vadd.f32 %v376_v14, %v190_v29 }
 0x206   :  { %v415_v35 = vpop.f32.mrf.mxu0  ;;  %v422_v36 = vpop.f32.mrf.mxu1  ;;  %v580_v43 = vadd.f32 %v376_v14, %v203_v30  ;;  %v306_v51 = vmul.f32 %v301_v46, %v231_v21  ;;  %vm222_vm4 = vcmp.lt.f32.partialorder %v571_v28, 0.0  ;;  %vm219_vm5 = vcmp.lt.f32.partialorder %v568_v27, 0.0 }
 0x207   :  { %443 = vrcp.f32 %v241_v31  ;;  %v234_v37 = vmul.f32 0.3275911, %v229_v32  ;;  %v237_v38 = vmul.f32 0.3275911, %v232_v33  ;;  %v578_v41 = vmul.f32 0.70710677, %v575_v34 }
 0x208   :  { %v206_v39 = vpop.f32.mrf.mxu1  ;;  %v584_v48 = vmul.f32 0.70710677, %v580_v43  ;;  %v299_v52 = vsub.f32 0.0, %v229_v32  ;;  %v302_v54 = vsub.f32 0.0, %v232_v33  ;;  %v313_v58 = vmul.f32 1.442695, %v306_v51 }
 0x209   :  { %v239_v40 = vadd.f32 1.0, %v234_v37  ;;  %v242_v42 = vadd.f32 1.0, %v237_v38  ;;  %v230_v45 = vand.u32 2147483647, %v578_v41  ;;  %vm220_vm6 = vcmp.lt.f32.partialorder %v578_v41, 0.0 }
 0x20a   :  { %v423_v44 = vpop.f32.mrf.mxu1  ;;  %v233_v50 = vand.u32 2147483647, %v584_v48  ;;  %v304_v59 = vmul.f32 %v299_v52, %v229_v32  ;;  %v307_v60 = vmul.f32 %v302_v54, %v232_v33  ;;  %v211_v28 = vmul.f32 0.5, %v557_v16 }
 0x20b   :  { %445 = vrcp.f32 %v239_v40  ;;  %v235_v47 = vmul.f32 0.3275911, %v230_v45  ;;  %v300_v61 = vsub.f32 0.0, %v230_v45  ;;  %v212_v27 = vmul.f32 0.5, %v565_v23 }
 0x20c   :  { %447 = vrcp.f32 %v242_v42  ;;  %v238_v53 = vmul.f32 0.3275911, %v233_v50  ;;  %v309_v3 = vmul.f32 1.442695, %v304_v59  ;;  %v315_v5 = vmul.f32 1.442695, %v307_v60 }
 0x20d   :  { %v240_v49 = vadd.f32 1.0, %v235_v47  ;;  %v305_v6 = vmul.f32 %v300_v61, %v230_v45  ;;  %v303_v7 = vsub.f32 0.0, %v233_v50  ;;  %v465_v60 = vmov 1.0  }
 0x20e   :  { %v243_v55 = vadd.f32 1.0, %v238_v53  ;;  %v226_v61 = vsel %vm221_vm3, -1.0, %v465_v60  ;;  %vm223_vm7 = vcmp.lt.f32.partialorder %v584_v48, 0.0  ;;  %v209_v41 = vmul.f32 0.5, %v563_v22 }
 0x20f   :  { %449 = vrcp.f32 %v240_v49  ;;  %v311_v15 = vmul.f32 1.442695, %v305_v6  ;;  %v308_v17 = vmul.f32 %v303_v7, %v233_v50  ;;  %v228_v23 = vsel %vm223_vm7, -1.0, %v465_v60 }
 0x210   :  { %451 = vrcp.f32 %v243_v55 }
 0x211   :  { %453 = vpow2.f32 %v313_v58  ;;  %v317_v32 = vmul.f32 1.442695, %v308_v17 }
 0x212   :  { %455 = vpow2.f32 %v309_v3 }
 0x213   :  { %457 = vpow2.f32 %v315_v5 }
 0x214   :  { %v444_v56 = vpop.eup %443  ;;  %459 = vpow2.f32 %v311_v15 }
 0x215   :  { %v256_v57 = vmul.f32 1.0614054, %v444_v56  ;;  %461 = vpow2.f32 %v317_v32 }
 0x217   :  { %v261_v62 = vadd.f32 -1.4531521, %v256_v57 }
 0x218   :  { %v446_v63 = vpop.eup %445 }
 0x219   :  { %v448_v0 = vpop.eup %447  ;;  %v266_v1 = vmul.f32 %v444_v56, %v261_v62  ;;  %v254_v2 = vmul.f32 1.0614054, %v446_v63 }
 0x21a   :  { %v257_v4 = vmul.f32 1.0614054, %v448_v0 }
 0x21b   :  { %v271_v8 = vadd.f32 1.4214138, %v266_v1  ;;  %v259_v9 = vadd.f32 -1.4531521, %v254_v2 }
 0x21c   :  { %v262_v10 = vadd.f32 -1.4531521, %v257_v4  ;;  %v450_v13 = vpop.eup %449 }
 0x21d   :  { %v276_v11 = vmul.f32 %v444_v56, %v271_v8  ;;  %v264_v12 = vmul.f32 %v446_v63, %v259_v9  ;;  %v255_v21 = vmul.f32 1.0614054, %v450_v13  ;;  %v452_v30 = vpop.eup %451  ;;  %v227_v8 = vsel %vm222_vm4, -1.0, %v465_v60 }
 0x21e   :  { %v267_v14 = vmul.f32 %v448_v0, %v262_v10  ;;  %v258_v37 = vmul.f32 1.0614054, %v452_v30  ;;  %v454_v45 = vpop.eup %453 }
 0x21f   :  { %v281_v19 = vadd.f32 -0.28449672, %v276_v11  ;;  %v269_v20 = vadd.f32 1.4214138, %v264_v12  ;;  %v260_v29 = vadd.f32 -1.4531521, %v255_v21  ;;  %v456_v58 = vpop.eup %455 }
 0x220   :  { %v272_v24 = vadd.f32 1.4214138, %v267_v14  ;;  %v263_v44 = vadd.f32 -1.4531521, %v258_v37  ;;  %v224_v11 = vsel %vm219_vm5, -1.0, %v465_v60 }
 0x221   :  { %v286_v25 = vmul.f32 %v444_v56, %v281_v19  ;;  %v274_v26 = vmul.f32 %v446_v63, %v269_v20  ;;  %v265_v36 = vmul.f32 %v450_v13, %v260_v29 }
 0x222   :  { %v277_v31 = vmul.f32 %v448_v0, %v272_v24  ;;  %v268_v51 = vmul.f32 %v452_v30, %v263_v44 }
 0x223   :  { %v291_v33 = vadd.f32 0.2548296, %v286_v25  ;;  %v279_v35 = vadd.f32 -0.28449672, %v274_v26  ;;  %v270_v42 = vadd.f32 1.4214138, %v265_v36 }
 0x224   :  { %v282_v38 = vadd.f32 -0.28449672, %v277_v31  ;;  %v273_v57 = vadd.f32 1.4214138, %v268_v51 }
 0x225   :  { %v296_v39 = vmul.f32 %v444_v56, %v291_v33  ;;  %v284_v40 = vmul.f32 %v446_v63, %v279_v35  ;;  %v275_v50 = vmul.f32 %v450_v13, %v270_v42  ;;  %v458_v56 = vpop.eup %457  ;;  %v210_v35 = vmul.f32 0.5, %v575_v34 }
 0x226   :  { %v287_v46 = vmul.f32 %v448_v0, %v282_v38  ;;  %v278_v2 = vmul.f32 %v452_v30, %v273_v57  ;;  %v460_v7 = vpop.eup %459 }
 0x227   :  { %v321_v47 = vmul.f32 %v454_v45, %v296_v39  ;;  %v289_v49 = vadd.f32 0.2548296, %v284_v40  ;;  %v280_v55 = vadd.f32 -0.28449672, %v275_v50  ;;  %v462_v20 = vpop.eup %461  ;;  %v213_v40 = vmul.f32 0.5, %v580_v43 }
 0x228   :  { %v292_v52 = vadd.f32 0.2548296, %v287_v46  ;;  %v283_v6 = vadd.f32 -0.28449672, %v278_v2 }
 0x229   :  { %v326_v53 = vsub.f32 1.0, %v321_v47  ;;  %v294_v54 = vmul.f32 %v446_v63, %v289_v49  ;;  %v285_v1 = vmul.f32 %v450_v13, %v280_v55 }
 0x22a   :  { %v297_v59 = vmul.f32 %v448_v0, %v292_v52  ;;  %v288_v0 = vmul.f32 %v452_v30, %v283_v6 }
 0x22b   :  { %v319_v62 = vmul.f32 %v456_v58, %v294_v54  ;;  %v331_v3 = vmul.f32 %v326_v53, %v226_v61  ;;  %v290_v5 = vadd.f32 0.2548296, %v285_v1 }
 0x22c   :  { %v322_v4 = vmul.f32 %v458_v56, %v297_v59  ;;  %v293_v17 = vadd.f32 0.2548296, %v288_v0 }
 0x22d   :  { %v324_v18 = vsub.f32 1.0, %v319_v62  ;;  %v295_v9 = vmul.f32 %v450_v13, %v290_v5  ;;  %v336_v10 = vadd.f32 1.0, %v331_v3  ;;  %v225_v13 = vsel %vm220_vm6, -1.0, %v465_v60 }
 0x22e   :  { %v327_v63 = vsub.f32 1.0, %v322_v4  ;;  %v298_v24 = vmul.f32 %v452_v30, %v293_v17 }
 0x22f   :  { %v329_v14 = vmul.f32 %v324_v18, %v224_v11  ;;  %v320_v15 = vmul.f32 %v460_v7, %v295_v9  ;;  %v341_v25 = vmul.f32 %v336_v10, %v211_v28 }
 0x230   :  { %v332_v12 = vmul.f32 %v327_v63, %v227_v8  ;;  %v323_v32 = vmul.f32 %v462_v20, %v298_v24 }
 0x231   :  { %v325_v21 = vsub.f32 1.0, %v320_v15  ;;  %v334_v29 = vadd.f32 1.0, %v329_v14 }
 0x232   :  { %v337_v19 = vadd.f32 1.0, %v332_v12  ;;  %v328_v36 = vsub.f32 1.0, %v323_v32 }
 0x233   :  { %v330_v31 = vmul.f32 %v325_v21, %v225_v13  ;;  %v339_v30 = vmul.f32 %v334_v29, %v209_v41 }
 0x234   :  { %v342_v26 = vmul.f32 %v337_v19, %v212_v27  ;;  %v333_v38 = vmul.f32 %v328_v36, %v228_v23 }
 0x235   :  { %v335_v16 = vadd.f32 1.0, %v330_v31 }
 0x236   :  { %v400_v33 = vpack.c.bf16 %v342_v26, %v341_v25  ;;  %v338_v48 = vadd.f32 1.0, %v333_v38 }
 0x237   :  { %v340_v37 = vmul.f32 %v335_v16, %v210_v35 }
 0x238   :  { %402 = vst [vmem:[%s611_s5 + $0x8] sm:$0xff] %v400_v33   ;;  %v343_v22 = vmul.f32 %v338_v48, %v213_v40 }
 0x239   :  { %v395_v39 = vpack.c.bf16 %v340_v37, %v339_v30 }
 0x23a   :  { %v391_v34 = vpack.c.bf16 %v343_v22, %v343_v22 }
 0x23b   :  { %396 = vst [vmem:[%s611_s5] sm:$0xff] %v395_v39  }
 0x23c   :  { %369 = vst [vmem:[%s611_s5 + $0x10] sm:$0x1] %v391_v34 }

// kernel: mae_forward.36
= control target key start
LH: loop header
LB: loop body
LE: loop exit
PB: predicated region body
PF: predicated region fallthrough
CT: control target
= control target key end

     0   :  { %vm26_vm0 = vcmask 261120   ;;  %vm39_vm1 = vcmask 254976   ;;  %v267_v35 = vmov 0.0   ;;  %vm268_vm2 = vmmov 0   ;;  %s379_s0 = inlined_call_operand.vmem [shape: f32[34,32], index: 0, kind: input, shape index: {}]   ;;  %s380_s1 = inlined_call_operand.vmem [shape: bf16[32,48], index: 1, kind: input, shape index: {}]   ;;  %s381_s3 = inlined_call_operand.vmem [shape: f32[1,32], index: 3, kind: input, shape index: {}]   ;;  %s382_s4 = inlined_call_operand.vmem [shape: f32[1,32], index: 4, kind: input, shape index: {}]   ;;  %s383_s2 = inlined_call_operand.vmem [shape: f32[1,48], index: 2, kind: input, shape index: {}]   ;;  %s384_s5 = inlined_call_operand.vmem [shape: f32[34,48], index: 5, kind: output, shape index: {}]  }
   0x1   :  { %v23_v0 = vld [vmem:[%s379_s0 + $0x10] sm:$0xff]  ;;  %v24_v1 = vld [vmem:[%s379_s0 + $0x18] sm:$0xff]  ;;  %v21_v2 = vld [vmem:[%s379_s0] sm:$0xff]  ;;  %249 = vmatprep.subr.bf16.mxu1 %v267_v35  ;;  %233 = vmatprep.subr.bf16.mxu0 %v267_v35  ;;  %vm209_vm3 = vcmask 392192   ;;  %vm214_vm4 = vcmask 386048  }
   0x2   :  { %v33_v3 = vsel %vm26_vm0, %v23_v0, 0.0  ;;  %v27_v4 = vsel %vm26_vm0, %v21_v2, 0.0  ;;  %v22_v5 = vld [vmem:[%s379_s0 + $0x8] sm:$0xff]  ;;  %v36_v6 = vsel %vm26_vm0, %v24_v1, 0.0  ;;  %v25_v8 = vld [vmem:[%s379_s0 + $0x20] sm:$0x3]  ;;  %241 = vmatprep.mubr.msk.bf16.mxu1 %vm268_vm2, %v267_v35  ;;  %237 = vmatprep.mubr.msk.bf16.mxu0 %vm268_vm2, %v267_v35 }
   0x3   :  { %34 = vadd.xlane.f32.xlu0 %v33_v3  ;;  %28 = vadd.xlane.f32.xlu1 %v27_v4  ;;  %v30_v7 = vsel %vm26_vm0, %v22_v5, 0.0  ;;  %v40_v9 = vsel %vm39_vm1, %v25_v8, 0.0  ;;  %v255_v36 = vld [vmem:[%s380_s1 + $0x8] sm:$0xff]   ;;  %v256_v37 = vld [vmem:[%s380_s1] sm:$0xff]  }
   0x4   :  { %251 = vmatpush3.bf16.msra.mxu1 %v255_v36  ;;  %234 = vmatpush3.bf16.msra.mxu0 %v255_v36  ;;  %v220_v55 = vld [vmem:[%s381_s3] ss:$0 sm:$0xff] }
   0x5   :  { %250 = vmatprep.subr.bf16.mxu1 %v267_v35  ;;  %235 = vmatprep.subr.bf16.mxu0 %v267_v35  ;;  %v221_v60 = vld [vmem:[%s382_s4] ss:$0 sm:$0xff] }
   0x7   :  { %37 = vadd.xlane.f32.xlu0 %v36_v6  ;;  %31 = vadd.xlane.f32.xlu1 %v30_v7 }
   0x8   :  { %252 = vmatpush3.bf16.msra.mxu1 %v256_v37  ;;  %236 = vmatpush3.bf16.msra.mxu0 %v256_v37 }
   0xb   :  { %41 = vadd.xlane.f32.xlu0 %v40_v9 }
  0x8c   :  { %v35_v10 = vpop.xlane.xlu0 %34  ;;  %v29_v11 = vpop.xlane.xlu1 %28 }
  0x8d   :  { %v46_v12 = vmul.f32 0.03125, %v35_v10  ;;  %v44_v13 = vmul.f32 0.03125, %v29_v11 }
  0x8f   :  { %v319_v14 = vsub.f32 %v23_v0, %v46_v12  ;;  %v321_v15 = vsub.f32 %v21_v2, %v44_v13 }
  0x90   :  { %v38_v16 = vpop.xlane.xlu0 %37  ;;  %v32_v17 = vpop.xlane.xlu1 %31 }
  0x91   :  { %v47_v18 = vmul.f32 0.03125, %v38_v16  ;;  %v56_v19 = vmul.f32 %v319_v14, %v319_v14  ;;  %v45_v20 = vmul.f32 0.03125, %v32_v17  ;;  %v54_v21 = vmul.f32 %v321_v15, %v321_v15 }
  0x93   :  { %v52_v22 = vsub.f32 %v24_v1, %v47_v18  ;;  %v65_v23 = vsel %vm26_vm0, %v56_v19, 0.0  ;;  %v328_v24 = vsub.f32 %v22_v5, %v45_v20  ;;  %v59_v28 = vsel %vm26_vm0, %v54_v21, 0.0 }
  0x94   :  { %v42_v25 = vpop.xlane.xlu0 %41  ;;  %66 = vadd.xlane.f32.xlu1 %v65_v23 }
  0x95   :  { %v48_v26 = vmul.f32 0.03125, %v42_v25  ;;  %v57_v27 = vmul.f32 %v52_v22, %v52_v22  ;;  %v55_v29 = vmul.f32 %v328_v24, %v328_v24 }
  0x97   :  { %v53_v30 = vsub.f32 %v25_v8, %v48_v26  ;;  %v68_v31 = vsel %vm26_vm0, %v57_v27, 0.0  ;;  %v62_v33 = vsel %vm26_vm0, %v55_v29, 0.0 }
  0x98   :  { %69 = vadd.xlane.f32.xlu0 %v68_v31  ;;  %60 = vadd.xlane.f32.xlu1 %v59_v28 }
  0x99   :  { %v58_v32 = vmul.f32 %v53_v30, %v53_v30 }
  0x9b   :  { %v71_v34 = vsel %vm39_vm1, %v58_v32, 0.0 }
  0x9c   :  { %72 = vadd.xlane.f32.xlu1 %v71_v34  ;;  %63 = vadd.xlane.f32.xlu0 %v62_v33 }
 0x11d   :  { %v67_v38 = vpop.xlane.xlu1 %66 }
 0x11e   :  { %v76_v39 = vmul.f32 0.03125, %v67_v38 }
 0x120   :  { %v81_v40 = vadd.f32 1e-06, %v76_v39 }
 0x121   :  { %v70_v41 = vpop.xlane.xlu0 %69  ;;  %v61_v42 = vpop.xlane.xlu1 %60 }
 0x122   :  { %257 = vrsqrt.f32 %v81_v40  ;;  %v77_v43 = vmul.f32 0.03125, %v70_v41  ;;  %v74_v44 = vmul.f32 0.03125, %v61_v42 }
 0x124   :  { %v82_v45 = vadd.f32 1e-06, %v77_v43  ;;  %v79_v46 = vadd.f32 1e-06, %v74_v44 }
 0x125   :  { %v64_v47 = vpop.xlane.xlu0 %63  ;;  %v73_v48 = vpop.xlane.xlu1 %72 }
 0x126   :  { %259 = vrsqrt.f32 %v82_v45  ;;  %v75_v49 = vmul.f32 0.03125, %v64_v47  ;;  %v78_v50 = vmul.f32 0.03125, %v73_v48 }
 0x127   :  { %261 = vrsqrt.f32 %v79_v46 }
 0x128   :  { %v80_v51 = vadd.f32 1e-06, %v75_v49  ;;  %v83_v52 = vadd.f32 1e-06, %v78_v50 }
 0x12a   :  { %263 = vrsqrt.f32 %v80_v51 }
 0x12b   :  { %265 = vrsqrt.f32 %v83_v52 }
 0x12f   :  { %v258_v53 = vpop.eup %257 }
 0x130   :  { %v91_v54 = vmul.f32 %v258_v53, %v319_v14  ;;  %v222_v14 = vld [vmem:[%s383_s2] ss:$0 sm:$0xff] }
 0x132   :  { %v103_v59 = vmul.f32 %v220_v55, %v91_v54 }
 0x133   :  { %v260_v56 = vpop.eup %259 }
 0x134   :  { %v262_v57 = vpop.eup %261  ;;  %v92_v58 = vmul.f32 %v260_v56, %v52_v22  ;;  %v115_v1 = vadd.f32 %v221_v60, %v103_v59 }
 0x135   :  { %v89_v61 = vmul.f32 %v262_v57, %v321_v15 }
 0x136   :  { %v104_v62 = vmul.f32 %v220_v55, %v92_v58 }
 0x137   :  { %v264_v63 = vpop.eup %263  ;;  %v101_v4 = vmul.f32 %v220_v55, %v89_v61 }
 0x138   :  { %v266_v0 = vpop.eup %265  ;;  %v116_v2 = vadd.f32 %v221_v60, %v104_v62  ;;  %v90_v3 = vmul.f32 %v264_v63, %v328_v24 }
 0x139   :  { %v93_v5 = vmul.f32 %v266_v0, %v53_v30  ;;  %v113_v9 = vadd.f32 %v221_v60, %v101_v4 }
 0x13a   :  { %v119_v6 = vpack.c.bf16 %v116_v2, %v115_v1  ;;  %v102_v7 = vmul.f32 %v220_v55, %v90_v3 }
 0x13b   :  { %v105_v8 = vmul.f32 %v220_v55, %v93_v5 }
 0x13c   :  { %242 = vmatmul.mubr.msk.bf16.vlgmr.msra.gmra.mxu1 %vm26_vm0, %v119_v6  ;;  %v114_v10 = vadd.f32 %v221_v60, %v102_v7 }
 0x13d   :  { %245 = vmatprep.mubr.msk.bf16.mxu1 %vm268_vm2, %v267_v35  ;;  %v117_v12 = vadd.f32 %v221_v60, %v105_v8 }
 0x13e   :  { %v118_v11 = vpack.c.bf16 %v114_v10, %v113_v9 }
 0x13f   :  { %v120_v13 = vpack.c.bf16 %v117_v12, %v117_v12 }
 0x140   :  { %238 = vmatmul.mubr.msk.bf16.vlgmr.msra.gmra.mxu0 %vm26_vm0, %v118_v11 }
 0x144   :  { %246 = vmatmul.mubr.msk.bf16.gmra.mxu1 %vm26_vm0, %v120_v13 }
 0x1fc   :  { %v195_v15 = vpop.f32.mrf.mxu1 }
 0x1fd   :  { %v196_v16 = vadd.f32 %v222_v14, %v195_v15 }
 0x1fe   :  { %v243_v17 = vpop.f32.mrf.mxu1 }
 0x1ff   :  { %212 = vst.msk [vmem:[%s384_s5 + $0x10] sm:$0xff] %vm209_vm3, %v196_v16 }
 0x200   :  { %v187_v18 = vpop.f32.mrf.mxu0  ;;  %v198_v19 = vpop.f32.mrf.mxu1 }
 0x201   :  { %v188_v20 = vadd.f32 %v222_v14, %v187_v18  ;;  %v199_v21 = vadd.f32 %v222_v14, %v198_v19 }
 0x202   :  { %v239_v22 = vpop.f32.mrf.mxu0  ;;  %v244_v23 = vpop.f32.mrf.mxu1 }
 0x203   :  { %210 = vst.msk [vmem:[%s384_s5] sm:$0xff] %vm209_vm3, %v188_v20  ;;  %213 = vst.msk [vmem:[%s384_s5 + $0x18] sm:$0xff] %vm209_vm3, %v199_v21 }
 0x204   :  { %v190_v24 = vpop.f32.mrf.mxu0  ;;  %v203_v25 = vpop.f32.mrf.mxu1 }
 0x205   :  { %v191_v26 = vadd.f32 %v222_v14, %v190_v24  ;;  %v204_v27 = vadd.f32 %v222_v14, %v203_v25 }
 0x206   :  { %v240_v28 = vpop.f32.mrf.mxu0  ;;  %v247_v29 = vpop.f32.mrf.mxu1 }
 0x207   :  { %211 = vst.msk [vmem:[%s384_s5 + $0x8] sm:$0xff] %vm209_vm3, %v191_v26 }
 0x208   :  { %215 = vst.msk [vmem:[%s384_s5 + $0x20] sm:$0x3] %vm214_vm4, %v204_v27  ;;  %v206_v30 = vpop.f32.mrf.mxu1 }
 0x20a   :  { %v248_v31 = vpop.f32.mrf.mxu1 }

// kernel: mae_forward.37
= control target key start
LH: loop header
LB: loop body
LE: loop exit
PB: predicated region body
PF: predicated region fallthrough
CT: control target
= control target key end

     0   :  { %vm53_vm0 = vcmask 392192   ;;  %s259_s0 = inlined_call_operand.vmem [shape: f32[32,48], index: 0, kind: input, shape index: {}]   ;;  %s260_s1 = inlined_call_operand.vmem [shape: f32[32,48], index: 1, kind: input, shape index: {}]   ;;  %s261_s2 = inlined_call_operand.vmem [shape: f32[32,1], index: 2, kind: input, shape index: {}]   ;;  %s262_s3 = inlined_call_operand.hbm [shape: f32[1,1], index: 3, kind: output, shape index: {}]  }
   0x1   :  { %v37_v0 = vld [vmem:[%s259_s0] sm:$0xff]  ;;  %v39_v2 = vld [vmem:[%s259_s0 + $0x10] sm:$0xff]  ;;  %v38_v5 = vld [vmem:[%s259_s0 + $0x8] sm:$0xff] }
   0x2   :  { %v41_v1 = vld [vmem:[%s260_s1] sm:$0xff]  ;;  %v43_v4 = vld [vmem:[%s260_s1 + $0x10] sm:$0xff]  ;;  %v42_v6 = vld [vmem:[%s260_s1 + $0x8] sm:$0xff] }
   0x3   :  { %v45_v3 = vsub.f32 %v37_v0, %v41_v1  ;;  %v47_v7 = vsub.f32 %v39_v2, %v43_v4  ;;  %v46_v8 = vsub.f32 %v38_v5, %v42_v6  ;;  %v40_v9 = vld [vmem:[%s259_s0 + $0x18] sm:$0xff] }
   0x4   :  { %v44_v10 = vld [vmem:[%s260_s1 + $0x18] sm:$0xff] }
   0x5   :  { %v49_v11 = vmul.f32 %v45_v3, %v45_v3  ;;  %v48_v12 = vsub.f32 %v40_v9, %v44_v10 }
   0x6   :  { %8 = vsyncpa [#allocation5], 0  ;;  %v51_v13 = vmul.f32 %v47_v7, %v47_v7  ;;  %v50_v14 = vmul.f32 %v46_v8, %v46_v8  ;;  %v75_v20 = vld [vmem:[%s261_s2] sm:$0xff]  ;;  %vm88_vm1 = vcmask 7168   ;;  %v76_v22 = vld [vmem:[%s261_s2 + $0x8] sm:$0xff]  ;;  %vm19_vm2 = vcmask 0  }
   0x7   :  { %v54_v15 = vsel %vm53_vm0, %v49_v11, 0.0  ;;  %v52_v16 = vmul.f32 %v48_v12, %v48_v12  ;;  %v110_v21 = vsel %vm88_vm1, %v75_v20, 0.0  ;;  %v111_v23 = vsel %vm88_vm1, %v76_v22, 0.0  ;;  %v77_v24 = vld [vmem:[%s261_s2 + $0x10] sm:$0xff]  ;;  %v78_v27 = vld [vmem:[%s261_s2 + $0x18] sm:$0xff]  ;;  %s182_s8 = smov [#allocation4]  }
   0x8   :  { %55 = vadd.xlane.f32.xlu0 %v54_v15  ;;  %v60_v17 = vsel %vm53_vm0, %v51_v13, 0.0  ;;  %v57_v18 = vsel %vm53_vm0, %v50_v14, 0.0  ;;  %v112_v25 = vadd.f32 %v111_v23, %v110_v21  ;;  %v113_v26 = vsel %vm88_vm1, %v77_v24, 0.0  ;;  %s143_s9 = sshll.u32 %s182_s8, 4  ;;  %s144_s9 = int_to_ptr.vmem [resolvable:$true] %s143_s9 }
   0x9   :  { %61 = vadd.xlane.f32.xlu1 %v60_v17  ;;  %v63_v19 = vsel %vm53_vm0, %v52_v16, 0.0  ;;  %v115_v29 = vsel %vm88_vm1, %v78_v27, 0.0  ;;  %v181_v50 = vmov 0.0   ;;  %s159_s10 = scalar_lea.vmem %s144_s9, 16  ;;  %s163_s11 = scalar_lea.vmem %s144_s9, 32 }
   0xa   :  { %v114_v28 = vadd.f32 %v113_v26, %v112_v25  ;;  %20 = vst.msk [vmem:[#allocation2] sm:$0x1] %vm19_vm2, %v181_v50  ;;  %21 = vst.msk [vmem:[#allocation3] sm:$0x1] %vm19_vm2, %v181_v50  ;;  %p160_p0 = scmp.ne.s32.totalorder %s144_s9, %s159_s10  ;;  %p164_p1 = scmp.lt.s32.totalorder %s144_s9, %s144_s9 }
   0xb   :  { %p165_p2 = scmp.lt.s32.totalorder %s163_s11, %s159_s10 }
   0xc   :  { %58 = vadd.xlane.f32.xlu0 %v57_v18  ;;  %v116_v30 = vadd.f32 %v115_v29, %v114_v28 }
   0xd   :  { %64 = vadd.xlane.f32.xlu1 %v63_v19  ;;  %p166_p3 = por %p165_p2, %p164_p1 }
   0xf   :  { %p167_p4 = pnand %p166_p3, %p160_p0 }
  0x11   :  { %117 = vadd.xlane.f32.xlu1 %v116_v30  ;;  %v83_v1 = vld [vmem:[#allocation2] sm:$0x1]  ;;  %v109_v2 = vld [vmem:[#allocation3] sm:$0x1] }
  0x91   :  { %v56_v31 = vpop.xlane.xlu0 %55 }
  0x92   :  { %v67_v32 = vmul.f32 0.020833334, %v56_v31  ;;  %v62_v33 = vpop.xlane.xlu1 %61 }
  0x93   :  { %v69_v34 = vmul.f32 0.020833334, %v62_v33 }
  0x94   :  { %v84_v36 = vmul.f32 %v75_v20, %v67_v32 }
  0x95   :  { %v59_v35 = vpop.xlane.xlu0 %58  ;;  %v86_v40 = vmul.f32 %v77_v24, %v69_v34 }
  0x96   :  { %v68_v37 = vmul.f32 0.020833334, %v59_v35  ;;  %v65_v38 = vpop.xlane.xlu1 %64  ;;  %v89_v43 = vsel %vm88_vm1, %v84_v36, 0.0 }
  0x97   :  { %v70_v39 = vmul.f32 0.020833334, %v65_v38  ;;  %v92_v46 = vsel %vm88_vm1, %v86_v40, 0.0 }
  0x98   :  { %v85_v41 = vmul.f32 %v76_v22, %v68_v37 }
  0x99   :  { %v87_v42 = vmul.f32 %v78_v27, %v70_v39 }
  0x9a   :  { %v90_v44 = vsel %vm88_vm1, %v85_v41, 0.0  ;;  %v118_v51 = vpop.xlane.xlu1 %117 }
  0x9b   :  { %v91_v45 = vadd.f32 %v90_v44, %v89_v43  ;;  %v94_v47 = vsel %vm88_vm1, %v87_v42, 0.0  ;;  %v119_v52 = vrot.slane %v118_v51, 4 }
  0x9d   :  { %v93_v48 = vadd.f32 %v92_v46, %v91_v45  ;;  %v120_v53 = vadd.f32 %v119_v52, %v118_v51 }
  0x9f   :  { %v95_v49 = vadd.f32 %v94_v47, %v93_v48  ;;  %v121_v54 = vrot.slane %v120_v53, 2 }
  0xa1   :  { %96 = vadd.xlane.f32.xlu0 %v95_v49  ;;  %v122_v58 = vadd.f32 %v121_v54, %v120_v53 }
  0xa3   :  { %v123_v61 = vrot.slane %v122_v58, 1 }
  0xa5   :  { %v124_v0 = vadd.f32 %v123_v61, %v122_v58 }
 0x12a   :  { %v97_v55 = vpop.xlane.xlu0 %96 }
 0x12b   :  { %v98_v56 = vrot.slane %v97_v55, 4 }
 0x12d   :  { %v99_v57 = vadd.f32 %v98_v56, %v97_v55 }
 0x12f   :  { %v100_v59 = vrot.slane %v99_v57, 2 }
 0x131   :  { %v101_v60 = vadd.f32 %v100_v59, %v99_v57 }
 0x133   :  { %v102_v62 = vrot.slane %v101_v60, 1 }
 0x135   :  { %v103_v63 = vadd.f32 %v102_v62, %v101_v60 }
 0x137   :  { %151 = vpush %v103_v63 }
 0x138   :  { %153 = vpush %v124_v0 }
 0x168   :  { %s152_s2 = spop %151 }
 0x169   :  { %v105_v3 = vstv %s152_s2  ;;  %s154_s7 = spop %153 }
 0x16a   :  { %v106_v4 = vadd.f32 %v105_v3, %v83_v1  ;;  %v126_v5 = vstv %s154_s7 }
 0x16b   :  { %v127_v6 = vadd.f32 %v126_v5, %v109_v2 }
 0x16c   :  { %108 = vst.msk [vmem:[#allocation2] sm:$0x1] %vm19_vm2, %v106_v4 }
 0x16d   :  { %128 = vst.msk [vmem:[#allocation3] sm:$0x1] %vm19_vm2, %v127_v6 }
 0x173   :  { %v132_v9 = vld [vmem:[#allocation2] sm:$0x1] }
 0x174   :  { %v133_v7 = vld [vmem:[#allocation3] sm:$0x1] }
 0x175   :  { %157 = vrcp.f32 %v133_v7 }
 0x182   :  { %v158_v8 = vpop.eup %157 }
 0x183   :  { %v135_v10 = vmul.f32 %v158_v8, %v132_v9 }
 0x185   :  { %136 = vst.msk [vmem:[#allocation4] sm:$0x1] %vm19_vm2, %v135_v10 }
 0x186   :  { %170 = shalt.err (!%p167_p4)
}
 0x187   :  { %146 = dma.vmem_to_hbm [thread:$0]  %s144_s9, 16, %s262_s3, [#allocation5]  }
 0x188   :  { %179 = dma.done.wait [#allocation5], 16  }
 0x189   :  { %180 = vsyncadd [#allocation5], 4294967280 }
 0x18a   :  { %150 = vsyncpa [#allocation5], 1 }

</bundles_post_ra>
